<compile_context>
chip_gen: v6e
topology: v6e:2x2x1
jax: 0.10.0
libtpu: 0.0.40
codegen_flags: <defaults>
</compile_context>

<pallas_src>
import functools

import jax
import jax.numpy as jnp
from jax import lax
from jax.experimental import pallas as pl
from jax.experimental.pallas import tpu as pltpu

# ----------------------------- config (synthetic) -----------------------------
EMBED_DIM = 16
LSTM_DIM = 32
LSTM_LAYERS = 2
REDUCE_DIM_ARC = 32
REDUCE_DIM_LABEL = 32

SIZES = {"vocab": 50, "postags": 12, "langs": 5, "deprels": 8}

B = 2    # batch
S = 8    # sequence length
BP = 8   # per-timestep row group, padded to one sublane tile


def _al8(x):
    return (x + 7) // 8 * 8


# ------------------------- packed-weight row layout -------------------------
_E, _H = EMBED_DIM, LSTM_DIM
_RA, _RL, _L = REDUCE_DIM_ARC, REDUCE_DIM_LABEL, SIZES["deprels"]
_V, _T = SIZES["vocab"], SIZES["postags"]
_BS = B * S
_SBP = S * BP
_LCOLS = _L * (_RL + 1)

# pack_lstm: lane width 8H
OFF_WIH0 = 0
OFF_WHH0 = _al8(OFF_WIH0 + 2 * _E)
OFF_WIH1 = _al8(OFF_WHH0 + 2 * _H)
OFF_WHH1 = _al8(OFF_WIH1 + 2 * _H)
OFF_B0 = _al8(OFF_WHH1 + 2 * _H)
OFF_B1 = OFF_B0 + 1
OFF_MASKF = OFF_B0 + 2
ROWS_LSTM = _al8(OFF_MASKF + 1)

# pack_head: lane width 4R = 128
OFF_WMLP = 0
OFF_BMLP = _al8(OFF_WMLP + 2 * _H)
OFF_PTM = _al8(OFF_BMLP + 1)
OFF_PBM = _al8(OFF_PTM + _SBP)
OFF_WARC = _al8(OFF_PBM + _BS)
OFF_BARC = _al8(OFF_WARC + _RA)
OFF_EMB = _al8(OFF_BARC + 1)
OFF_BLKM = _al8(OFF_EMB + _V + _T)
OFF_FOLD = _al8(OFF_BLKM + _BS)
OFF_CMOD = _al8(OFF_FOLD + _BS)
ROWS_HEAD = _al8(OFF_CMOD + 1)

# pack_label: lane width L*(RL+1)
OFF_WLAB = 0
OFF_BLAB = OFF_WLAB + _RL
OFF_ONES = OFF_BLAB + 1
OFF_DEPE = _al8(OFF_ONES + 1)
ROWS_LAB = _al8(OFF_DEPE + _RL)


# ------------------------------ fused parser kernel ------------------------------
def parser_kernel(idx_ref, wl_ref, wh_ref, wlab_ref, yhead_ref, ylabel_ref,
                  h0buf, h1buf):
    E, H = EMBED_DIM, LSTM_DIM
    RA, RL, L = REDUCE_DIM_ARC, REDUCE_DIM_LABEL, SIZES["deprels"]
    V, T = SIZES["vocab"], SIZES["postags"]
    Sq, Bt, Bp, BS = S, B, BP, B * S
    f32 = jnp.float32

    # ---------------- in-kernel embedding gather (one-hot matmul) ----------------
    idx = idx_ref[...]                                           # [BS, 2] int32
    f_col = idx[:, 0:1]
    t_col = idx[:, 1:2]
    vcol = lax.broadcasted_iota(jnp.int32, (BS, V + T), 1)
    onehot_emb = jnp.where(vcol < V,
                           (f_col == vcol).astype(f32),
                           (t_col == vcol - V).astype(f32))      # [BS, V+T]
    emb_tab = wh_ref[OFF_EMB:OFF_EMB + V + T, 0:2 * E]           # [V+T, 2E] block-diag
    x_bm = jnp.dot(onehot_emb, emb_tab,
                   preferred_element_type=f32)                   # [BS, 2E] batch-major

    # scatter to time-major padded rows (r = t*Bp + b), zeros for padded batch rows
    p_tm = wh_ref[OFF_PTM:OFF_PTM + Sq * Bp, 0:BS]               # [S*Bp, BS]
    x_tm = jnp.dot(p_tm, x_bm, preferred_element_type=f32)       # [S*Bp, 2E]

    # ---------------- BiLSTM: 2 layers, fwd+bwd fused per timestep ----------------
    fwd_lane = wl_ref[OFF_MASKF:OFF_MASKF + 1, :] > 0.5          # [1, 8H] fwd-gate lanes

    def run_layer(x_in, in_rows, wih_off, whh_off, b_off, dst):
        wih = wl_ref[wih_off:wih_off + in_rows, :]               # [in, 8H]
        whh = wl_ref[whh_off:whh_off + 2 * H, :]                 # [2H, 8H] block-diag
        bias = wl_ref[b_off:b_off + 1, :]                        # [1, 8H]
        # hoisted input projection for both directions (gates interleaved per gate)
        gx = jnp.dot(x_in, wih, preferred_element_type=f32) + bias   # [S*Bp, 8H]
        h = jnp.zeros((Bp, 2 * H), f32)                          # fwd lanes [0:H], bwd [H:2H]
        c = jnp.zeros((Bp, 2 * H), f32)
        for i in range(Sq):                                      # fully unrolled, static
            tf, tb = i, Sq - 1 - i
            gsel = jnp.where(fwd_lane,
                             gx[tf * Bp:(tf + 1) * Bp, :],
                             gx[tb * Bp:(tb + 1) * Bp, :])       # [Bp, 8H]
            g = gsel + jnp.dot(h, whh, preferred_element_type=f32)
            i_g = jax.nn.sigmoid(g[:, 0:2 * H])
            f_g = jax.nn.sigmoid(g[:, 2 * H:4 * H])
            c_in = jnp.tanh(g[:, 4 * H:6 * H])
            o_g = jax.nn.sigmoid(g[:, 6 * H:8 * H])
            c = f_g * c + i_g * c_in
            h = o_g * jnp.tanh(c)
            # 8-sublane-aligned row-block stores; fwd / bwd lane halves in place
            dst[tf * Bp:(tf + 1) * Bp, 0:H] = h[:, 0:H]
            dst[tb * Bp:(tb + 1) * Bp, H:2 * H] = h[:, H:2 * H]

    run_layer(x_tm, 2 * E, OFF_WIH0, OFF_WHH0, OFF_B0, h0buf)
    run_layer(h0buf[...], 2 * H, OFF_WIH1, OFF_WHH1, OFF_B1, h1buf)

    # ---------------- batched epilogue (no per-batch loop) ----------------
    p_bm = wh_ref[OFF_PBM:OFF_PBM + BS, 0:Sq * Bp]               # [BS, S*Bp]
    o_bm = jnp.dot(p_bm, h1buf[...], preferred_element_type=f32) # [BS, 2H] batch-major

    w_mlp = wh_ref[OFF_WMLP:OFF_WMLP + 2 * H, :]                 # [2H, 4R]
    b_mlp = wh_ref[OFF_BMLP:OFF_BMLP + 1, :]
    mlp = jnp.maximum(jnp.dot(o_bm, w_mlp, preferred_element_type=f32) + b_mlp, 0.0)
    red_head = mlp[:, 0:RA]
    red_dep = mlp[:, RA:2 * RA]
    red_dl_head = mlp[:, 2 * RA:2 * RA + RL]
    red_dl_dep = mlp[:, 2 * RA + RL:2 * RA + 2 * RL]

    # arc biaffine over the whole batch with a same-batch block mask
    warc_m = wh_ref[OFF_WARC:OFF_WARC + RA, 0:RA]
    warc_b = wh_ref[OFF_BARC:OFF_BARC + 1, 0:RA]
    blockm = wh_ref[OFF_BLKM:OFF_BLKM + BS, 0:BS]                # [BS, BS]
    fold = wh_ref[OFF_FOLD:OFF_FOLD + BS, 0:Sq]                  # [BS, S]
    cmod = wh_ref[OFF_CMOD:OFF_CMOD + 1, 0:BS]                   # [1, BS] (c % S)

    affine = jnp.dot(red_head, warc_m, preferred_element_type=f32) + warc_b
    full = jnp.dot(affine, red_dep.T, preferred_element_type=f32)        # [BS, BS]
    scores = jnp.dot(full * blockm, fold, preferred_element_type=f32)    # [BS, S]

    # argmax over heads (first-max tie-break) + gather of selected-head features
    col_s = lax.broadcasted_iota(jnp.int32, (BS, Sq), 1).astype(f32)
    mx = jnp.max(scores, axis=1, keepdims=True)
    amax = jnp.min(jnp.where(scores >= mx, col_s, float(Sq)), axis=1, keepdims=True)
    onehot_full = blockm * (cmod == amax).astype(f32)                    # [BS, BS]
    selected = jnp.dot(onehot_full, red_dl_head, preferred_element_type=f32)  # [BS, RL]

    # label biaffine for all labels at once (no per-label loop)
    wlab_m = wlab_ref[OFF_WLAB:OFF_WLAB + RL, :]                 # [RL, L*(RL+1)]
    wlab_b = wlab_ref[OFF_BLAB:OFF_BLAB + 1, :]
    onesp = wlab_ref[OFF_ONES:OFF_ONES + 1, :]
    depexp = wlab_ref[OFF_DEPE:OFF_DEPE + RL, :]
    A = jnp.dot(selected, wlab_m, preferred_element_type=f32) + wlab_b   # [BS, 264]
    D = jnp.dot(red_dl_dep, depexp, preferred_element_type=f32) + onesp  # [BS, 264]

    cols = L * (RL + 1)
    ci = lax.broadcasted_iota(jnp.int32, (cols, L), 0)
    lo = lax.broadcasted_iota(jnp.int32, (cols, L), 1) * (RL + 1)
    gsum = ((ci >= lo) & (ci < lo + (RL + 1))).astype(f32)               # [264, L]
    logits = jnp.dot(A * D, gsum, preferred_element_type=f32)            # [BS, L]

    # outputs: one aligned row-block store per batch element (offsets 0, 8)
    for bi in range(Bt):
        yhead_ref[bi] = scores[bi * Sq:(bi + 1) * Sq, :]
        ylabel_ref[bi] = logits[bi * Sq:(bi + 1) * Sq, :]


# ------------------------------ parameter init ------------------------------
def init_params(key):
    def nrm(k, shape, scale=0.1):
        return scale * jax.random.normal(k, shape, dtype=jnp.float32)

    keys = iter(jax.random.split(key, 64))
    params = {
        "emb_forms": nrm(next(keys), (SIZES["vocab"], EMBED_DIM)),
        "emb_tags": nrm(next(keys), (SIZES["postags"], EMBED_DIM)),
        "emb_langs": nrm(next(keys), (SIZES["langs"], EMBED_DIM)),  # unused in forward
    }

    lstm_layers = []
    in_dim = 2 * EMBED_DIM
    for _ in range(LSTM_LAYERS):
        layer = {}
        for d in ("f", "b"):
            layer[f"wih_{d}"] = nrm(next(keys), (in_dim, 4 * LSTM_DIM))
            layer[f"whh_{d}"] = nrm(next(keys), (LSTM_DIM, 4 * LSTM_DIM))
            layer[f"b_{d}"] = nrm(next(keys), (1, 4 * LSTM_DIM))  # b_ih + b_hh folded
        lstm_layers.append(layer)
        in_dim = 2 * LSTM_DIM
    params["lstm"] = lstm_layers

    d2h = 2 * LSTM_DIM
    params["w_head"] = nrm(next(keys), (d2h, REDUCE_DIM_ARC))
    params["b_head"] = nrm(next(keys), (1, REDUCE_DIM_ARC))
    params["w_dep"] = nrm(next(keys), (d2h, REDUCE_DIM_ARC))
    params["b_dep"] = nrm(next(keys), (1, REDUCE_DIM_ARC))
    params["w_deprel_head"] = nrm(next(keys), (d2h, REDUCE_DIM_LABEL))
    params["b_deprel_head"] = nrm(next(keys), (1, REDUCE_DIM_LABEL))
    params["w_deprel_dep"] = nrm(next(keys), (d2h, REDUCE_DIM_LABEL))
    params["b_deprel_dep"] = nrm(next(keys), (1, REDUCE_DIM_LABEL))

    params["w_arc_biaffine"] = nrm(next(keys), (REDUCE_DIM_ARC + 1, REDUCE_DIM_ARC))
    params["w_label_biaffine"] = nrm(
        next(keys), (SIZES["deprels"], REDUCE_DIM_LABEL + 1, REDUCE_DIM_LABEL + 1))
    return params


# ------------------------- host-side packing (constant-folded under jit) -------------------------
def build_packs(params):
    E, H = EMBED_DIM, LSTM_DIM
    RA, RL, L = REDUCE_DIM_ARC, REDUCE_DIM_LABEL, SIZES["deprels"]
    V, T = SIZES["vocab"], SIZES["postags"]

    def interleave_gates(wf, wb):
        # [., 4H] x2 -> [., 8H], lane order [i_f,i_b,f_f,f_b,g_f,g_b,o_f,o_b]
        parts = []
        for k in range(4):
            parts.append(wf[..., k * H:(k + 1) * H])
            parts.append(wb[..., k * H:(k + 1) * H])
        return jnp.concatenate(parts, axis=-1)

    def block_whh(whh_f, whh_b):
        blk = jnp.zeros((2 * H, 8 * H), jnp.float32)
        for k in range(4):
            blk = blk.at[0:H, (2 * k) * H:(2 * k + 1) * H].set(whh_f[:, k * H:(k + 1) * H])
            blk = blk.at[H:2 * H, (2 * k + 1) * H:(2 * k + 2) * H].set(whh_b[:, k * H:(k + 1) * H])
        return blk

    lstm = params["lstm"]
    pack_lstm = jnp.zeros((ROWS_LSTM, 8 * H), jnp.float32)
    pack_lstm = pack_lstm.at[OFF_WIH0:OFF_WIH0 + 2 * E].set(
        interleave_gates(lstm[0]["wih_f"], lstm[0]["wih_b"]))
    pack_lstm = pack_lstm.at[OFF_WHH0:OFF_WHH0 + 2 * H].set(
        block_whh(lstm[0]["whh_f"], lstm[0]["whh_b"]))
    pack_lstm = pack_lstm.at[OFF_WIH1:OFF_WIH1 + 2 * H].set(
        interleave_gates(lstm[1]["wih_f"], lstm[1]["wih_b"]))
    pack_lstm = pack_lstm.at[OFF_WHH1:OFF_WHH1 + 2 * H].set(
        block_whh(lstm[1]["whh_f"], lstm[1]["whh_b"]))
    pack_lstm = pack_lstm.at[OFF_B0:OFF_B0 + 1].set(
        interleave_gates(lstm[0]["b_f"], lstm[0]["b_b"]))
    pack_lstm = pack_lstm.at[OFF_B1:OFF_B1 + 1].set(
        interleave_gates(lstm[1]["b_f"], lstm[1]["b_b"]))
    pack_lstm = pack_lstm.at[OFF_MASKF:OFF_MASKF + 1].set(
        interleave_gates(jnp.ones((1, 4 * H), jnp.float32),
                         jnp.zeros((1, 4 * H), jnp.float32)))

    pack_head = jnp.zeros((ROWS_HEAD, 2 * RA + 2 * RL), jnp.float32)
    w_mlp = jnp.concatenate([params["w_head"], params["w_dep"],
                             params["w_deprel_head"], params["w_deprel_dep"]], axis=1)
    b_mlp = jnp.concatenate([params["b_head"], params["b_dep"],
                             params["b_deprel_head"], params["b_deprel_dep"]], axis=1)
    pack_head = pack_head.at[OFF_WMLP:OFF_WMLP + 2 * H].set(w_mlp)
    pack_head = pack_head.at[OFF_BMLP:OFF_BMLP + 1].set(b_mlp)

    # time-major scatter / batch-major gather permutation constants
    r = jnp.arange(S * BP)
    b_of, s_of = r % BP, r // BP
    p_tm = ((b_of[:, None] < B) &
            (jnp.arange(B * S)[None, :] == (b_of * S + s_of)[:, None])).astype(jnp.float32)
    r2 = jnp.arange(B * S)
    p_bm = (jnp.arange(S * BP)[None, :] ==
            ((r2 % S) * BP + r2 // S)[:, None]).astype(jnp.float32)
    pack_head = pack_head.at[OFF_PTM:OFF_PTM + S * BP, 0:B * S].set(p_tm)
    pack_head = pack_head.at[OFF_PBM:OFF_PBM + B * S, 0:S * BP].set(p_bm)

    warc = params["w_arc_biaffine"]
    pack_head = pack_head.at[OFF_WARC:OFF_WARC + RA, 0:RA].set(warc[:RA, :])
    pack_head = pack_head.at[OFF_BARC:OFF_BARC + 1, 0:RA].set(warc[RA:RA + 1, :])

    emb_tab = jnp.zeros((V + T, 2 * E), jnp.float32)
    emb_tab = emb_tab.at[0:V, 0:E].set(params["emb_forms"])
    emb_tab = emb_tab.at[V:V + T, E:2 * E].set(params["emb_tags"])
    pack_head = pack_head.at[OFF_EMB:OFF_EMB + V + T, 0:2 * E].set(emb_tab)

    rr = jnp.arange(B * S)
    blockm = ((rr[:, None] // S) == (rr[None, :] // S)).astype(jnp.float32)
    fold = ((rr[:, None] % S) == jnp.arange(S)[None, :]).astype(jnp.float32)
    cmod = (rr % S).astype(jnp.float32)[None, :]
    pack_head = pack_head.at[OFF_BLKM:OFF_BLKM + B * S, 0:B * S].set(blockm)
    pack_head = pack_head.at[OFF_FOLD:OFF_FOLD + B * S, 0:S].set(fold)
    pack_head = pack_head.at[OFF_CMOD:OFF_CMOD + 1, 0:B * S].set(cmod)

    cols = L * (RL + 1)
    pack_label = jnp.zeros((ROWS_LAB, cols), jnp.float32)
    wlab = params["w_label_biaffine"]                            # [L, RL+1, RL+1]
    w_r = jnp.transpose(wlab, (1, 0, 2)).reshape(RL + 1, cols)
    pack_label = pack_label.at[OFF_WLAB:OFF_WLAB + RL].set(w_r[:RL, :])
    pack_label = pack_label.at[OFF_BLAB:OFF_BLAB + 1].set(w_r[RL:RL + 1, :])
    q_idx = jnp.arange(cols) % (RL + 1)
    pack_label = pack_label.at[OFF_ONES:OFF_ONES + 1].set(
        (q_idx == RL).astype(jnp.float32)[None, :])
    pack_label = pack_label.at[OFF_DEPE:OFF_DEPE + RL].set(
        (q_idx[None, :] == jnp.arange(RL)[:, None]).astype(jnp.float32))

    return pack_lstm, pack_head, pack_label


# ------------------------------ forward ------------------------------
def cs_parser_forward(params, forms, tags, pack):
    # TODO(synk): `pack` (sequence lengths) is assumed full-length; ragged
    # batches would need masking of the backward LSTM / argmax.
    del pack
    assert forms.shape == (B, S) and tags.shape == (B, S)

    # Weight packing: params are constants under jit -> constant-folded.
    pack_lstm, pack_head, pack_label = build_packs(params)

    # Only runtime-varying host op: flatten/stack the int indices for the
    # in-kernel embedding gather (tiny int32 array).
    idx = jnp.stack([forms.reshape(-1), tags.reshape(-1)], axis=1).astype(jnp.int32)

    vmem = pl.BlockSpec(memory_space=pltpu.MemorySpace.VMEM)
    y_head, y_label = pl.pallas_call(
        parser_kernel,
        out_shape=(jax.ShapeDtypeStruct((B, S, S), jnp.float32),
                   jax.ShapeDtypeStruct((B, S, SIZES["deprels"]), jnp.float32)),
        in_specs=[vmem, vmem, vmem, vmem],
        out_specs=(vmem, vmem),
        scratch_shapes=[pltpu.VMEM((S * BP, 2 * LSTM_DIM), jnp.float32),   # layer-0 out
                        pltpu.VMEM((S * BP, 2 * LSTM_DIM), jnp.float32)],  # layer-1 out
    )(idx, pack_lstm, pack_head, pack_label)
    return y_head, y_label


# ------------------------------ main ------------------------------
if __name__ == "__main__":
    key = jax.random.PRNGKey(0)
    k_param, k_forms, k_tags = jax.random.split(key, 3)

    params = init_params(k_param)
    forms = jax.random.randint(k_forms, (B, S), 0, SIZES["vocab"], dtype=jnp.int32)
    tags = jax.random.randint(k_tags, (B, S), 0, SIZES["postags"], dtype=jnp.int32)
    pack = jnp.full((B,), S, dtype=jnp.int32)  # full-length sequences

    fwd = jax.jit(functools.partial(cs_parser_forward, params))
    y_pred_head, y_pred_label = fwd(forms, tags, pack)
    jax.block_until_ready((y_pred_head, y_pred_label))

    assert y_pred_head.shape == (B, S, S)
    assert y_pred_label.shape == (B, S, SIZES["deprels"])
    print("KERNEL_OK")
</pallas_src>

<mosaic_0001>
module attributes {stable_mosaic.version = 11 : i64} {
  func.func @parser_kernel(%arg0: memref<16x2xi32, #tpu.memory_space<vmem>>, %arg1: memref<232x256xf32, #tpu.memory_space<vmem>>, %arg2: memref<296x128xf32, #tpu.memory_space<vmem>>, %arg3: memref<72x264xf32, #tpu.memory_space<vmem>>, %arg4: memref<2x8x8xf32, #tpu.memory_space<vmem>>, %arg5: memref<2x8x8xf32, #tpu.memory_space<vmem>>, %arg6: memref<64x64xf32, #tpu.memory_space<vmem>>, %arg7: memref<64x64xf32, #tpu.memory_space<vmem>>) attributes {dimension_semantics = [], scalar_prefetch = 0 : i64, scratch_operands = 2 : i64, tpu.core_type = #tpu.core_type<tc>} {
    %c0 = arith.constant 0 : index
    %c0_0 = arith.constant 0 : index
    %0 = vector.load %arg0[%c0, %c0_0] : memref<16x2xi32, #tpu.memory_space<vmem>>, vector<16x2xi32>
    %1 = vector.extract_strided_slice %0 {offsets = [0, 0], sizes = [16, 1], strides = [1, 1]} : vector<16x2xi32> to vector<16x1xi32>
    %2 = vector.extract_strided_slice %0 {offsets = [0, 1], sizes = [16, 1], strides = [1, 1]} : vector<16x2xi32> to vector<16x1xi32>
    %3 = tpu.iota {dimensions = array<i32: 1>} : vector<16x62xi32>
    %c50_i32 = arith.constant 50 : i32
    %4 = vector.broadcast %c50_i32 : i32 to vector<16x62xi32>
    %5 = arith.cmpi slt, %3, %4 : vector<16x62xi32>
    %6 = vector.broadcast %1 : vector<16x1xi32> to vector<16x62xi32>
    %7 = arith.cmpi eq, %6, %3 : vector<16x62xi32>
    %8 = arith.extui %7 : vector<16x62xi1> to vector<16x62xi32>
    %9 = arith.sitofp %8 : vector<16x62xi32> to vector<16x62xf32>
    %c50_i32_1 = arith.constant 50 : i32
    %10 = vector.broadcast %c50_i32_1 : i32 to vector<16x62xi32>
    %11 = arith.subi %3, %10 : vector<16x62xi32>
    %12 = vector.broadcast %2 : vector<16x1xi32> to vector<16x62xi32>
    %13 = arith.cmpi eq, %12, %11 : vector<16x62xi32>
    %14 = arith.extui %13 : vector<16x62xi1> to vector<16x62xi32>
    %15 = arith.sitofp %14 : vector<16x62xi32> to vector<16x62xf32>
    %16 = arith.select %5, %9, %15 : vector<16x62xi1>, vector<16x62xf32>
    %c192 = arith.constant 192 : index
    %c0_2 = arith.constant 0 : index
    %17 = vector.load %arg2[%c192, %c0_2] : memref<296x128xf32, #tpu.memory_space<vmem>>, vector<62x32xf32>
    %cst = arith.constant dense<0.000000e+00> : vector<16x32xf32>
    %18 = tpu.matmul %16, %17, %cst {dimension_numbers = #tpu.dot_dimension_numbers<[1], [0], [0], [1], [0, 0, 1, 1], [], []>} : vector<16x62xf32>, vector<62x32xf32>, vector<16x32xf32> -> vector<16x32xf32>
    %c72 = arith.constant 72 : index
    %c0_3 = arith.constant 0 : index
    %19 = vector.load %arg2[%c72, %c0_3] : memref<296x128xf32, #tpu.memory_space<vmem>>, vector<64x16xf32>
    %cst_4 = arith.constant dense<0.000000e+00> : vector<64x32xf32>
    %20 = tpu.matmul %19, %18, %cst_4 {dimension_numbers = #tpu.dot_dimension_numbers<[1], [0], [0], [1], [0, 0, 1, 1], [], []>} : vector<64x16xf32>, vector<16x32xf32>, vector<64x32xf32> -> vector<64x32xf32>
    %c226 = arith.constant 226 : index
    %c0_5 = arith.constant 0 : index
    %21 = vector.load %arg1[%c226, %c0_5] : memref<232x256xf32, #tpu.memory_space<vmem>>, vector<1x256xf32>
    %cst_6 = arith.constant 5.000000e-01 : f32
    %22 = vector.broadcast %cst_6 : f32 to vector<1x256xf32>
    %23 = arith.cmpf ogt, %21, %22 : vector<1x256xf32>
    %c0_7 = arith.constant 0 : index
    %c0_8 = arith.constant 0 : index
    %24 = vector.load %arg1[%c0_7, %c0_8] : memref<232x256xf32, #tpu.memory_space<vmem>>, vector<32x256xf32>
    %c32 = arith.constant 32 : index
    %c0_9 = arith.constant 0 : index
    %25 = vector.load %arg1[%c32, %c0_9] : memref<232x256xf32, #tpu.memory_space<vmem>>, vector<64x256xf32>
    %c224 = arith.constant 224 : index
    %c0_10 = arith.constant 0 : index
    %26 = vector.load %arg1[%c224, %c0_10] : memref<232x256xf32, #tpu.memory_space<vmem>>, vector<1x256xf32>
    %cst_11 = arith.constant dense<0.000000e+00> : vector<64x256xf32>
    %27 = tpu.matmul %20, %24, %cst_11 {dimension_numbers = #tpu.dot_dimension_numbers<[1], [0], [0], [1], [0, 0, 1, 1], [], []>} : vector<64x32xf32>, vector<32x256xf32>, vector<64x256xf32> -> vector<64x256xf32>
    %28 = vector.broadcast %26 : vector<1x256xf32> to vector<64x256xf32>
    %29 = arith.addf %27, %28 : vector<64x256xf32>
    %cst_12 = arith.constant 0.000000e+00 : f32
    %30 = vector.broadcast %cst_12 : f32 to vector<8x64xf32>
    %cst_13 = arith.constant 0.000000e+00 : f32
    %31 = vector.broadcast %cst_13 : f32 to vector<8x64xf32>
    %32 = vector.extract_strided_slice %29 {offsets = [0, 0], sizes = [8, 256], strides = [1, 1]} : vector<64x256xf32> to vector<8x256xf32>
    %33 = vector.extract_strided_slice %29 {offsets = [56, 0], sizes = [8, 256], strides = [1, 1]} : vector<64x256xf32> to vector<8x256xf32>
    %34 = vector.shape_cast %23 : vector<1x256xi1> to vector<1x256xi1>
    %35 = vector.broadcast %34 : vector<1x256xi1> to vector<8x256xi1>
    %36 = arith.select %35, %32, %33 : vector<8x256xi1>, vector<8x256xf32>
    %cst_14 = arith.constant dense<0.000000e+00> : vector<8x256xf32>
    %37 = tpu.matmul %30, %25, %cst_14 {dimension_numbers = #tpu.dot_dimension_numbers<[1], [0], [0], [1], [0, 0, 1, 1], [], []>} : vector<8x64xf32>, vector<64x256xf32>, vector<8x256xf32> -> vector<8x256xf32>
    %38 = arith.addf %36, %37 : vector<8x256xf32>
    %39 = vector.extract_strided_slice %38 {offsets = [0, 0], sizes = [8, 64], strides = [1, 1]} : vector<8x256xf32> to vector<8x64xf32>
    %40 = arith.negf %39 : vector<8x64xf32>
    %41 = math.exp %40 : vector<8x64xf32>
    %cst_15 = arith.constant 1.000000e+00 : f32
    %42 = vector.broadcast %cst_15 : f32 to vector<8x64xf32>
    %43 = arith.addf %42, %41 : vector<8x64xf32>
    %44 = arith.divf %42, %43 : vector<8x64xf32>
    %45 = vector.extract_strided_slice %38 {offsets = [0, 64], sizes = [8, 64], strides = [1, 1]} : vector<8x256xf32> to vector<8x64xf32>
    %46 = arith.negf %45 : vector<8x64xf32>
    %47 = math.exp %46 : vector<8x64xf32>
    %cst_16 = arith.constant 1.000000e+00 : f32
    %48 = vector.broadcast %cst_16 : f32 to vector<8x64xf32>
    %49 = arith.addf %48, %47 : vector<8x64xf32>
    %50 = arith.divf %48, %49 : vector<8x64xf32>
    %51 = vector.extract_strided_slice %38 {offsets = [0, 128], sizes = [8, 64], strides = [1, 1]} : vector<8x256xf32> to vector<8x64xf32>
    %52 = math.tanh %51 : vector<8x64xf32>
    %53 = vector.extract_strided_slice %38 {offsets = [0, 192], sizes = [8, 64], strides = [1, 1]} : vector<8x256xf32> to vector<8x64xf32>
    %54 = arith.negf %53 : vector<8x64xf32>
    %55 = math.exp %54 : vector<8x64xf32>
    %cst_17 = arith.constant 1.000000e+00 : f32
    %56 = vector.broadcast %cst_17 : f32 to vector<8x64xf32>
    %57 = arith.addf %56, %55 : vector<8x64xf32>
    %58 = arith.divf %56, %57 : vector<8x64xf32>
    %59 = arith.mulf %50, %31 : vector<8x64xf32>
    %60 = arith.mulf %44, %52 : vector<8x64xf32>
    %61 = arith.addf %59, %60 : vector<8x64xf32>
    %62 = math.tanh %61 : vector<8x64xf32>
    %63 = arith.mulf %58, %62 : vector<8x64xf32>
    %64 = vector.extract_strided_slice %63 {offsets = [0, 0], sizes = [8, 32], strides = [1, 1]} : vector<8x64xf32> to vector<8x32xf32>
    %c0_18 = arith.constant 0 : index
    %c0_19 = arith.constant 0 : index
    %65 = vector.load %arg6[%c0_18, %c0_19] : memref<64x64xf32, #tpu.memory_space<vmem>>, vector<8x32xf32>
    tpu.vector_store %arg6[%c0_18, %c0_19], %64 {strides = array<i32>} : memref<64x64xf32, #tpu.memory_space<vmem>>, vector<8x32xf32>,
    %66 = vector.extract_strided_slice %63 {offsets = [0, 32], sizes = [8, 32], strides = [1, 1]} : vector<8x64xf32> to vector<8x32xf32>
    %c56 = arith.constant 56 : index
    %c32_20 = arith.constant 32 : index
    %67 = vector.load %arg6[%c56, %c32_20] : memref<64x64xf32, #tpu.memory_space<vmem>>, vector<8x32xf32>
    tpu.vector_store %arg6[%c56, %c32_20], %66 {strides = array<i32>} : memref<64x64xf32, #tpu.memory_space<vmem>>, vector<8x32xf32>,
    %68 = vector.extract_strided_slice %29 {offsets = [8, 0], sizes = [8, 256], strides = [1, 1]} : vector<64x256xf32> to vector<8x256xf32>
    %69 = vector.extract_strided_slice %29 {offsets = [48, 0], sizes = [8, 256], strides = [1, 1]} : vector<64x256xf32> to vector<8x256xf32>
    %70 = vector.shape_cast %23 : vector<1x256xi1> to vector<1x256xi1>
    %71 = vector.broadcast %70 : vector<1x256xi1> to vector<8x256xi1>
    %72 = arith.select %71, %68, %69 : vector<8x256xi1>, vector<8x256xf32>
    %cst_21 = arith.constant dense<0.000000e+00> : vector<8x256xf32>
    %73 = tpu.matmul %63, %25, %cst_21 {dimension_numbers = #tpu.dot_dimension_numbers<[1], [0], [0], [1], [0, 0, 1, 1], [], []>} : vector<8x64xf32>, vector<64x256xf32>, vector<8x256xf32> -> vector<8x256xf32>
    %74 = arith.addf %72, %73 : vector<8x256xf32>
    %75 = vector.extract_strided_slice %74 {offsets = [0, 0], sizes = [8, 64], strides = [1, 1]} : vector<8x256xf32> to vector<8x64xf32>
    %76 = arith.negf %75 : vector<8x64xf32>
    %77 = math.exp %76 : vector<8x64xf32>
    %cst_22 = arith.constant 1.000000e+00 : f32
    %78 = vector.broadcast %cst_22 : f32 to vector<8x64xf32>
    %79 = arith.addf %78, %77 : vector<8x64xf32>
    %80 = arith.divf %78, %79 : vector<8x64xf32>
    %81 = vector.extract_strided_slice %74 {offsets = [0, 64], sizes = [8, 64], strides = [1, 1]} : vector<8x256xf32> to vector<8x64xf32>
    %82 = arith.negf %81 : vector<8x64xf32>
    %83 = math.exp %82 : vector<8x64xf32>
    %cst_23 = arith.constant 1.000000e+00 : f32
    %84 = vector.broadcast %cst_23 : f32 to vector<8x64xf32>
    %85 = arith.addf %84, %83 : vector<8x64xf32>
    %86 = arith.divf %84, %85 : vector<8x64xf32>
    %87 = vector.extract_strided_slice %74 {offsets = [0, 128], sizes = [8, 64], strides = [1, 1]} : vector<8x256xf32> to vector<8x64xf32>
    %88 = math.tanh %87 : vector<8x64xf32>
    %89 = vector.extract_strided_slice %74 {offsets = [0, 192], sizes = [8, 64], strides = [1, 1]} : vector<8x256xf32> to vector<8x64xf32>
    %90 = arith.negf %89 : vector<8x64xf32>
    %91 = math.exp %90 : vector<8x64xf32>
    %cst_24 = arith.constant 1.000000e+00 : f32
    %92 = vector.broadcast %cst_24 : f32 to vector<8x64xf32>
    %93 = arith.addf %92, %91 : vector<8x64xf32>
    %94 = arith.divf %92, %93 : vector<8x64xf32>
    %95 = arith.mulf %86, %61 : vector<8x64xf32>
    %96 = arith.mulf %80, %88 : vector<8x64xf32>
    %97 = arith.addf %95, %96 : vector<8x64xf32>
    %98 = math.tanh %97 : vector<8x64xf32>
    %99 = arith.mulf %94, %98 : vector<8x64xf32>
    %100 = vector.extract_strided_slice %99 {offsets = [0, 0], sizes = [8, 32], strides = [1, 1]} : vector<8x64xf32> to vector<8x32xf32>
    %c8 = arith.constant 8 : index
    %c0_25 = arith.constant 0 : index
    %101 = vector.load %arg6[%c8, %c0_25] : memref<64x64xf32, #tpu.memory_space<vmem>>, vector<8x32xf32>
    tpu.vector_store %arg6[%c8, %c0_25], %100 {strides = array<i32>} : memref<64x64xf32, #tpu.memory_space<vmem>>, vector<8x32xf32>,
    %102 = vector.extract_strided_slice %99 {offsets = [0, 32], sizes = [8, 32], strides = [1, 1]} : vector<8x64xf32> to vector<8x32xf32>
    %c48 = arith.constant 48 : index
    %c32_26 = arith.constant 32 : index
    %103 = vector.load %arg6[%c48, %c32_26] : memref<64x64xf32, #tpu.memory_space<vmem>>, vector<8x32xf32>
    tpu.vector_store %arg6[%c48, %c32_26], %102 {strides = array<i32>} : memref<64x64xf32, #tpu.memory_space<vmem>>, vector<8x32xf32>,
    %104 = vector.extract_strided_slice %29 {offsets = [16, 0], sizes = [8, 256], strides = [1, 1]} : vector<64x256xf32> to vector<8x256xf32>
    %105 = vector.extract_strided_slice %29 {offsets = [40, 0], sizes = [8, 256], strides = [1, 1]} : vector<64x256xf32> to vector<8x256xf32>
    %106 = vector.shape_cast %23 : vector<1x256xi1> to vector<1x256xi1>
    %107 = vector.broadcast %106 : vector<1x256xi1> to vector<8x256xi1>
    %108 = arith.select %107, %104, %105 : vector<8x256xi1>, vector<8x256xf32>
    %cst_27 = arith.constant dense<0.000000e+00> : vector<8x256xf32>
    %109 = tpu.matmul %99, %25, %cst_27 {dimension_numbers = #tpu.dot_dimension_numbers<[1], [0], [0], [1], [0, 0, 1, 1], [], []>} : vector<8x64xf32>, vector<64x256xf32>, vector<8x256xf32> -> vector<8x256xf32>
    %110 = arith.addf %108, %109 : vector<8x256xf32>
    %111 = vector.extract_strided_slice %110 {offsets = [0, 0], sizes = [8, 64], strides = [1, 1]} : vector<8x256xf32> to vector<8x64xf32>
    %112 = arith.negf %111 : vector<8x64xf32>
    %113 = math.exp %112 : vector<8x64xf32>
    %cst_28 = arith.constant 1.000000e+00 : f32
    %114 = vector.broadcast %cst_28 : f32 to vector<8x64xf32>
    %115 = arith.addf %114, %113 : vector<8x64xf32>
    %116 = arith.divf %114, %115 : vector<8x64xf32>
    %117 = vector.extract_strided_slice %110 {offsets = [0, 64], sizes = [8, 64], strides = [1, 1]} : vector<8x256xf32> to vector<8x64xf32>
    %118 = arith.negf %117 : vector<8x64xf32>
    %119 = math.exp %118 : vector<8x64xf32>
    %cst_29 = arith.constant 1.000000e+00 : f32
    %120 = vector.broadcast %cst_29 : f32 to vector<8x64xf32>
    %121 = arith.addf %120, %119 : vector<8x64xf32>
    %122 = arith.divf %120, %121 : vector<8x64xf32>
    %123 = vector.extract_strided_slice %110 {offsets = [0, 128], sizes = [8, 64], strides = [1, 1]} : vector<8x256xf32> to vector<8x64xf32>
    %124 = math.tanh %123 : vector<8x64xf32>
    %125 = vector.extract_strided_slice %110 {offsets = [0, 192], sizes = [8, 64], strides = [1, 1]} : vector<8x256xf32> to vector<8x64xf32>
    %126 = arith.negf %125 : vector<8x64xf32>
    %127 = math.exp %126 : vector<8x64xf32>
    %cst_30 = arith.constant 1.000000e+00 : f32
    %128 = vector.broadcast %cst_30 : f32 to vector<8x64xf32>
    %129 = arith.addf %128, %127 : vector<8x64xf32>
    %130 = arith.divf %128, %129 : vector<8x64xf32>
    %131 = arith.mulf %122, %97 : vector<8x64xf32>
    %132 = arith.mulf %116, %124 : vector<8x64xf32>
    %133 = arith.addf %131, %132 : vector<8x64xf32>
    %134 = math.tanh %133 : vector<8x64xf32>
    %135 = arith.mulf %130, %134 : vector<8x64xf32>
    %136 = vector.extract_strided_slice %135 {offsets = [0, 0], sizes = [8, 32], strides = [1, 1]} : vector<8x64xf32> to vector<8x32xf32>
    %c16 = arith.constant 16 : index
    %c0_31 = arith.constant 0 : index
    %137 = vector.load %arg6[%c16, %c0_31] : memref<64x64xf32, #tpu.memory_space<vmem>>, vector<8x32xf32>
    tpu.vector_store %arg6[%c16, %c0_31], %136 {strides = array<i32>} : memref<64x64xf32, #tpu.memory_space<vmem>>, vector<8x32xf32>,
    %138 = vector.extract_strided_slice %135 {offsets = [0, 32], sizes = [8, 32], strides = [1, 1]} : vector<8x64xf32> to vector<8x32xf32>
    %c40 = arith.constant 40 : index
    %c32_32 = arith.constant 32 : index
    %139 = vector.load %arg6[%c40, %c32_32] : memref<64x64xf32, #tpu.memory_space<vmem>>, vector<8x32xf32>
    tpu.vector_store %arg6[%c40, %c32_32], %138 {strides = array<i32>} : memref<64x64xf32, #tpu.memory_space<vmem>>, vector<8x32xf32>,
    %140 = vector.extract_strided_slice %29 {offsets = [24, 0], sizes = [8, 256], strides = [1, 1]} : vector<64x256xf32> to vector<8x256xf32>
    %141 = vector.extract_strided_slice %29 {offsets = [32, 0], sizes = [8, 256], strides = [1, 1]} : vector<64x256xf32> to vector<8x256xf32>
    %142 = vector.shape_cast %23 : vector<1x256xi1> to vector<1x256xi1>
    %143 = vector.broadcast %142 : vector<1x256xi1> to vector<8x256xi1>
    %144 = arith.select %143, %140, %141 : vector<8x256xi1>, vector<8x256xf32>
    %cst_33 = arith.constant dense<0.000000e+00> : vector<8x256xf32>
    %145 = tpu.matmul %135, %25, %cst_33 {dimension_numbers = #tpu.dot_dimension_numbers<[1], [0], [0], [1], [0, 0, 1, 1], [], []>} : vector<8x64xf32>, vector<64x256xf32>, vector<8x256xf32> -> vector<8x256xf32>
    %146 = arith.addf %144, %145 : vector<8x256xf32>
    %147 = vector.extract_strided_slice %146 {offsets = [0, 0], sizes = [8, 64], strides = [1, 1]} : vector<8x256xf32> to vector<8x64xf32>
    %148 = arith.negf %147 : vector<8x64xf32>
    %149 = math.exp %148 : vector<8x64xf32>
    %cst_34 = arith.constant 1.000000e+00 : f32
    %150 = vector.broadcast %cst_34 : f32 to vector<8x64xf32>
    %151 = arith.addf %150, %149 : vector<8x64xf32>
    %152 = arith.divf %150, %151 : vector<8x64xf32>
    %153 = vector.extract_strided_slice %146 {offsets = [0, 64], sizes = [8, 64], strides = [1, 1]} : vector<8x256xf32> to vector<8x64xf32>
    %154 = arith.negf %153 : vector<8x64xf32>
    %155 = math.exp %154 : vector<8x64xf32>
    %cst_35 = arith.constant 1.000000e+00 : f32
    %156 = vector.broadcast %cst_35 : f32 to vector<8x64xf32>
    %157 = arith.addf %156, %155 : vector<8x64xf32>
    %158 = arith.divf %156, %157 : vector<8x64xf32>
    %159 = vector.extract_strided_slice %146 {offsets = [0, 128], sizes = [8, 64], strides = [1, 1]} : vector<8x256xf32> to vector<8x64xf32>
    %160 = math.tanh %159 : vector<8x64xf32>
    %161 = vector.extract_strided_slice %146 {offsets = [0, 192], sizes = [8, 64], strides = [1, 1]} : vector<8x256xf32> to vector<8x64xf32>
    %162 = arith.negf %161 : vector<8x64xf32>
    %163 = math.exp %162 : vector<8x64xf32>
    %cst_36 = arith.constant 1.000000e+00 : f32
    %164 = vector.broadcast %cst_36 : f32 to vector<8x64xf32>
    %165 = arith.addf %164, %163 : vector<8x64xf32>
    %166 = arith.divf %164, %165 : vector<8x64xf32>
    %167 = arith.mulf %158, %133 : vector<8x64xf32>
    %168 = arith.mulf %152, %160 : vector<8x64xf32>
    %169 = arith.addf %167, %168 : vector<8x64xf32>
    %170 = math.tanh %169 : vector<8x64xf32>
    %171 = arith.mulf %166, %170 : vector<8x64xf32>
    %172 = vector.extract_strided_slice %171 {offsets = [0, 0], sizes = [8, 32], strides = [1, 1]} : vector<8x64xf32> to vector<8x32xf32>
    %c24 = arith.constant 24 : index
    %c0_37 = arith.constant 0 : index
    %173 = vector.load %arg6[%c24, %c0_37] : memref<64x64xf32, #tpu.memory_space<vmem>>, vector<8x32xf32>
    tpu.vector_store %arg6[%c24, %c0_37], %172 {strides = array<i32>} : memref<64x64xf32, #tpu.memory_space<vmem>>, vector<8x32xf32>,
    %174 = vector.extract_strided_slice %171 {offsets = [0, 32], sizes = [8, 32], strides = [1, 1]} : vector<8x64xf32> to vector<8x32xf32>
    %c32_38 = arith.constant 32 : index
    %c32_39 = arith.constant 32 : index
    %175 = vector.load %arg6[%c32_38, %c32_39] : memref<64x64xf32, #tpu.memory_space<vmem>>, vector<8x32xf32>
    tpu.vector_store %arg6[%c32_38, %c32_39], %174 {strides = array<i32>} : memref<64x64xf32, #tpu.memory_space<vmem>>, vector<8x32xf32>,
    %176 = vector.extract_strided_slice %29 {offsets = [32, 0], sizes = [8, 256], strides = [1, 1]} : vector<64x256xf32> to vector<8x256xf32>
    %177 = vector.extract_strided_slice %29 {offsets = [24, 0], sizes = [8, 256], strides = [1, 1]} : vector<64x256xf32> to vector<8x256xf32>
    %178 = vector.shape_cast %23 : vector<1x256xi1> to vector<1x256xi1>
    %179 = vector.broadcast %178 : vector<1x256xi1> to vector<8x256xi1>
    %180 = arith.select %179, %176, %177 : vector<8x256xi1>, vector<8x256xf32>
    %cst_40 = arith.constant dense<0.000000e+00> : vector<8x256xf32>
    %181 = tpu.matmul %171, %25, %cst_40 {dimension_numbers = #tpu.dot_dimension_numbers<[1], [0], [0], [1], [0, 0, 1, 1], [], []>} : vector<8x64xf32>, vector<64x256xf32>, vector<8x256xf32> -> vector<8x256xf32>
    %182 = arith.addf %180, %181 : vector<8x256xf32>
    %183 = vector.extract_strided_slice %182 {offsets = [0, 0], sizes = [8, 64], strides = [1, 1]} : vector<8x256xf32> to vector<8x64xf32>
    %184 = arith.negf %183 : vector<8x64xf32>
    %185 = math.exp %184 : vector<8x64xf32>
    %cst_41 = arith.constant 1.000000e+00 : f32
    %186 = vector.broadcast %cst_41 : f32 to vector<8x64xf32>
    %187 = arith.addf %186, %185 : vector<8x64xf32>
    %188 = arith.divf %186, %187 : vector<8x64xf32>
    %189 = vector.extract_strided_slice %182 {offsets = [0, 64], sizes = [8, 64], strides = [1, 1]} : vector<8x256xf32> to vector<8x64xf32>
    %190 = arith.negf %189 : vector<8x64xf32>
    %191 = math.exp %190 : vector<8x64xf32>
    %cst_42 = arith.constant 1.000000e+00 : f32
    %192 = vector.broadcast %cst_42 : f32 to vector<8x64xf32>
    %193 = arith.addf %192, %191 : vector<8x64xf32>
    %194 = arith.divf %192, %193 : vector<8x64xf32>
    %195 = vector.extract_strided_slice %182 {offsets = [0, 128], sizes = [8, 64], strides = [1, 1]} : vector<8x256xf32> to vector<8x64xf32>
    %196 = math.tanh %195 : vector<8x64xf32>
    %197 = vector.extract_strided_slice %182 {offsets = [0, 192], sizes = [8, 64], strides = [1, 1]} : vector<8x256xf32> to vector<8x64xf32>
    %198 = arith.negf %197 : vector<8x64xf32>
    %199 = math.exp %198 : vector<8x64xf32>
    %cst_43 = arith.constant 1.000000e+00 : f32
    %200 = vector.broadcast %cst_43 : f32 to vector<8x64xf32>
    %201 = arith.addf %200, %199 : vector<8x64xf32>
    %202 = arith.divf %200, %201 : vector<8x64xf32>
    %203 = arith.mulf %194, %169 : vector<8x64xf32>
    %204 = arith.mulf %188, %196 : vector<8x64xf32>
    %205 = arith.addf %203, %204 : vector<8x64xf32>
    %206 = math.tanh %205 : vector<8x64xf32>
    %207 = arith.mulf %202, %206 : vector<8x64xf32>
    %208 = vector.extract_strided_slice %207 {offsets = [0, 0], sizes = [8, 32], strides = [1, 1]} : vector<8x64xf32> to vector<8x32xf32>
    %c32_44 = arith.constant 32 : index
    %c0_45 = arith.constant 0 : index
    %209 = vector.load %arg6[%c32_44, %c0_45] : memref<64x64xf32, #tpu.memory_space<vmem>>, vector<8x32xf32>
    tpu.vector_store %arg6[%c32_44, %c0_45], %208 {strides = array<i32>} : memref<64x64xf32, #tpu.memory_space<vmem>>, vector<8x32xf32>,
    %210 = vector.extract_strided_slice %207 {offsets = [0, 32], sizes = [8, 32], strides = [1, 1]} : vector<8x64xf32> to vector<8x32xf32>
    %c24_46 = arith.constant 24 : index
    %c32_47 = arith.constant 32 : index
    %211 = vector.load %arg6[%c24_46, %c32_47] : memref<64x64xf32, #tpu.memory_space<vmem>>, vector<8x32xf32>
    tpu.vector_store %arg6[%c24_46, %c32_47], %210 {strides = array<i32>} : memref<64x64xf32, #tpu.memory_space<vmem>>, vector<8x32xf32>,
    %212 = vector.extract_strided_slice %29 {offsets = [40, 0], sizes = [8, 256], strides = [1, 1]} : vector<64x256xf32> to vector<8x256xf32>
    %213 = vector.extract_strided_slice %29 {offsets = [16, 0], sizes = [8, 256], strides = [1, 1]} : vector<64x256xf32> to vector<8x256xf32>
    %214 = vector.shape_cast %23 : vector<1x256xi1> to vector<1x256xi1>
    %215 = vector.broadcast %214 : vector<1x256xi1> to vector<8x256xi1>
    %216 = arith.select %215, %212, %213 : vector<8x256xi1>, vector<8x256xf32>
    %cst_48 = arith.constant dense<0.000000e+00> : vector<8x256xf32>
    %217 = tpu.matmul %207, %25, %cst_48 {dimension_numbers = #tpu.dot_dimension_numbers<[1], [0], [0], [1], [0, 0, 1, 1], [], []>} : vector<8x64xf32>, vector<64x256xf32>, vector<8x256xf32> -> vector<8x256xf32>
    %218 = arith.addf %216, %217 : vector<8x256xf32>
    %219 = vector.extract_strided_slice %218 {offsets = [0, 0], sizes = [8, 64], strides = [1, 1]} : vector<8x256xf32> to vector<8x64xf32>
    %220 = arith.negf %219 : vector<8x64xf32>
    %221 = math.exp %220 : vector<8x64xf32>
    %cst_49 = arith.constant 1.000000e+00 : f32
    %222 = vector.broadcast %cst_49 : f32 to vector<8x64xf32>
    %223 = arith.addf %222, %221 : vector<8x64xf32>
    %224 = arith.divf %222, %223 : vector<8x64xf32>
    %225 = vector.extract_strided_slice %218 {offsets = [0, 64], sizes = [8, 64], strides = [1, 1]} : vector<8x256xf32> to vector<8x64xf32>
    %226 = arith.negf %225 : vector<8x64xf32>
    %227 = math.exp %226 : vector<8x64xf32>
    %cst_50 = arith.constant 1.000000e+00 : f32
    %228 = vector.broadcast %cst_50 : f32 to vector<8x64xf32>
    %229 = arith.addf %228, %227 : vector<8x64xf32>
    %230 = arith.divf %228, %229 : vector<8x64xf32>
    %231 = vector.extract_strided_slice %218 {offsets = [0, 128], sizes = [8, 64], strides = [1, 1]} : vector<8x256xf32> to vector<8x64xf32>
    %232 = math.tanh %231 : vector<8x64xf32>
    %233 = vector.extract_strided_slice %218 {offsets = [0, 192], sizes = [8, 64], strides = [1, 1]} : vector<8x256xf32> to vector<8x64xf32>
    %234 = arith.negf %233 : vector<8x64xf32>
    %235 = math.exp %234 : vector<8x64xf32>
    %cst_51 = arith.constant 1.000000e+00 : f32
    %236 = vector.broadcast %cst_51 : f32 to vector<8x64xf32>
    %237 = arith.addf %236, %235 : vector<8x64xf32>
    %238 = arith.divf %236, %237 : vector<8x64xf32>
    %239 = arith.mulf %230, %205 : vector<8x64xf32>
    %240 = arith.mulf %224, %232 : vector<8x64xf32>
    %241 = arith.addf %239, %240 : vector<8x64xf32>
    %242 = math.tanh %241 : vector<8x64xf32>
    %243 = arith.mulf %238, %242 : vector<8x64xf32>
    %244 = vector.extract_strided_slice %243 {offsets = [0, 0], sizes = [8, 32], strides = [1, 1]} : vector<8x64xf32> to vector<8x32xf32>
    %c40_52 = arith.constant 40 : index
    %c0_53 = arith.constant 0 : index
    %245 = vector.load %arg6[%c40_52, %c0_53] : memref<64x64xf32, #tpu.memory_space<vmem>>, vector<8x32xf32>
    tpu.vector_store %arg6[%c40_52, %c0_53], %244 {strides = array<i32>} : memref<64x64xf32, #tpu.memory_space<vmem>>, vector<8x32xf32>,
    %246 = vector.extract_strided_slice %243 {offsets = [0, 32], sizes = [8, 32], strides = [1, 1]} : vector<8x64xf32> to vector<8x32xf32>
    %c16_54 = arith.constant 16 : index
    %c32_55 = arith.constant 32 : index
    %247 = vector.load %arg6[%c16_54, %c32_55] : memref<64x64xf32, #tpu.memory_space<vmem>>, vector<8x32xf32>
    tpu.vector_store %arg6[%c16_54, %c32_55], %246 {strides = array<i32>} : memref<64x64xf32, #tpu.memory_space<vmem>>, vector<8x32xf32>,
    %248 = vector.extract_strided_slice %29 {offsets = [48, 0], sizes = [8, 256], strides = [1, 1]} : vector<64x256xf32> to vector<8x256xf32>
    %249 = vector.extract_strided_slice %29 {offsets = [8, 0], sizes = [8, 256], strides = [1, 1]} : vector<64x256xf32> to vector<8x256xf32>
    %250 = vector.shape_cast %23 : vector<1x256xi1> to vector<1x256xi1>
    %251 = vector.broadcast %250 : vector<1x256xi1> to vector<8x256xi1>
    %252 = arith.select %251, %248, %249 : vector<8x256xi1>, vector<8x256xf32>
    %cst_56 = arith.constant dense<0.000000e+00> : vector<8x256xf32>
    %253 = tpu.matmul %243, %25, %cst_56 {dimension_numbers = #tpu.dot_dimension_numbers<[1], [0], [0], [1], [0, 0, 1, 1], [], []>} : vector<8x64xf32>, vector<64x256xf32>, vector<8x256xf32> -> vector<8x256xf32>
    %254 = arith.addf %252, %253 : vector<8x256xf32>
    %255 = vector.extract_strided_slice %254 {offsets = [0, 0], sizes = [8, 64], strides = [1, 1]} : vector<8x256xf32> to vector<8x64xf32>
    %256 = arith.negf %255 : vector<8x64xf32>
    %257 = math.exp %256 : vector<8x64xf32>
    %cst_57 = arith.constant 1.000000e+00 : f32
    %258 = vector.broadcast %cst_57 : f32 to vector<8x64xf32>
    %259 = arith.addf %258, %257 : vector<8x64xf32>
    %260 = arith.divf %258, %259 : vector<8x64xf32>
    %261 = vector.extract_strided_slice %254 {offsets = [0, 64], sizes = [8, 64], strides = [1, 1]} : vector<8x256xf32> to vector<8x64xf32>
    %262 = arith.negf %261 : vector<8x64xf32>
    %263 = math.exp %262 : vector<8x64xf32>
    %cst_58 = arith.constant 1.000000e+00 : f32
    %264 = vector.broadcast %cst_58 : f32 to vector<8x64xf32>
    %265 = arith.addf %264, %263 : vector<8x64xf32>
    %266 = arith.divf %264, %265 : vector<8x64xf32>
    %267 = vector.extract_strided_slice %254 {offsets = [0, 128], sizes = [8, 64], strides = [1, 1]} : vector<8x256xf32> to vector<8x64xf32>
    %268 = math.tanh %267 : vector<8x64xf32>
    %269 = vector.extract_strided_slice %254 {offsets = [0, 192], sizes = [8, 64], strides = [1, 1]} : vector<8x256xf32> to vector<8x64xf32>
    %270 = arith.negf %269 : vector<8x64xf32>
    %271 = math.exp %270 : vector<8x64xf32>
    %cst_59 = arith.constant 1.000000e+00 : f32
    %272 = vector.broadcast %cst_59 : f32 to vector<8x64xf32>
    %273 = arith.addf %272, %271 : vector<8x64xf32>
    %274 = arith.divf %272, %273 : vector<8x64xf32>
    %275 = arith.mulf %266, %241 : vector<8x64xf32>
    %276 = arith.mulf %260, %268 : vector<8x64xf32>
    %277 = arith.addf %275, %276 : vector<8x64xf32>
    %278 = math.tanh %277 : vector<8x64xf32>
    %279 = arith.mulf %274, %278 : vector<8x64xf32>
    %280 = vector.extract_strided_slice %279 {offsets = [0, 0], sizes = [8, 32], strides = [1, 1]} : vector<8x64xf32> to vector<8x32xf32>
    %c48_60 = arith.constant 48 : index
    %c0_61 = arith.constant 0 : index
    %281 = vector.load %arg6[%c48_60, %c0_61] : memref<64x64xf32, #tpu.memory_space<vmem>>, vector<8x32xf32>
    tpu.vector_store %arg6[%c48_60, %c0_61], %280 {strides = array<i32>} : memref<64x64xf32, #tpu.memory_space<vmem>>, vector<8x32xf32>,
    %282 = vector.extract_strided_slice %279 {offsets = [0, 32], sizes = [8, 32], strides = [1, 1]} : vector<8x64xf32> to vector<8x32xf32>
    %c8_62 = arith.constant 8 : index
    %c32_63 = arith.constant 32 : index
    %283 = vector.load %arg6[%c8_62, %c32_63] : memref<64x64xf32, #tpu.memory_space<vmem>>, vector<8x32xf32>
    tpu.vector_store %arg6[%c8_62, %c32_63], %282 {strides = array<i32>} : memref<64x64xf32, #tpu.memory_space<vmem>>, vector<8x32xf32>,
    %284 = vector.extract_strided_slice %29 {offsets = [56, 0], sizes = [8, 256], strides = [1, 1]} : vector<64x256xf32> to vector<8x256xf32>
    %285 = vector.extract_strided_slice %29 {offsets = [0, 0], sizes = [8, 256], strides = [1, 1]} : vector<64x256xf32> to vector<8x256xf32>
    %286 = vector.shape_cast %23 : vector<1x256xi1> to vector<1x256xi1>
    %287 = vector.broadcast %286 : vector<1x256xi1> to vector<8x256xi1>
    %288 = arith.select %287, %284, %285 : vector<8x256xi1>, vector<8x256xf32>
    %cst_64 = arith.constant dense<0.000000e+00> : vector<8x256xf32>
    %289 = tpu.matmul %279, %25, %cst_64 {dimension_numbers = #tpu.dot_dimension_numbers<[1], [0], [0], [1], [0, 0, 1, 1], [], []>} : vector<8x64xf32>, vector<64x256xf32>, vector<8x256xf32> -> vector<8x256xf32>
    %290 = arith.addf %288, %289 : vector<8x256xf32>
    %291 = vector.extract_strided_slice %290 {offsets = [0, 0], sizes = [8, 64], strides = [1, 1]} : vector<8x256xf32> to vector<8x64xf32>
    %292 = arith.negf %291 : vector<8x64xf32>
    %293 = math.exp %292 : vector<8x64xf32>
    %cst_65 = arith.constant 1.000000e+00 : f32
    %294 = vector.broadcast %cst_65 : f32 to vector<8x64xf32>
    %295 = arith.addf %294, %293 : vector<8x64xf32>
    %296 = arith.divf %294, %295 : vector<8x64xf32>
    %297 = vector.extract_strided_slice %290 {offsets = [0, 64], sizes = [8, 64], strides = [1, 1]} : vector<8x256xf32> to vector<8x64xf32>
    %298 = arith.negf %297 : vector<8x64xf32>
    %299 = math.exp %298 : vector<8x64xf32>
    %cst_66 = arith.constant 1.000000e+00 : f32
    %300 = vector.broadcast %cst_66 : f32 to vector<8x64xf32>
    %301 = arith.addf %300, %299 : vector<8x64xf32>
    %302 = arith.divf %300, %301 : vector<8x64xf32>
    %303 = vector.extract_strided_slice %290 {offsets = [0, 128], sizes = [8, 64], strides = [1, 1]} : vector<8x256xf32> to vector<8x64xf32>
    %304 = math.tanh %303 : vector<8x64xf32>
    %305 = vector.extract_strided_slice %290 {offsets = [0, 192], sizes = [8, 64], strides = [1, 1]} : vector<8x256xf32> to vector<8x64xf32>
    %306 = arith.negf %305 : vector<8x64xf32>
    %307 = math.exp %306 : vector<8x64xf32>
    %cst_67 = arith.constant 1.000000e+00 : f32
    %308 = vector.broadcast %cst_67 : f32 to vector<8x64xf32>
    %309 = arith.addf %308, %307 : vector<8x64xf32>
    %310 = arith.divf %308, %309 : vector<8x64xf32>
    %311 = arith.mulf %302, %277 : vector<8x64xf32>
    %312 = arith.mulf %296, %304 : vector<8x64xf32>
    %313 = arith.addf %311, %312 : vector<8x64xf32>
    %314 = math.tanh %313 : vector<8x64xf32>
    %315 = arith.mulf %310, %314 : vector<8x64xf32>
    %316 = vector.extract_strided_slice %315 {offsets = [0, 0], sizes = [8, 32], strides = [1, 1]} : vector<8x64xf32> to vector<8x32xf32>
    %c56_68 = arith.constant 56 : index
    %c0_69 = arith.constant 0 : index
    %317 = vector.load %arg6[%c56_68, %c0_69] : memref<64x64xf32, #tpu.memory_space<vmem>>, vector<8x32xf32>
    tpu.vector_store %arg6[%c56_68, %c0_69], %316 {strides = array<i32>} : memref<64x64xf32, #tpu.memory_space<vmem>>, vector<8x32xf32>,
    %318 = vector.extract_strided_slice %315 {offsets = [0, 32], sizes = [8, 32], strides = [1, 1]} : vector<8x64xf32> to vector<8x32xf32>
    %c0_70 = arith.constant 0 : index
    %c32_71 = arith.constant 32 : index
    %319 = vector.load %arg6[%c0_70, %c32_71] : memref<64x64xf32, #tpu.memory_space<vmem>>, vector<8x32xf32>
    tpu.vector_store %arg6[%c0_70, %c32_71], %318 {strides = array<i32>} : memref<64x64xf32, #tpu.memory_space<vmem>>, vector<8x32xf32>,
    %c0_72 = arith.constant 0 : index
    %c0_73 = arith.constant 0 : index
    %320 = vector.load %arg6[%c0_72, %c0_73] : memref<64x64xf32, #tpu.memory_space<vmem>>, vector<64x64xf32>
    %c96 = arith.constant 96 : index
    %c0_74 = arith.constant 0 : index
    %321 = vector.load %arg1[%c96, %c0_74] : memref<232x256xf32, #tpu.memory_space<vmem>>, vector<64x256xf32>
    %c160 = arith.constant 160 : index
    %c0_75 = arith.constant 0 : index
    %322 = vector.load %arg1[%c160, %c0_75] : memref<232x256xf32, #tpu.memory_space<vmem>>, vector<64x256xf32>
    %c225 = arith.constant 225 : index
    %c0_76 = arith.constant 0 : index
    %323 = vector.load %arg1[%c225, %c0_76] : memref<232x256xf32, #tpu.memory_space<vmem>>, vector<1x256xf32>
    %cst_77 = arith.constant dense<0.000000e+00> : vector<64x256xf32>
    %324 = tpu.matmul %320, %321, %cst_77 {dimension_numbers = #tpu.dot_dimension_numbers<[1], [0], [0], [1], [0, 0, 1, 1], [], []>} : vector<64x64xf32>, vector<64x256xf32>, vector<64x256xf32> -> vector<64x256xf32>
    %325 = vector.broadcast %323 : vector<1x256xf32> to vector<64x256xf32>
    %326 = arith.addf %324, %325 : vector<64x256xf32>
    %cst_78 = arith.constant 0.000000e+00 : f32
    %327 = vector.broadcast %cst_78 : f32 to vector<8x64xf32>
    %cst_79 = arith.constant 0.000000e+00 : f32
    %328 = vector.broadcast %cst_79 : f32 to vector<8x64xf32>
    %329 = vector.extract_strided_slice %326 {offsets = [0, 0], sizes = [8, 256], strides = [1, 1]} : vector<64x256xf32> to vector<8x256xf32>
    %330 = vector.extract_strided_slice %326 {offsets = [56, 0], sizes = [8, 256], strides = [1, 1]} : vector<64x256xf32> to vector<8x256xf32>
    %331 = vector.shape_cast %23 : vector<1x256xi1> to vector<1x256xi1>
    %332 = vector.broadcast %331 : vector<1x256xi1> to vector<8x256xi1>
    %333 = arith.select %332, %329, %330 : vector<8x256xi1>, vector<8x256xf32>
    %cst_80 = arith.constant dense<0.000000e+00> : vector<8x256xf32>
    %334 = tpu.matmul %327, %322, %cst_80 {dimension_numbers = #tpu.dot_dimension_numbers<[1], [0], [0], [1], [0, 0, 1, 1], [], []>} : vector<8x64xf32>, vector<64x256xf32>, vector<8x256xf32> -> vector<8x256xf32>
    %335 = arith.addf %333, %334 : vector<8x256xf32>
    %336 = vector.extract_strided_slice %335 {offsets = [0, 0], sizes = [8, 64], strides = [1, 1]} : vector<8x256xf32> to vector<8x64xf32>
    %337 = arith.negf %336 : vector<8x64xf32>
    %338 = math.exp %337 : vector<8x64xf32>
    %cst_81 = arith.constant 1.000000e+00 : f32
    %339 = vector.broadcast %cst_81 : f32 to vector<8x64xf32>
    %340 = arith.addf %339, %338 : vector<8x64xf32>
    %341 = arith.divf %339, %340 : vector<8x64xf32>
    %342 = vector.extract_strided_slice %335 {offsets = [0, 64], sizes = [8, 64], strides = [1, 1]} : vector<8x256xf32> to vector<8x64xf32>
    %343 = arith.negf %342 : vector<8x64xf32>
    %344 = math.exp %343 : vector<8x64xf32>
    %cst_82 = arith.constant 1.000000e+00 : f32
    %345 = vector.broadcast %cst_82 : f32 to vector<8x64xf32>
    %346 = arith.addf %345, %344 : vector<8x64xf32>
    %347 = arith.divf %345, %346 : vector<8x64xf32>
    %348 = vector.extract_strided_slice %335 {offsets = [0, 128], sizes = [8, 64], strides = [1, 1]} : vector<8x256xf32> to vector<8x64xf32>
    %349 = math.tanh %348 : vector<8x64xf32>
    %350 = vector.extract_strided_slice %335 {offsets = [0, 192], sizes = [8, 64], strides = [1, 1]} : vector<8x256xf32> to vector<8x64xf32>
    %351 = arith.negf %350 : vector<8x64xf32>
    %352 = math.exp %351 : vector<8x64xf32>
    %cst_83 = arith.constant 1.000000e+00 : f32
    %353 = vector.broadcast %cst_83 : f32 to vector<8x64xf32>
    %354 = arith.addf %353, %352 : vector<8x64xf32>
    %355 = arith.divf %353, %354 : vector<8x64xf32>
    %356 = arith.mulf %347, %328 : vector<8x64xf32>
    %357 = arith.mulf %341, %349 : vector<8x64xf32>
    %358 = arith.addf %356, %357 : vector<8x64xf32>
    %359 = math.tanh %358 : vector<8x64xf32>
    %360 = arith.mulf %355, %359 : vector<8x64xf32>
    %361 = vector.extract_strided_slice %360 {offsets = [0, 0], sizes = [8, 32], strides = [1, 1]} : vector<8x64xf32> to vector<8x32xf32>
    %c0_84 = arith.constant 0 : index
    %c0_85 = arith.constant 0 : index
    %362 = vector.load %arg7[%c0_84, %c0_85] : memref<64x64xf32, #tpu.memory_space<vmem>>, vector<8x32xf32>
    tpu.vector_store %arg7[%c0_84, %c0_85], %361 {strides = array<i32>} : memref<64x64xf32, #tpu.memory_space<vmem>>, vector<8x32xf32>,
    %363 = vector.extract_strided_slice %360 {offsets = [0, 32], sizes = [8, 32], strides = [1, 1]} : vector<8x64xf32> to vector<8x32xf32>
    %c56_86 = arith.constant 56 : index
    %c32_87 = arith.constant 32 : index
    %364 = vector.load %arg7[%c56_86, %c32_87] : memref<64x64xf32, #tpu.memory_space<vmem>>, vector<8x32xf32>
    tpu.vector_store %arg7[%c56_86, %c32_87], %363 {strides = array<i32>} : memref<64x64xf32, #tpu.memory_space<vmem>>, vector<8x32xf32>,
    %365 = vector.extract_strided_slice %326 {offsets = [8, 0], sizes = [8, 256], strides = [1, 1]} : vector<64x256xf32> to vector<8x256xf32>
    %366 = vector.extract_strided_slice %326 {offsets = [48, 0], sizes = [8, 256], strides = [1, 1]} : vector<64x256xf32> to vector<8x256xf32>
    %367 = vector.shape_cast %23 : vector<1x256xi1> to vector<1x256xi1>
    %368 = vector.broadcast %367 : vector<1x256xi1> to vector<8x256xi1>
    %369 = arith.select %368, %365, %366 : vector<8x256xi1>, vector<8x256xf32>
    %cst_88 = arith.constant dense<0.000000e+00> : vector<8x256xf32>
    %370 = tpu.matmul %360, %322, %cst_88 {dimension_numbers = #tpu.dot_dimension_numbers<[1], [0], [0], [1], [0, 0, 1, 1], [], []>} : vector<8x64xf32>, vector<64x256xf32>, vector<8x256xf32> -> vector<8x256xf32>
    %371 = arith.addf %369, %370 : vector<8x256xf32>
    %372 = vector.extract_strided_slice %371 {offsets = [0, 0], sizes = [8, 64], strides = [1, 1]} : vector<8x256xf32> to vector<8x64xf32>
    %373 = arith.negf %372 : vector<8x64xf32>
    %374 = math.exp %373 : vector<8x64xf32>
    %cst_89 = arith.constant 1.000000e+00 : f32
    %375 = vector.broadcast %cst_89 : f32 to vector<8x64xf32>
    %376 = arith.addf %375, %374 : vector<8x64xf32>
    %377 = arith.divf %375, %376 : vector<8x64xf32>
    %378 = vector.extract_strided_slice %371 {offsets = [0, 64], sizes = [8, 64], strides = [1, 1]} : vector<8x256xf32> to vector<8x64xf32>
    %379 = arith.negf %378 : vector<8x64xf32>
    %380 = math.exp %379 : vector<8x64xf32>
    %cst_90 = arith.constant 1.000000e+00 : f32
    %381 = vector.broadcast %cst_90 : f32 to vector<8x64xf32>
    %382 = arith.addf %381, %380 : vector<8x64xf32>
    %383 = arith.divf %381, %382 : vector<8x64xf32>
    %384 = vector.extract_strided_slice %371 {offsets = [0, 128], sizes = [8, 64], strides = [1, 1]} : vector<8x256xf32> to vector<8x64xf32>
    %385 = math.tanh %384 : vector<8x64xf32>
    %386 = vector.extract_strided_slice %371 {offsets = [0, 192], sizes = [8, 64], strides = [1, 1]} : vector<8x256xf32> to vector<8x64xf32>
    %387 = arith.negf %386 : vector<8x64xf32>
    %388 = math.exp %387 : vector<8x64xf32>
    %cst_91 = arith.constant 1.000000e+00 : f32
    %389 = vector.broadcast %cst_91 : f32 to vector<8x64xf32>
    %390 = arith.addf %389, %388 : vector<8x64xf32>
    %391 = arith.divf %389, %390 : vector<8x64xf32>
    %392 = arith.mulf %383, %358 : vector<8x64xf32>
    %393 = arith.mulf %377, %385 : vector<8x64xf32>
    %394 = arith.addf %392, %393 : vector<8x64xf32>
    %395 = math.tanh %394 : vector<8x64xf32>
    %396 = arith.mulf %391, %395 : vector<8x64xf32>
    %397 = vector.extract_strided_slice %396 {offsets = [0, 0], sizes = [8, 32], strides = [1, 1]} : vector<8x64xf32> to vector<8x32xf32>
    %c8_92 = arith.constant 8 : index
    %c0_93 = arith.constant 0 : index
    %398 = vector.load %arg7[%c8_92, %c0_93] : memref<64x64xf32, #tpu.memory_space<vmem>>, vector<8x32xf32>
    tpu.vector_store %arg7[%c8_92, %c0_93], %397 {strides = array<i32>} : memref<64x64xf32, #tpu.memory_space<vmem>>, vector<8x32xf32>,
    %399 = vector.extract_strided_slice %396 {offsets = [0, 32], sizes = [8, 32], strides = [1, 1]} : vector<8x64xf32> to vector<8x32xf32>
    %c48_94 = arith.constant 48 : index
    %c32_95 = arith.constant 32 : index
    %400 = vector.load %arg7[%c48_94, %c32_95] : memref<64x64xf32, #tpu.memory_space<vmem>>, vector<8x32xf32>
    tpu.vector_store %arg7[%c48_94, %c32_95], %399 {strides = array<i32>} : memref<64x64xf32, #tpu.memory_space<vmem>>, vector<8x32xf32>,
    %401 = vector.extract_strided_slice %326 {offsets = [16, 0], sizes = [8, 256], strides = [1, 1]} : vector<64x256xf32> to vector<8x256xf32>
    %402 = vector.extract_strided_slice %326 {offsets = [40, 0], sizes = [8, 256], strides = [1, 1]} : vector<64x256xf32> to vector<8x256xf32>
    %403 = vector.shape_cast %23 : vector<1x256xi1> to vector<1x256xi1>
    %404 = vector.broadcast %403 : vector<1x256xi1> to vector<8x256xi1>
    %405 = arith.select %404, %401, %402 : vector<8x256xi1>, vector<8x256xf32>
    %cst_96 = arith.constant dense<0.000000e+00> : vector<8x256xf32>
    %406 = tpu.matmul %396, %322, %cst_96 {dimension_numbers = #tpu.dot_dimension_numbers<[1], [0], [0], [1], [0, 0, 1, 1], [], []>} : vector<8x64xf32>, vector<64x256xf32>, vector<8x256xf32> -> vector<8x256xf32>
    %407 = arith.addf %405, %406 : vector<8x256xf32>
    %408 = vector.extract_strided_slice %407 {offsets = [0, 0], sizes = [8, 64], strides = [1, 1]} : vector<8x256xf32> to vector<8x64xf32>
    %409 = arith.negf %408 : vector<8x64xf32>
    %410 = math.exp %409 : vector<8x64xf32>
    %cst_97 = arith.constant 1.000000e+00 : f32
    %411 = vector.broadcast %cst_97 : f32 to vector<8x64xf32>
    %412 = arith.addf %411, %410 : vector<8x64xf32>
    %413 = arith.divf %411, %412 : vector<8x64xf32>
    %414 = vector.extract_strided_slice %407 {offsets = [0, 64], sizes = [8, 64], strides = [1, 1]} : vector<8x256xf32> to vector<8x64xf32>
    %415 = arith.negf %414 : vector<8x64xf32>
    %416 = math.exp %415 : vector<8x64xf32>
    %cst_98 = arith.constant 1.000000e+00 : f32
    %417 = vector.broadcast %cst_98 : f32 to vector<8x64xf32>
    %418 = arith.addf %417, %416 : vector<8x64xf32>
    %419 = arith.divf %417, %418 : vector<8x64xf32>
    %420 = vector.extract_strided_slice %407 {offsets = [0, 128], sizes = [8, 64], strides = [1, 1]} : vector<8x256xf32> to vector<8x64xf32>
    %421 = math.tanh %420 : vector<8x64xf32>
    %422 = vector.extract_strided_slice %407 {offsets = [0, 192], sizes = [8, 64], strides = [1, 1]} : vector<8x256xf32> to vector<8x64xf32>
    %423 = arith.negf %422 : vector<8x64xf32>
    %424 = math.exp %423 : vector<8x64xf32>
    %cst_99 = arith.constant 1.000000e+00 : f32
    %425 = vector.broadcast %cst_99 : f32 to vector<8x64xf32>
    %426 = arith.addf %425, %424 : vector<8x64xf32>
    %427 = arith.divf %425, %426 : vector<8x64xf32>
    %428 = arith.mulf %419, %394 : vector<8x64xf32>
    %429 = arith.mulf %413, %421 : vector<8x64xf32>
    %430 = arith.addf %428, %429 : vector<8x64xf32>
    %431 = math.tanh %430 : vector<8x64xf32>
    %432 = arith.mulf %427, %431 : vector<8x64xf32>
    %433 = vector.extract_strided_slice %432 {offsets = [0, 0], sizes = [8, 32], strides = [1, 1]} : vector<8x64xf32> to vector<8x32xf32>
    %c16_100 = arith.constant 16 : index
    %c0_101 = arith.constant 0 : index
    %434 = vector.load %arg7[%c16_100, %c0_101] : memref<64x64xf32, #tpu.memory_space<vmem>>, vector<8x32xf32>
    tpu.vector_store %arg7[%c16_100, %c0_101], %433 {strides = array<i32>} : memref<64x64xf32, #tpu.memory_space<vmem>>, vector<8x32xf32>,
    %435 = vector.extract_strided_slice %432 {offsets = [0, 32], sizes = [8, 32], strides = [1, 1]} : vector<8x64xf32> to vector<8x32xf32>
    %c40_102 = arith.constant 40 : index
    %c32_103 = arith.constant 32 : index
    %436 = vector.load %arg7[%c40_102, %c32_103] : memref<64x64xf32, #tpu.memory_space<vmem>>, vector<8x32xf32>
    tpu.vector_store %arg7[%c40_102, %c32_103], %435 {strides = array<i32>} : memref<64x64xf32, #tpu.memory_space<vmem>>, vector<8x32xf32>,
    %437 = vector.extract_strided_slice %326 {offsets = [24, 0], sizes = [8, 256], strides = [1, 1]} : vector<64x256xf32> to vector<8x256xf32>
    %438 = vector.extract_strided_slice %326 {offsets = [32, 0], sizes = [8, 256], strides = [1, 1]} : vector<64x256xf32> to vector<8x256xf32>
    %439 = vector.shape_cast %23 : vector<1x256xi1> to vector<1x256xi1>
    %440 = vector.broadcast %439 : vector<1x256xi1> to vector<8x256xi1>
    %441 = arith.select %440, %437, %438 : vector<8x256xi1>, vector<8x256xf32>
    %cst_104 = arith.constant dense<0.000000e+00> : vector<8x256xf32>
    %442 = tpu.matmul %432, %322, %cst_104 {dimension_numbers = #tpu.dot_dimension_numbers<[1], [0], [0], [1], [0, 0, 1, 1], [], []>} : vector<8x64xf32>, vector<64x256xf32>, vector<8x256xf32> -> vector<8x256xf32>
    %443 = arith.addf %441, %442 : vector<8x256xf32>
    %444 = vector.extract_strided_slice %443 {offsets = [0, 0], sizes = [8, 64], strides = [1, 1]} : vector<8x256xf32> to vector<8x64xf32>
    %445 = arith.negf %444 : vector<8x64xf32>
    %446 = math.exp %445 : vector<8x64xf32>
    %cst_105 = arith.constant 1.000000e+00 : f32
    %447 = vector.broadcast %cst_105 : f32 to vector<8x64xf32>
    %448 = arith.addf %447, %446 : vector<8x64xf32>
    %449 = arith.divf %447, %448 : vector<8x64xf32>
    %450 = vector.extract_strided_slice %443 {offsets = [0, 64], sizes = [8, 64], strides = [1, 1]} : vector<8x256xf32> to vector<8x64xf32>
    %451 = arith.negf %450 : vector<8x64xf32>
    %452 = math.exp %451 : vector<8x64xf32>
    %cst_106 = arith.constant 1.000000e+00 : f32
    %453 = vector.broadcast %cst_106 : f32 to vector<8x64xf32>
    %454 = arith.addf %453, %452 : vector<8x64xf32>
    %455 = arith.divf %453, %454 : vector<8x64xf32>
    %456 = vector.extract_strided_slice %443 {offsets = [0, 128], sizes = [8, 64], strides = [1, 1]} : vector<8x256xf32> to vector<8x64xf32>
    %457 = math.tanh %456 : vector<8x64xf32>
    %458 = vector.extract_strided_slice %443 {offsets = [0, 192], sizes = [8, 64], strides = [1, 1]} : vector<8x256xf32> to vector<8x64xf32>
    %459 = arith.negf %458 : vector<8x64xf32>
    %460 = math.exp %459 : vector<8x64xf32>
    %cst_107 = arith.constant 1.000000e+00 : f32
    %461 = vector.broadcast %cst_107 : f32 to vector<8x64xf32>
    %462 = arith.addf %461, %460 : vector<8x64xf32>
    %463 = arith.divf %461, %462 : vector<8x64xf32>
    %464 = arith.mulf %455, %430 : vector<8x64xf32>
    %465 = arith.mulf %449, %457 : vector<8x64xf32>
    %466 = arith.addf %464, %465 : vector<8x64xf32>
    %467 = math.tanh %466 : vector<8x64xf32>
    %468 = arith.mulf %463, %467 : vector<8x64xf32>
    %469 = vector.extract_strided_slice %468 {offsets = [0, 0], sizes = [8, 32], strides = [1, 1]} : vector<8x64xf32> to vector<8x32xf32>
    %c24_108 = arith.constant 24 : index
    %c0_109 = arith.constant 0 : index
    %470 = vector.load %arg7[%c24_108, %c0_109] : memref<64x64xf32, #tpu.memory_space<vmem>>, vector<8x32xf32>
    tpu.vector_store %arg7[%c24_108, %c0_109], %469 {strides = array<i32>} : memref<64x64xf32, #tpu.memory_space<vmem>>, vector<8x32xf32>,
    %471 = vector.extract_strided_slice %468 {offsets = [0, 32], sizes = [8, 32], strides = [1, 1]} : vector<8x64xf32> to vector<8x32xf32>
    %c32_110 = arith.constant 32 : index
    %c32_111 = arith.constant 32 : index
    %472 = vector.load %arg7[%c32_110, %c32_111] : memref<64x64xf32, #tpu.memory_space<vmem>>, vector<8x32xf32>
    tpu.vector_store %arg7[%c32_110, %c32_111], %471 {strides = array<i32>} : memref<64x64xf32, #tpu.memory_space<vmem>>, vector<8x32xf32>,
    %473 = vector.extract_strided_slice %326 {offsets = [32, 0], sizes = [8, 256], strides = [1, 1]} : vector<64x256xf32> to vector<8x256xf32>
    %474 = vector.extract_strided_slice %326 {offsets = [24, 0], sizes = [8, 256], strides = [1, 1]} : vector<64x256xf32> to vector<8x256xf32>
    %475 = vector.shape_cast %23 : vector<1x256xi1> to vector<1x256xi1>
    %476 = vector.broadcast %475 : vector<1x256xi1> to vector<8x256xi1>
    %477 = arith.select %476, %473, %474 : vector<8x256xi1>, vector<8x256xf32>
    %cst_112 = arith.constant dense<0.000000e+00> : vector<8x256xf32>
    %478 = tpu.matmul %468, %322, %cst_112 {dimension_numbers = #tpu.dot_dimension_numbers<[1], [0], [0], [1], [0, 0, 1, 1], [], []>} : vector<8x64xf32>, vector<64x256xf32>, vector<8x256xf32> -> vector<8x256xf32>
    %479 = arith.addf %477, %478 : vector<8x256xf32>
    %480 = vector.extract_strided_slice %479 {offsets = [0, 0], sizes = [8, 64], strides = [1, 1]} : vector<8x256xf32> to vector<8x64xf32>
    %481 = arith.negf %480 : vector<8x64xf32>
    %482 = math.exp %481 : vector<8x64xf32>
    %cst_113 = arith.constant 1.000000e+00 : f32
    %483 = vector.broadcast %cst_113 : f32 to vector<8x64xf32>
    %484 = arith.addf %483, %482 : vector<8x64xf32>
    %485 = arith.divf %483, %484 : vector<8x64xf32>
    %486 = vector.extract_strided_slice %479 {offsets = [0, 64], sizes = [8, 64], strides = [1, 1]} : vector<8x256xf32> to vector<8x64xf32>
    %487 = arith.negf %486 : vector<8x64xf32>
    %488 = math.exp %487 : vector<8x64xf32>
    %cst_114 = arith.constant 1.000000e+00 : f32
    %489 = vector.broadcast %cst_114 : f32 to vector<8x64xf32>
    %490 = arith.addf %489, %488 : vector<8x64xf32>
    %491 = arith.divf %489, %490 : vector<8x64xf32>
    %492 = vector.extract_strided_slice %479 {offsets = [0, 128], sizes = [8, 64], strides = [1, 1]} : vector<8x256xf32> to vector<8x64xf32>
    %493 = math.tanh %492 : vector<8x64xf32>
    %494 = vector.extract_strided_slice %479 {offsets = [0, 192], sizes = [8, 64], strides = [1, 1]} : vector<8x256xf32> to vector<8x64xf32>
    %495 = arith.negf %494 : vector<8x64xf32>
    %496 = math.exp %495 : vector<8x64xf32>
    %cst_115 = arith.constant 1.000000e+00 : f32
    %497 = vector.broadcast %cst_115 : f32 to vector<8x64xf32>
    %498 = arith.addf %497, %496 : vector<8x64xf32>
    %499 = arith.divf %497, %498 : vector<8x64xf32>
    %500 = arith.mulf %491, %466 : vector<8x64xf32>
    %501 = arith.mulf %485, %493 : vector<8x64xf32>
    %502 = arith.addf %500, %501 : vector<8x64xf32>
    %503 = math.tanh %502 : vector<8x64xf32>
    %504 = arith.mulf %499, %503 : vector<8x64xf32>
    %505 = vector.extract_strided_slice %504 {offsets = [0, 0], sizes = [8, 32], strides = [1, 1]} : vector<8x64xf32> to vector<8x32xf32>
    %c32_116 = arith.constant 32 : index
    %c0_117 = arith.constant 0 : index
    %506 = vector.load %arg7[%c32_116, %c0_117] : memref<64x64xf32, #tpu.memory_space<vmem>>, vector<8x32xf32>
    tpu.vector_store %arg7[%c32_116, %c0_117], %505 {strides = array<i32>} : memref<64x64xf32, #tpu.memory_space<vmem>>, vector<8x32xf32>,
    %507 = vector.extract_strided_slice %504 {offsets = [0, 32], sizes = [8, 32], strides = [1, 1]} : vector<8x64xf32> to vector<8x32xf32>
    %c24_118 = arith.constant 24 : index
    %c32_119 = arith.constant 32 : index
    %508 = vector.load %arg7[%c24_118, %c32_119] : memref<64x64xf32, #tpu.memory_space<vmem>>, vector<8x32xf32>
    tpu.vector_store %arg7[%c24_118, %c32_119], %507 {strides = array<i32>} : memref<64x64xf32, #tpu.memory_space<vmem>>, vector<8x32xf32>,
    %509 = vector.extract_strided_slice %326 {offsets = [40, 0], sizes = [8, 256], strides = [1, 1]} : vector<64x256xf32> to vector<8x256xf32>
    %510 = vector.extract_strided_slice %326 {offsets = [16, 0], sizes = [8, 256], strides = [1, 1]} : vector<64x256xf32> to vector<8x256xf32>
    %511 = vector.shape_cast %23 : vector<1x256xi1> to vector<1x256xi1>
    %512 = vector.broadcast %511 : vector<1x256xi1> to vector<8x256xi1>
    %513 = arith.select %512, %509, %510 : vector<8x256xi1>, vector<8x256xf32>
    %cst_120 = arith.constant dense<0.000000e+00> : vector<8x256xf32>
    %514 = tpu.matmul %504, %322, %cst_120 {dimension_numbers = #tpu.dot_dimension_numbers<[1], [0], [0], [1], [0, 0, 1, 1], [], []>} : vector<8x64xf32>, vector<64x256xf32>, vector<8x256xf32> -> vector<8x256xf32>
    %515 = arith.addf %513, %514 : vector<8x256xf32>
    %516 = vector.extract_strided_slice %515 {offsets = [0, 0], sizes = [8, 64], strides = [1, 1]} : vector<8x256xf32> to vector<8x64xf32>
    %517 = arith.negf %516 : vector<8x64xf32>
    %518 = math.exp %517 : vector<8x64xf32>
    %cst_121 = arith.constant 1.000000e+00 : f32
    %519 = vector.broadcast %cst_121 : f32 to vector<8x64xf32>
    %520 = arith.addf %519, %518 : vector<8x64xf32>
    %521 = arith.divf %519, %520 : vector<8x64xf32>
    %522 = vector.extract_strided_slice %515 {offsets = [0, 64], sizes = [8, 64], strides = [1, 1]} : vector<8x256xf32> to vector<8x64xf32>
    %523 = arith.negf %522 : vector<8x64xf32>
    %524 = math.exp %523 : vector<8x64xf32>
    %cst_122 = arith.constant 1.000000e+00 : f32
    %525 = vector.broadcast %cst_122 : f32 to vector<8x64xf32>
    %526 = arith.addf %525, %524 : vector<8x64xf32>
    %527 = arith.divf %525, %526 : vector<8x64xf32>
    %528 = vector.extract_strided_slice %515 {offsets = [0, 128], sizes = [8, 64], strides = [1, 1]} : vector<8x256xf32> to vector<8x64xf32>
    %529 = math.tanh %528 : vector<8x64xf32>
    %530 = vector.extract_strided_slice %515 {offsets = [0, 192], sizes = [8, 64], strides = [1, 1]} : vector<8x256xf32> to vector<8x64xf32>
    %531 = arith.negf %530 : vector<8x64xf32>
    %532 = math.exp %531 : vector<8x64xf32>
    %cst_123 = arith.constant 1.000000e+00 : f32
    %533 = vector.broadcast %cst_123 : f32 to vector<8x64xf32>
    %534 = arith.addf %533, %532 : vector<8x64xf32>
    %535 = arith.divf %533, %534 : vector<8x64xf32>
    %536 = arith.mulf %527, %502 : vector<8x64xf32>
    %537 = arith.mulf %521, %529 : vector<8x64xf32>
    %538 = arith.addf %536, %537 : vector<8x64xf32>
    %539 = math.tanh %538 : vector<8x64xf32>
    %540 = arith.mulf %535, %539 : vector<8x64xf32>
    %541 = vector.extract_strided_slice %540 {offsets = [0, 0], sizes = [8, 32], strides = [1, 1]} : vector<8x64xf32> to vector<8x32xf32>
    %c40_124 = arith.constant 40 : index
    %c0_125 = arith.constant 0 : index
    %542 = vector.load %arg7[%c40_124, %c0_125] : memref<64x64xf32, #tpu.memory_space<vmem>>, vector<8x32xf32>
    tpu.vector_store %arg7[%c40_124, %c0_125], %541 {strides = array<i32>} : memref<64x64xf32, #tpu.memory_space<vmem>>, vector<8x32xf32>,
    %543 = vector.extract_strided_slice %540 {offsets = [0, 32], sizes = [8, 32], strides = [1, 1]} : vector<8x64xf32> to vector<8x32xf32>
    %c16_126 = arith.constant 16 : index
    %c32_127 = arith.constant 32 : index
    %544 = vector.load %arg7[%c16_126, %c32_127] : memref<64x64xf32, #tpu.memory_space<vmem>>, vector<8x32xf32>
    tpu.vector_store %arg7[%c16_126, %c32_127], %543 {strides = array<i32>} : memref<64x64xf32, #tpu.memory_space<vmem>>, vector<8x32xf32>,
    %545 = vector.extract_strided_slice %326 {offsets = [48, 0], sizes = [8, 256], strides = [1, 1]} : vector<64x256xf32> to vector<8x256xf32>
    %546 = vector.extract_strided_slice %326 {offsets = [8, 0], sizes = [8, 256], strides = [1, 1]} : vector<64x256xf32> to vector<8x256xf32>
    %547 = vector.shape_cast %23 : vector<1x256xi1> to vector<1x256xi1>
    %548 = vector.broadcast %547 : vector<1x256xi1> to vector<8x256xi1>
    %549 = arith.select %548, %545, %546 : vector<8x256xi1>, vector<8x256xf32>
    %cst_128 = arith.constant dense<0.000000e+00> : vector<8x256xf32>
    %550 = tpu.matmul %540, %322, %cst_128 {dimension_numbers = #tpu.dot_dimension_numbers<[1], [0], [0], [1], [0, 0, 1, 1], [], []>} : vector<8x64xf32>, vector<64x256xf32>, vector<8x256xf32> -> vector<8x256xf32>
    %551 = arith.addf %549, %550 : vector<8x256xf32>
    %552 = vector.extract_strided_slice %551 {offsets = [0, 0], sizes = [8, 64], strides = [1, 1]} : vector<8x256xf32> to vector<8x64xf32>
    %553 = arith.negf %552 : vector<8x64xf32>
    %554 = math.exp %553 : vector<8x64xf32>
    %cst_129 = arith.constant 1.000000e+00 : f32
    %555 = vector.broadcast %cst_129 : f32 to vector<8x64xf32>
    %556 = arith.addf %555, %554 : vector<8x64xf32>
    %557 = arith.divf %555, %556 : vector<8x64xf32>
    %558 = vector.extract_strided_slice %551 {offsets = [0, 64], sizes = [8, 64], strides = [1, 1]} : vector<8x256xf32> to vector<8x64xf32>
    %559 = arith.negf %558 : vector<8x64xf32>
    %560 = math.exp %559 : vector<8x64xf32>
    %cst_130 = arith.constant 1.000000e+00 : f32
    %561 = vector.broadcast %cst_130 : f32 to vector<8x64xf32>
    %562 = arith.addf %561, %560 : vector<8x64xf32>
    %563 = arith.divf %561, %562 : vector<8x64xf32>
    %564 = vector.extract_strided_slice %551 {offsets = [0, 128], sizes = [8, 64], strides = [1, 1]} : vector<8x256xf32> to vector<8x64xf32>
    %565 = math.tanh %564 : vector<8x64xf32>
    %566 = vector.extract_strided_slice %551 {offsets = [0, 192], sizes = [8, 64], strides = [1, 1]} : vector<8x256xf32> to vector<8x64xf32>
    %567 = arith.negf %566 : vector<8x64xf32>
    %568 = math.exp %567 : vector<8x64xf32>
    %cst_131 = arith.constant 1.000000e+00 : f32
    %569 = vector.broadcast %cst_131 : f32 to vector<8x64xf32>
    %570 = arith.addf %569, %568 : vector<8x64xf32>
    %571 = arith.divf %569, %570 : vector<8x64xf32>
    %572 = arith.mulf %563, %538 : vector<8x64xf32>
    %573 = arith.mulf %557, %565 : vector<8x64xf32>
    %574 = arith.addf %572, %573 : vector<8x64xf32>
    %575 = math.tanh %574 : vector<8x64xf32>
    %576 = arith.mulf %571, %575 : vector<8x64xf32>
    %577 = vector.extract_strided_slice %576 {offsets = [0, 0], sizes = [8, 32], strides = [1, 1]} : vector<8x64xf32> to vector<8x32xf32>
    %c48_132 = arith.constant 48 : index
    %c0_133 = arith.constant 0 : index
    %578 = vector.load %arg7[%c48_132, %c0_133] : memref<64x64xf32, #tpu.memory_space<vmem>>, vector<8x32xf32>
    tpu.vector_store %arg7[%c48_132, %c0_133], %577 {strides = array<i32>} : memref<64x64xf32, #tpu.memory_space<vmem>>, vector<8x32xf32>,
    %579 = vector.extract_strided_slice %576 {offsets = [0, 32], sizes = [8, 32], strides = [1, 1]} : vector<8x64xf32> to vector<8x32xf32>
    %c8_134 = arith.constant 8 : index
    %c32_135 = arith.constant 32 : index
    %580 = vector.load %arg7[%c8_134, %c32_135] : memref<64x64xf32, #tpu.memory_space<vmem>>, vector<8x32xf32>
    tpu.vector_store %arg7[%c8_134, %c32_135], %579 {strides = array<i32>} : memref<64x64xf32, #tpu.memory_space<vmem>>, vector<8x32xf32>,
    %581 = vector.extract_strided_slice %326 {offsets = [56, 0], sizes = [8, 256], strides = [1, 1]} : vector<64x256xf32> to vector<8x256xf32>
    %582 = vector.extract_strided_slice %326 {offsets = [0, 0], sizes = [8, 256], strides = [1, 1]} : vector<64x256xf32> to vector<8x256xf32>
    %583 = vector.shape_cast %23 : vector<1x256xi1> to vector<1x256xi1>
    %584 = vector.broadcast %583 : vector<1x256xi1> to vector<8x256xi1>
    %585 = arith.select %584, %581, %582 : vector<8x256xi1>, vector<8x256xf32>
    %cst_136 = arith.constant dense<0.000000e+00> : vector<8x256xf32>
    %586 = tpu.matmul %576, %322, %cst_136 {dimension_numbers = #tpu.dot_dimension_numbers<[1], [0], [0], [1], [0, 0, 1, 1], [], []>} : vector<8x64xf32>, vector<64x256xf32>, vector<8x256xf32> -> vector<8x256xf32>
    %587 = arith.addf %585, %586 : vector<8x256xf32>
    %588 = vector.extract_strided_slice %587 {offsets = [0, 0], sizes = [8, 64], strides = [1, 1]} : vector<8x256xf32> to vector<8x64xf32>
    %589 = arith.negf %588 : vector<8x64xf32>
    %590 = math.exp %589 : vector<8x64xf32>
    %cst_137 = arith.constant 1.000000e+00 : f32
    %591 = vector.broadcast %cst_137 : f32 to vector<8x64xf32>
    %592 = arith.addf %591, %590 : vector<8x64xf32>
    %593 = arith.divf %591, %592 : vector<8x64xf32>
    %594 = vector.extract_strided_slice %587 {offsets = [0, 64], sizes = [8, 64], strides = [1, 1]} : vector<8x256xf32> to vector<8x64xf32>
    %595 = arith.negf %594 : vector<8x64xf32>
    %596 = math.exp %595 : vector<8x64xf32>
    %cst_138 = arith.constant 1.000000e+00 : f32
    %597 = vector.broadcast %cst_138 : f32 to vector<8x64xf32>
    %598 = arith.addf %597, %596 : vector<8x64xf32>
    %599 = arith.divf %597, %598 : vector<8x64xf32>
    %600 = vector.extract_strided_slice %587 {offsets = [0, 128], sizes = [8, 64], strides = [1, 1]} : vector<8x256xf32> to vector<8x64xf32>
    %601 = math.tanh %600 : vector<8x64xf32>
    %602 = vector.extract_strided_slice %587 {offsets = [0, 192], sizes = [8, 64], strides = [1, 1]} : vector<8x256xf32> to vector<8x64xf32>
    %603 = arith.negf %602 : vector<8x64xf32>
    %604 = math.exp %603 : vector<8x64xf32>
    %cst_139 = arith.constant 1.000000e+00 : f32
    %605 = vector.broadcast %cst_139 : f32 to vector<8x64xf32>
    %606 = arith.addf %605, %604 : vector<8x64xf32>
    %607 = arith.divf %605, %606 : vector<8x64xf32>
    %608 = arith.mulf %599, %574 : vector<8x64xf32>
    %609 = arith.mulf %593, %601 : vector<8x64xf32>
    %610 = arith.addf %608, %609 : vector<8x64xf32>
    %611 = math.tanh %610 : vector<8x64xf32>
    %612 = arith.mulf %607, %611 : vector<8x64xf32>
    %613 = vector.extract_strided_slice %612 {offsets = [0, 0], sizes = [8, 32], strides = [1, 1]} : vector<8x64xf32> to vector<8x32xf32>
    %c56_140 = arith.constant 56 : index
    %c0_141 = arith.constant 0 : index
    %614 = vector.load %arg7[%c56_140, %c0_141] : memref<64x64xf32, #tpu.memory_space<vmem>>, vector<8x32xf32>
    tpu.vector_store %arg7[%c56_140, %c0_141], %613 {strides = array<i32>} : memref<64x64xf32, #tpu.memory_space<vmem>>, vector<8x32xf32>,
    %615 = vector.extract_strided_slice %612 {offsets = [0, 32], sizes = [8, 32], strides = [1, 1]} : vector<8x64xf32> to vector<8x32xf32>
    %c0_142 = arith.constant 0 : index
    %c32_143 = arith.constant 32 : index
    %616 = vector.load %arg7[%c0_142, %c32_143] : memref<64x64xf32, #tpu.memory_space<vmem>>, vector<8x32xf32>
    tpu.vector_store %arg7[%c0_142, %c32_143], %615 {strides = array<i32>} : memref<64x64xf32, #tpu.memory_space<vmem>>, vector<8x32xf32>,
    %c136 = arith.constant 136 : index
    %c0_144 = arith.constant 0 : index
    %617 = vector.load %arg2[%c136, %c0_144] : memref<296x128xf32, #tpu.memory_space<vmem>>, vector<16x64xf32>
    %c0_145 = arith.constant 0 : index
    %c0_146 = arith.constant 0 : index
    %618 = vector.load %arg7[%c0_145, %c0_146] : memref<64x64xf32, #tpu.memory_space<vmem>>, vector<64x64xf32>
    %cst_147 = arith.constant dense<0.000000e+00> : vector<16x64xf32>
    %619 = tpu.matmul %617, %618, %cst_147 {dimension_numbers = #tpu.dot_dimension_numbers<[1], [0], [0], [1], [0, 0, 1, 1], [], []>} : vector<16x64xf32>, vector<64x64xf32>, vector<16x64xf32> -> vector<16x64xf32>
    %c0_148 = arith.constant 0 : index
    %c0_149 = arith.constant 0 : index
    %620 = vector.load %arg2[%c0_148, %c0_149] : memref<296x128xf32, #tpu.memory_space<vmem>>, vector<64x128xf32>
    %c64 = arith.constant 64 : index
    %c0_150 = arith.constant 0 : index
    %621 = vector.load %arg2[%c64, %c0_150] : memref<296x128xf32, #tpu.memory_space<vmem>>, vector<1x128xf32>
    %cst_151 = arith.constant dense<0.000000e+00> : vector<16x128xf32>
    %622 = tpu.matmul %619, %620, %cst_151 {dimension_numbers = #tpu.dot_dimension_numbers<[1], [0], [0], [1], [0, 0, 1, 1], [], []>} : vector<16x64xf32>, vector<64x128xf32>, vector<16x128xf32> -> vector<16x128xf32>
    %623 = vector.broadcast %621 : vector<1x128xf32> to vector<16x128xf32>
    %624 = arith.addf %622, %623 : vector<16x128xf32>
    %cst_152 = arith.constant 0.000000e+00 : f32
    %625 = vector.broadcast %cst_152 : f32 to vector<16x128xf32>
    %626 = arith.maximumf %624, %625 : vector<16x128xf32>
    %627 = vector.extract_strided_slice %626 {offsets = [0, 0], sizes = [16, 32], strides = [1, 1]} : vector<16x128xf32> to vector<16x32xf32>
    %628 = vector.extract_strided_slice %626 {offsets = [0, 32], sizes = [16, 32], strides = [1, 1]} : vector<16x128xf32> to vector<16x32xf32>
    %629 = vector.extract_strided_slice %626 {offsets = [0, 64], sizes = [16, 32], strides = [1, 1]} : vector<16x128xf32> to vector<16x32xf32>
    %630 = vector.extract_strided_slice %626 {offsets = [0, 96], sizes = [16, 32], strides = [1, 1]} : vector<16x128xf32> to vector<16x32xf32>
    %c152 = arith.constant 152 : index
    %c0_153 = arith.constant 0 : index
    %631 = vector.load %arg2[%c152, %c0_153] : memref<296x128xf32, #tpu.memory_space<vmem>>, vector<32x32xf32>
    %c184 = arith.constant 184 : index
    %c0_154 = arith.constant 0 : index
    %632 = vector.load %arg2[%c184, %c0_154] : memref<296x128xf32, #tpu.memory_space<vmem>>, vector<1x32xf32>
    %c256 = arith.constant 256 : index
    %c0_155 = arith.constant 0 : index
    %633 = vector.load %arg2[%c256, %c0_155] : memref<296x128xf32, #tpu.memory_space<vmem>>, vector<16x16xf32>
    %c272 = arith.constant 272 : index
    %c0_156 = arith.constant 0 : index
    %634 = vector.load %arg2[%c272, %c0_156] : memref<296x128xf32, #tpu.memory_space<vmem>>, vector<16x8xf32>
    %c288 = arith.constant 288 : index
    %c0_157 = arith.constant 0 : index
    %635 = vector.load %arg2[%c288, %c0_157] : memref<296x128xf32, #tpu.memory_space<vmem>>, vector<1x16xf32>
    %cst_158 = arith.constant dense<0.000000e+00> : vector<16x32xf32>
    %636 = tpu.matmul %627, %631, %cst_158 {dimension_numbers = #tpu.dot_dimension_numbers<[1], [0], [0], [1], [0, 0, 1, 1], [], []>} : vector<16x32xf32>, vector<32x32xf32>, vector<16x32xf32> -> vector<16x32xf32>
    %637 = vector.broadcast %632 : vector<1x32xf32> to vector<16x32xf32>
    %638 = arith.addf %636, %637 : vector<16x32xf32>
    %639 = tpu.transpose %628, [1, 0] : vector<16x32xf32> -> vector<32x16xf32>
    %cst_159 = arith.constant dense<0.000000e+00> : vector<16x16xf32>
    %640 = tpu.matmul %638, %639, %cst_159 {dimension_numbers = #tpu.dot_dimension_numbers<[1], [0], [0], [1], [0, 0, 1, 1], [], []>} : vector<16x32xf32>, vector<32x16xf32>, vector<16x16xf32> -> vector<16x16xf32>
    %641 = arith.mulf %640, %633 : vector<16x16xf32>
    %cst_160 = arith.constant dense<0.000000e+00> : vector<16x8xf32>
    %642 = tpu.matmul %641, %634, %cst_160 {dimension_numbers = #tpu.dot_dimension_numbers<[1], [0], [0], [1], [0, 0, 1, 1], [], []>} : vector<16x16xf32>, vector<16x8xf32>, vector<16x8xf32> -> vector<16x8xf32>
    %643 = tpu.iota {dimensions = array<i32: 1>} : vector<16x8xi32>
    %644 = arith.sitofp %643 : vector<16x8xi32> to vector<16x8xf32>
    %cst_161 = arith.constant dense<0xFF800000> : vector<16xf32>
    %645 = vector.multi_reduction <maximumf>, %642, %cst_161 [1] : vector<16x8xf32> to vector<16xf32>
    %646 = vector.shape_cast %645 : vector<16xf32> to vector<16x1xf32>
    %647 = vector.broadcast %646 : vector<16x1xf32> to vector<16x8xf32>
    %648 = arith.cmpf oge, %642, %647 : vector<16x8xf32>
    %cst_162 = arith.constant 8.000000e+00 : f32
    %649 = vector.broadcast %cst_162 : f32 to vector<16x8xf32>
    %650 = arith.select %648, %644, %649 : vector<16x8xi1>, vector<16x8xf32>
    %cst_163 = arith.constant dense<0x7F800000> : vector<16xf32>
    %651 = vector.multi_reduction <minimumf>, %650, %cst_163 [1] : vector<16x8xf32> to vector<16xf32>
    %652 = vector.shape_cast %651 : vector<16xf32> to vector<16x1xf32>
    %653 = vector.broadcast %635 : vector<1x16xf32> to vector<16x16xf32>
    %654 = vector.broadcast %652 : vector<16x1xf32> to vector<16x16xf32>
    %655 = arith.cmpf oeq, %653, %654 : vector<16x16xf32>
    %656 = arith.extui %655 : vector<16x16xi1> to vector<16x16xi32>
    %657 = arith.sitofp %656 : vector<16x16xi32> to vector<16x16xf32>
    %658 = arith.mulf %633, %657 : vector<16x16xf32>
    %cst_164 = arith.constant dense<0.000000e+00> : vector<16x32xf32>
    %659 = tpu.matmul %658, %629, %cst_164 {dimension_numbers = #tpu.dot_dimension_numbers<[1], [0], [0], [1], [0, 0, 1, 1], [], []>} : vector<16x16xf32>, vector<16x32xf32>, vector<16x32xf32> -> vector<16x32xf32>
    %c0_165 = arith.constant 0 : index
    %c0_166 = arith.constant 0 : index
    %660 = vector.load %arg3[%c0_165, %c0_166] : memref<72x264xf32, #tpu.memory_space<vmem>>, vector<32x264xf32>
    %c32_167 = arith.constant 32 : index
    %c0_168 = arith.constant 0 : index
    %661 = vector.load %arg3[%c32_167, %c0_168] : memref<72x264xf32, #tpu.memory_space<vmem>>, vector<1x264xf32>
    %c33 = arith.constant 33 : index
    %c0_169 = arith.constant 0 : index
    %662 = vector.load %arg3[%c33, %c0_169] : memref<72x264xf32, #tpu.memory_space<vmem>>, vector<1x264xf32>
    %c40_170 = arith.constant 40 : index
    %c0_171 = arith.constant 0 : index
    %663 = vector.load %arg3[%c40_170, %c0_171] : memref<72x264xf32, #tpu.memory_space<vmem>>, vector<32x264xf32>
    %cst_172 = arith.constant dense<0.000000e+00> : vector<16x264xf32>
    %664 = tpu.matmul %659, %660, %cst_172 {dimension_numbers = #tpu.dot_dimension_numbers<[1], [0], [0], [1], [0, 0, 1, 1], [], []>} : vector<16x32xf32>, vector<32x264xf32>, vector<16x264xf32> -> vector<16x264xf32>
    %665 = vector.broadcast %661 : vector<1x264xf32> to vector<16x264xf32>
    %666 = arith.addf %664, %665 : vector<16x264xf32>
    %cst_173 = arith.constant dense<0.000000e+00> : vector<16x264xf32>
    %667 = tpu.matmul %630, %663, %cst_173 {dimension_numbers = #tpu.dot_dimension_numbers<[1], [0], [0], [1], [0, 0, 1, 1], [], []>} : vector<16x32xf32>, vector<32x264xf32>, vector<16x264xf32> -> vector<16x264xf32>
    %668 = vector.broadcast %662 : vector<1x264xf32> to vector<16x264xf32>
    %669 = arith.addf %667, %668 : vector<16x264xf32>
    %670 = tpu.iota {dimensions = array<i32: 0>} : vector<264x8xi32>
    %671 = tpu.iota {dimensions = array<i32: 1>} : vector<264x8xi32>
    %c33_i32 = arith.constant 33 : i32
    %672 = vector.broadcast %c33_i32 : i32 to vector<264x8xi32>
    %673 = arith.muli %671, %672 : vector<264x8xi32>
    %674 = arith.cmpi sge, %670, %673 : vector<264x8xi32>
    %c33_i32_174 = arith.constant 33 : i32
    %675 = vector.broadcast %c33_i32_174 : i32 to vector<264x8xi32>
    %676 = arith.addi %673, %675 : vector<264x8xi32>
    %677 = arith.cmpi slt, %670, %676 : vector<264x8xi32>
    %678 = arith.andi %674, %677 : vector<264x8xi1>
    %679 = arith.extui %678 : vector<264x8xi1> to vector<264x8xi32>
    %680 = arith.sitofp %679 : vector<264x8xi32> to vector<264x8xf32>
    %681 = arith.mulf %666, %669 : vector<16x264xf32>
    %cst_175 = arith.constant dense<0.000000e+00> : vector<16x8xf32>
    %682 = tpu.matmul %681, %680, %cst_175 {dimension_numbers = #tpu.dot_dimension_numbers<[1], [0], [0], [1], [0, 0, 1, 1], [], []>} : vector<16x264xf32>, vector<264x8xf32>, vector<16x8xf32> -> vector<16x8xf32>
    %683 = vector.extract_strided_slice %642 {offsets = [0, 0], sizes = [8, 8], strides = [1, 1]} : vector<16x8xf32> to vector<8x8xf32>
    %c0_176 = arith.constant 0 : index
    %c0_177 = arith.constant 0 : index
    %c0_178 = arith.constant 0 : index
    %684 = vector.load %arg4[%c0_176, %c0_177, %c0_178] : memref<2x8x8xf32, #tpu.memory_space<vmem>>, vector<1x8x8xf32>
    %685 = vector.shape_cast %684 : vector<1x8x8xf32> to vector<8x8xf32>
    %686 = vector.shape_cast %683 : vector<8x8xf32> to vector<1x8x8xf32>
    tpu.vector_store %arg4[%c0_176, %c0_177, %c0_178], %686 {strides = array<i32>} : memref<2x8x8xf32, #tpu.memory_space<vmem>>, vector<1x8x8xf32>,
    %687 = vector.extract_strided_slice %682 {offsets = [0, 0], sizes = [8, 8], strides = [1, 1]} : vector<16x8xf32> to vector<8x8xf32>
    %c0_179 = arith.constant 0 : index
    %c0_180 = arith.constant 0 : index
    %c0_181 = arith.constant 0 : index
    %688 = vector.load %arg5[%c0_179, %c0_180, %c0_181] : memref<2x8x8xf32, #tpu.memory_space<vmem>>, vector<1x8x8xf32>
    %689 = vector.shape_cast %688 : vector<1x8x8xf32> to vector<8x8xf32>
    %690 = vector.shape_cast %687 : vector<8x8xf32> to vector<1x8x8xf32>
    tpu.vector_store %arg5[%c0_179, %c0_180, %c0_181], %690 {strides = array<i32>} : memref<2x8x8xf32, #tpu.memory_space<vmem>>, vector<1x8x8xf32>,
    %691 = vector.extract_strided_slice %642 {offsets = [8, 0], sizes = [8, 8], strides = [1, 1]} : vector<16x8xf32> to vector<8x8xf32>
    %c1 = arith.constant 1 : index
    %c0_182 = arith.constant 0 : index
    %c0_183 = arith.constant 0 : index
    %692 = vector.load %arg4[%c1, %c0_182, %c0_183] : memref<2x8x8xf32, #tpu.memory_space<vmem>>, vector<1x8x8xf32>
    %693 = vector.shape_cast %692 : vector<1x8x8xf32> to vector<8x8xf32>
    %694 = vector.shape_cast %691 : vector<8x8xf32> to vector<1x8x8xf32>
    tpu.vector_store %arg4[%c1, %c0_182, %c0_183], %694 {strides = array<i32>} : memref<2x8x8xf32, #tpu.memory_space<vmem>>, vector<1x8x8xf32>,
    %695 = vector.extract_strided_slice %682 {offsets = [8, 0], sizes = [8, 8], strides = [1, 1]} : vector<16x8xf32> to vector<8x8xf32>
    %c1_184 = arith.constant 1 : index
    %c0_185 = arith.constant 0 : index
    %c0_186 = arith.constant 0 : index
    %696 = vector.load %arg5[%c1_184, %c0_185, %c0_186] : memref<2x8x8xf32, #tpu.memory_space<vmem>>, vector<1x8x8xf32>
    %697 = vector.shape_cast %696 : vector<1x8x8xf32> to vector<8x8xf32>
    %698 = vector.shape_cast %695 : vector<8x8xf32> to vector<1x8x8xf32>
    tpu.vector_store %arg5[%c1_184, %c0_185, %c0_186], %698 {strides = array<i32>} : memref<2x8x8xf32, #tpu.memory_space<vmem>>, vector<1x8x8xf32>,
    return
  }
}

</mosaic_0001>

<bundles_post_ra>
// kernel: cs_parser_forward.1
= control target key start
LH: loop header
LB: loop body
LE: loop exit
PB: predicated region body
PF: predicated region fallthrough
CT: control target
= control target key end

     0   :  { %11 = vsyncpa [#allocation5], 0  ;;  %v4375_v2 = vmov 0   ;;  %vm68_vm0 = vcmask 1045504   ;;  %s5852_s0 = inlined_call_operand.vmem [shape: s32[16,2], index: 0, kind: input, shape index: {}]   ;;  %s5853_s1 = inlined_call_operand.vmem [shape: f32[232,256], index: 1, kind: input, shape index: {}]   ;;  %s5854_s2 = inlined_call_operand.vmem [shape: f32[296,128], index: 2, kind: input, shape index: {}]   ;;  %s5855_s3 = inlined_call_operand.vmem [shape: f32[72,264], index: 3, kind: input, shape index: {}]   ;;  %s5856_s4 = inlined_call_operand.hbm [shape: f32[2,8,8], index: 4, kind: output, shape index: {0}]   ;;  %s5857_s5 = inlined_call_operand.hbm [shape: f32[2,8,8], index: 5, kind: output, shape index: {1}]  }
   0x1   :  { %v22_v0 = vld [vmem:[%s5852_s0 + $0x8] sm:$0xff]  ;;  %v21_v1 = vld [vmem:[%s5852_s0] sm:$0xff]  ;;  %4137 = vset.pattern.permute.xlu1 %v4375_v2  ;;  %4135 = vset.pattern.permute.xlu0 %v4375_v2  ;;  %v60_v3 = vld [vmem:[%s5854_s2 + $0xf8] sm:$0x3f] }
   0x2   :  { %30 = vperm.xlu1 %4137, %v22_v0   ;;  %27 = vperm.xlu0 %4135, %v21_v1   ;;  %v59_v4 = vld [vmem:[%s5854_s2 + $0xf0] sm:$0xff] }
   0x3   :  { %3984 = vmatprep.subr.msk.mxu0 %vm68_vm0, %v60_v3 }
   0x4   :  { %3985 = vmatpush3.msk.msra.mxu0 %vm68_vm0, %v60_v3 }
   0x5   :  { %12 = vsyncpa [#allocation7], 0  ;;  %v4376_v5 = vmov 1   ;;  %v58_v6 = vld [vmem:[%s5854_s2 + $0xe8] sm:$0xff]  ;;  %3986 = vmatprep.subr.mxu0 %v59_v4  ;;  %v57_v7 = vld [vmem:[%s5854_s2 + $0xe0] sm:$0xff]  ;;  %v23_v12 = vlaneseq  ;;  %v4377_v19 = vmov 0.0  }
   0x6   :  { %4138 = vset.pattern.permute.xlu1 %v4376_v5  ;;  %4136 = vset.pattern.permute.xlu0 %v4376_v5  ;;  %v56_v8 = vld [vmem:[%s5854_s2 + $0xd8] sm:$0xff]  ;;  %v55_v9 = vld [vmem:[%s5854_s2 + $0xd0] sm:$0xff]  ;;  %v54_v10 = vld [vmem:[%s5854_s2 + $0xc8] sm:$0xff]  ;;  %vm61_vm6 = vcmask 506880   ;;  %vm155_vm7 = vcmask 130048   ;;  %vm325_vm8 = vcmask 261120  }
   0x7   :  { %43 = vperm.xlu1 %4138, %v22_v0   ;;  %40 = vperm.xlu0 %4136, %v21_v1   ;;  %v53_v11 = vld [vmem:[%s5854_s2 + $0xc0] sm:$0xff]  ;;  %v4449_v13 = vand.u32 127, %v23_v12  ;;  %v147_v26 = vld [vmem:[%s5854_s2 + $0x48] sm:$0xff]  ;;  %v295_v27 = vld [vmem:[%s5853_s1 + $0x38] sm:$0xff]  ;;  %v4666_v5 = vshrl.u32 %v23_v12, 7  ;;  %s4378_s27 = smov 64  }
   0x8   :  { %3987 = vmatpush3.msra.mxu0 %v59_v4  ;;  %4007 = vmatprep.mubr.msk.f32.mxu1 %vm155_vm7, %v147_v26  ;;  %v294_v28 = vld [vmem:[%s5853_s1 + $0x30] sm:$0xff]  ;;  %v293_v29 = vld [vmem:[%s5853_s1 + $0x28] sm:$0xff]  ;;  %v292_v30 = vld [vmem:[%s5853_s1 + $0x20] sm:$0xff]  ;;  %vm580_vm12 = vcmask 523520   ;;  %vm476_vm13 = vcmask 523264   ;;  %s4379_s22 = smov 96  }
   0x9   :  { %3988 = vmatprep.subr.mxu0 %v58_v6  ;;  %v3697_v16 = vadd.s32 4294967246, %v4449_v13  ;;  %vm25_vm3 = vcmp.lt.s32.totalorder %v4449_v13, 50  ;;  %v291_v31 = vld [vmem:[%s5853_s1 + $0x18] sm:$0xff]  ;;  %v148_v34 = vld [vmem:[%s5854_s2 + $0x50] sm:$0xff]  ;;  %v150_v36 = vld [vmem:[%s5854_s2 + $0x60] sm:$0xff]  ;;  %vm5858_vm14 = vcmask 64512  }
   0xa   :  { %3989 = vmatpush3.msra.mxu0 %v58_v6  ;;  %v149_v35 = vld [vmem:[%s5854_s2 + $0x58] sm:$0xff]  ;;  %v151_v37 = vld [vmem:[%s5854_s2 + $0x68] sm:$0xff]  ;;  %v152_v38 = vld [vmem:[%s5854_s2 + $0x70] sm:$0xff]  ;;  %s4380_s12 = smov 32  }
   0xb   :  { %3990 = vmatprep.subr.mxu0 %v57_v7  ;;  %v153_v39 = vld [vmem:[%s5854_s2 + $0x78] sm:$0xff]  ;;  %v154_v40 = vld [vmem:[%s5854_s2 + $0x80] sm:$0xff]  ;;  %v290_v41 = vld [vmem:[%s5853_s1 + $0x10] sm:$0xff] }
   0xc   :  { %3991 = vmatpush3.msra.mxu0 %v57_v7  ;;  %v289_v42 = vld [vmem:[%s5853_s1 + $0x8] sm:$0xff]  ;;  %v288_v43 = vld [vmem:[%s5853_s1] sm:$0xff]  ;;  %v4520_v44 = vld [vmem:[%s5853_s1 + $0xb8] sm:$0xff]  ;;  %v4672_v7 = vsub.s32 0, %v4666_v5 }
   0xd   :  { %3992 = vmatprep.subr.mxu0 %v56_v8  ;;  %v4527_v46 = vld [vmem:[%s5853_s1 + $0xb0] sm:$0xff]  ;;  %v4532_v48 = vld [vmem:[%s5853_s1 + $0xa8] sm:$0xff]  ;;  %v4538_v49 = vld [vmem:[%s5853_s1 + $0xa0] sm:$0xff] }
   0xe   :  { %3993 = vmatpush3.msra.mxu0 %v56_v8  ;;  %v4545_v51 = vld [vmem:[%s5853_s1 + $0x98] sm:$0xff]  ;;  %v4551_v52 = vld [vmem:[%s5853_s1 + $0x90] sm:$0xff]  ;;  %v4557_v54 = vld [vmem:[%s5853_s1 + $0x88] sm:$0xff] }
   0xf   :  { %3994 = vmatprep.subr.mxu0 %v55_v9  ;;  %v4564_v55 = vld [vmem:[%s5853_s1 + $0x80] sm:$0xff]  ;;  %v4573_v58 = vld [vmem:[%s5853_s1 + $0x78] sm:$0xff]  ;;  %v4580_v59 = vld [vmem:[%s5853_s1 + $0x70] sm:$0xff] }
  0x10   :  { %3995 = vmatpush3.msra.mxu0 %v55_v9  ;;  %v4588_v60 = vld [vmem:[%s5853_s1 + $0x68] sm:$0xff]  ;;  %v4595_v62 = vld [vmem:[%s5853_s1 + $0x60] sm:$0xff]  ;;  %v4603_v63 = vld [vmem:[%s5853_s1 + $0x58] sm:$0xff] }
  0x11   :  { %3996 = vmatprep.subr.mxu0 %v54_v10  ;;  %v4610_v0 = vld [vmem:[%s5853_s1 + $0x50] sm:$0xff]  ;;  %v4616_v1 = vld [vmem:[%s5853_s1 + $0x48] sm:$0xff]  ;;  %v4623_v4 = vld [vmem:[%s5853_s1 + $0x40] sm:$0xff] }
  0x12   :  { %3997 = vmatpush3.msra.mxu0 %v54_v10  ;;  %v3711_v6 = vld [vmem:[%s5853_s1 + $0x1c2] ss:$8 sm:$0x3]  ;;  %v3712_v8 = vld [vmem:[%s5853_s1 + $0x1c0] ss:$8 sm:$0x3] }
  0x13   :  { %3998 = vmatprep.subr.mxu0 %v53_v11  ;;  %v4678_v10 = vsub.s32 1, %v4666_v5  ;;  %vm287_vm9 = vcmp.gt.f32.partialorder %v3711_v6, 0.5  ;;  %v318_v12 = vrot.slane %v3712_v8, %v4672_v7 }
  0x14   :  { %3999 = vmatpush3.msra.mxu0 %v53_v11 }
  0x15   :  { %374 = vmatprep.subr.mxu0 %v295_v27 }
  0x7d   :  { %v28_v14 = vpop.permute.xlu0 %27  ;;  %v31_v15 = vpop.permute.xlu1 %30 }
  0x7e   :  { %vm33_vm1 = vcmp.eq.s32.totalorder %v31_v15, %v4449_v13  ;;  %vm32_vm2 = vcmp.eq.s32.totalorder %v28_v14, %v4449_v13  ;;  %v322_v15 = vrot.slane %v3712_v8, %v4678_v10 }
  0x7f   :  { %v3696_v20 = vsel %vm33_vm1, 1.0, %v4377_v19  ;;  %v3695_v22 = vsel %vm32_vm2, 1.0, %v4377_v19 }
  0x82   :  { %v44_v17 = vpop.permute.xlu1 %43  ;;  %v41_v18 = vpop.permute.xlu0 %40 }
  0x83   :  { %vm46_vm4 = vcmp.eq.s32.totalorder %v44_v17, %v3697_v16  ;;  %vm45_vm5 = vcmp.eq.s32.totalorder %v41_v18, %v3697_v16  ;;  %v463_v16 = vsel %vm287_vm9, 1, %v4375_v2 }
  0x84   :  { %v3699_v21 = vsel %vm46_vm4, 1.0, %v4377_v19  ;;  %v3698_v23 = vsel %vm45_vm5, 1.0, %v4377_v19  ;;  %v471_v26 = vrot.slane %v463_v16, %v4678_v10 }
  0x85   :  { %v52_v24 = vsel %vm25_vm3, %v3696_v20, %v3699_v21  ;;  %v51_v25 = vsel %vm25_vm3, %v3695_v22, %v3698_v23  ;;  %v467_v21 = vrot.slane %v463_v16, %v4672_v7 }
  0x86   :  { %4000 = vmatprep.mubr.msk.f32.mxu0 %vm61_vm6, %v51_v25  ;;  %vm4705_vm11 = vcmp.eq.s32.totalorder %v471_v26, 1 }
  0x87   :  { %4001 = vmatmul.mubr.msk.f32.vlgmr.msra.gmra.mxu0 %vm61_vm6, %v52_v24  ;;  %vm4697_vm10 = vcmp.eq.s32.totalorder %v467_v21, 1 }
  0x88   :  { %414 = vmatprep.mubr.f32.mxu0 %v4377_v19  ;;  %375 = vmatpush1.msra.mxu0 %v294_v28 }
  0x89   :  { %376 = vmatprep.subr.mxu0 %v293_v29 }
  0x8a   :  { %377 = vmatpush1.msra.mxu0 %v292_v30 }
  0x8b   :  { %378 = vmatprep.subr.mxu0 %v291_v31 }
  0x8c   :  { %379 = vmatpush1.msra.mxu0 %v290_v41 }
  0x8d   :  { %380 = vmatprep.subr.mxu0 %v289_v42 }
  0x8e   :  { %381 = vmatpush1.msra.mxu0 %v288_v43 }
  0x8f   :  { %496 = vmatprep.subr.mxu0 %v4520_v44 }
 0x147   :  { %v4002_v32 = vpop.f32.mrf.mxu0 }
 0x148   :  { %4003 = vmatprep.subr.mxu1 %v4002_v32 }
 0x149   :  { %v138_v33 = vpop.f32.mrf.mxu0  ;;  %4004 = vmatpush3.msra.mxu1 %v4002_v32 }
 0x14a   :  { %4005 = vmatprep.subr.mxu1 %v138_v33 }
 0x14b   :  { %4006 = vmatpush3.msra.mxu1 %v138_v33 }
 0x14c   :  { %4008 = vmatmul.mubr.msk.f32.vlgmr.msra.gmra.mxu1 %vm155_vm7, %v148_v34  ;;  %4116 = vmatprep.subr.mxu1 %v295_v27 }
 0x14d   :  { %4010 = vmatprep.mubr.msk.f32.mxu1 %vm155_vm7, %v149_v35  ;;  %4120 = vmatpush1.msra.mxu1 %v294_v28 }
 0x14e   :  { %4117 = vmatprep.subr.mxu1 %v293_v29 }
 0x14f   :  { %4121 = vmatpush1.msra.mxu1 %v292_v30 }
 0x150   :  { %4011 = vmatmul.mubr.msk.f32.gmra.mxu1 %vm155_vm7, %v150_v36  ;;  %4118 = vmatprep.subr.mxu1 %v291_v31 }
 0x151   :  { %4013 = vmatprep.mubr.msk.f32.mxu1 %vm155_vm7, %v151_v37  ;;  %4122 = vmatpush1.msra.mxu1 %v290_v41 }
 0x152   :  { %4119 = vmatprep.subr.mxu1 %v289_v42 }
 0x153   :  { %4123 = vmatpush1.msra.mxu1 %v288_v43 }
 0x154   :  { %4014 = vmatmul.mubr.msk.f32.gmra.mxu1 %vm155_vm7, %v152_v38  ;;  %707 = vmatprep.subr.mxu1 %v4520_v44 }
 0x155   :  { %4016 = vmatprep.mubr.msk.f32.mxu1 %vm155_vm7, %v153_v39 }
 0x158   :  { %4017 = vmatmul.mubr.msk.f32.gmra.mxu1 %vm155_vm7, %v154_v40 }
 0x159   :  { %438 = vmatprep.mubr.f32.mxu1 %v4377_v19 }
 0x20c   :  { %v4009_v45 = vpop.f32.mrf.mxu1 }
 0x20e   :  { %v246_v47 = vpop.f32.mrf.mxu1 }
 0x20f   :  { %3713 = vmatmul.mubr.msk.f32.vlgmr.msra.gmra.mxu0 %vm325_vm8, %v246_v47 }
 0x210   :  { %v4012_v50 = vpop.f32.mrf.mxu1  ;;  %420 = vmatprep.mubr.f32.mxu0 %v4377_v19  ;;  %497 = vmatpush1.msra.mxu0 %v4527_v46 }
 0x211   :  { %498 = vmatprep.subr.mxu0 %v4532_v48 }
 0x212   :  { %v256_v53 = vpop.f32.mrf.mxu1  ;;  %499 = vmatpush1.msra.mxu0 %v4538_v49 }
 0x213   :  { %3714 = vmatmul.mubr.msk.f32.gmra.mxu0 %vm325_vm8, %v4009_v45  ;;  %500 = vmatprep.subr.mxu0 %v4545_v51 }
 0x214   :  { %v4015_v56 = vpop.f32.mrf.mxu1  ;;  %426 = vmatprep.mubr.f32.mxu0 %v4377_v19  ;;  %501 = vmatpush1.msra.mxu0 %v4551_v52 }
 0x215   :  { %502 = vmatprep.subr.mxu0 %v4557_v54 }
 0x216   :  { %v266_v57 = vpop.f32.mrf.mxu1  ;;  %503 = vmatpush1.msra.mxu0 %v4564_v55 }
 0x217   :  { %3715 = vmatmul.mubr.msk.f32.gmra.mxu0 %vm325_vm8, %v256_v53  ;;  %3717 = vmatmul.mubr.msk.f32.vlgmr.msra.gmra.mxu1 %vm325_vm8, %v266_v57 }
 0x218   :  { %432 = vmatprep.mubr.f32.mxu0 %v4377_v19  ;;  %444 = vmatprep.mubr.f32.mxu1 %v4377_v19  ;;  %v4018_v61 = vpop.f32.mrf.mxu1 }
 0x219   :  { %504 = vmatprep.subr.mxu0 %v4573_v58  ;;  %708 = vmatpush1.msra.mxu1 %v4527_v46 }
 0x21a   :  { %505 = vmatpush1.msra.mxu0 %v4580_v59  ;;  %709 = vmatprep.subr.mxu1 %v4532_v48  ;;  %v276_v3 = vpop.f32.mrf.mxu1 }
 0x21b   :  { %3716 = vmatmul.mubr.msk.f32.gmra.mxu0 %vm325_vm8, %v4012_v50  ;;  %3718 = vmatmul.mubr.msk.f32.gmra.mxu1 %vm325_vm8, %v4015_v56 }
 0x21c   :  { %450 = vmatprep.mubr.f32.mxu1 %v4377_v19  ;;  %506 = vmatprep.subr.mxu0 %v4588_v60 }
 0x21d   :  { %507 = vmatpush1.msra.mxu0 %v4595_v62  ;;  %544 = vmatprep.mubr.f32.mxu0 %v4377_v19 }
 0x21e   :  { %508 = vmatprep.subr.mxu0 %v4603_v63  ;;  %710 = vmatpush1.msra.mxu1 %v4538_v49 }
 0x21f   :  { %3719 = vmatmul.mubr.msk.f32.gmra.mxu1 %vm325_vm8, %v276_v3  ;;  %509 = vmatpush1.msra.mxu0 %v4610_v0 }
 0x220   :  { %456 = vmatprep.mubr.f32.mxu1 %v4377_v19  ;;  %510 = vmatprep.subr.mxu0 %v4616_v1 }
 0x221   :  { %511 = vmatpush1.msra.mxu0 %v4623_v4  ;;  %711 = vmatprep.subr.mxu1 %v4545_v51 }
 0x222   :  { %545 = vmatmul.mubr.f32.vlgmr.msra.gmra.mxu0 %v4377_v19  ;;  %602 = vmatprep.subr.mxu0 %v4520_v44 }
 0x223   :  { %3720 = vmatmul.mubr.msk.f32.gmra.mxu1 %vm325_vm8, %v4018_v61  ;;  %603 = vmatpush1.msra.mxu0 %v4527_v46 }
 0x224   :  { %604 = vmatprep.subr.mxu0 %v4532_v48  ;;  %650 = vmatprep.mubr.f32.mxu0 %v4377_v19 }
 0x225   :  { %605 = vmatpush1.msra.mxu0 %v4538_v49  ;;  %712 = vmatpush1.msra.mxu1 %v4551_v52 }
 0x226   :  { %606 = vmatprep.subr.mxu0 %v4545_v51  ;;  %713 = vmatprep.subr.mxu1 %v4557_v54 }
 0x227   :  { %607 = vmatpush1.msra.mxu0 %v4551_v52  ;;  %714 = vmatpush1.msra.mxu1 %v4564_v55 }
 0x228   :  { %608 = vmatprep.subr.mxu0 %v4557_v54  ;;  %715 = vmatprep.subr.mxu1 %v4573_v58 }
 0x229   :  { %609 = vmatpush1.msra.mxu0 %v4564_v55  ;;  %716 = vmatpush1.msra.mxu1 %v4580_v59 }
 0x22a   :  { %610 = vmatprep.subr.mxu0 %v4573_v58  ;;  %717 = vmatprep.subr.mxu1 %v4588_v60 }
 0x22b   :  { %611 = vmatpush1.msra.mxu0 %v4580_v59  ;;  %718 = vmatpush1.msra.mxu1 %v4595_v62 }
 0x22c   :  { %612 = vmatprep.subr.mxu0 %v4588_v60  ;;  %719 = vmatprep.subr.mxu1 %v4603_v63 }
 0x22d   :  { %613 = vmatpush1.msra.mxu0 %v4595_v62  ;;  %720 = vmatpush1.msra.mxu1 %v4610_v0 }
 0x22e   :  { %614 = vmatprep.subr.mxu0 %v4603_v63  ;;  %721 = vmatprep.subr.mxu1 %v4616_v1 }
 0x22f   :  { %615 = vmatpush1.msra.mxu0 %v4610_v0  ;;  %722 = vmatpush1.msra.mxu1 %v4623_v4 }
 0x230   :  { %616 = vmatprep.subr.mxu0 %v4616_v1  ;;  %755 = vmatprep.mubr.f32.mxu1 %v4377_v19 }
 0x231   :  { %617 = vmatpush1.msra.mxu0 %v4623_v4  ;;  %917 = vmatprep.subr.mxu1 %v4520_v44 }
 0x232   :  { %812 = vmatprep.subr.mxu0 %v4520_v44 }
 0x2cf   :  { %v416_v9 = vpop.f32.mrf.mxu0 }
 0x2d0   :  { %v4757_v16 = vadd.f32 %v416_v9, %v318_v12 }
 0x2d1   :  { %v418_v11 = vpop.f32.mrf.mxu0 }
 0x2d2   :  { %v4769_v26 = vadd.f32 %v418_v11, %v322_v15 }
 0x2d3   :  { %v422_v14 = vpop.f32.mrf.mxu0 }
 0x2d4   :  { %v4683_v17 = vadd.f32 %v422_v14, %v318_v12 }
 0x2d5   :  { %v424_v18 = vpop.f32.mrf.mxu0 }
 0x2d6   :  { %v4685_v20 = vadd.f32 %v424_v18, %v322_v15 }
 0x2d7   :  { %v428_v22 = vpop.f32.mrf.mxu0  ;;  %v440_v23 = vpop.f32.mrf.mxu1 }
 0x2d8   :  { %v4688_v24 = vadd.f32 %v428_v22, %v318_v12  ;;  %v4690_v25 = vadd.f32 %v440_v23, %v318_v12 }
 0x2d9   :  { %v430_v27 = vpop.f32.mrf.mxu0  ;;  %v442_v28 = vpop.f32.mrf.mxu1 }
 0x2da   :  { %v4693_v29 = vadd.f32 %v430_v27, %v322_v15  ;;  %v4695_v2 = vadd.f32 %v442_v28, %v322_v15 }
 0x2db   :  { %v434_v31 = vpop.f32.mrf.mxu0  ;;  %v446_v32 = vpop.f32.mrf.mxu1 }
 0x2dc   :  { %v4701_v33 = vadd.f32 %v434_v31, %v318_v12  ;;  %v4703_v34 = vadd.f32 %v446_v32, %v318_v12 }
 0x2dd   :  { %v436_v36 = vpop.f32.mrf.mxu0  ;;  %v448_v37 = vpop.f32.mrf.mxu1 }
 0x2de   :  { %v4709_v38 = vadd.f32 %v436_v36, %v322_v15  ;;  %v4711_v39 = vadd.f32 %v448_v37, %v322_v15  ;;  %v687_v40 = vsel %vm4697_vm10, %v4688_v24, %v4703_v34  ;;  %v792_v41 = vsel %vm4697_vm10, %v4701_v33, %v4690_v25 }
 0x2df   :  { %v452_v42 = vpop.f32.mrf.mxu1  ;;  %v897_v43 = vsel %vm4697_vm10, %v4690_v25, %v4701_v33  ;;  %v1002_v45 = vsel %vm4697_vm10, %v4703_v34, %v4688_v24 }
 0x2e0   :  { %v4729_v47 = vadd.f32 %v452_v42, %v318_v12  ;;  %v688_v50 = vsel %vm4705_vm11, %v4693_v29, %v4711_v39  ;;  %v793_v53 = vsel %vm4705_vm11, %v4709_v38, %v4695_v2  ;;  %v898_v56 = vsel %vm4705_vm11, %v4695_v2, %v4709_v38 }
 0x2e1   :  { %v454_v57 = vpop.f32.mrf.mxu1  ;;  %v1003_v61 = vsel %vm4705_vm11, %v4711_v39, %v4693_v29 }
 0x2e2   :  { %v4747_v3 = vadd.f32 %v454_v57, %v322_v15  ;;  %v582_v6 = vsel %vm4697_vm10, %v4683_v17, %v4729_v47  ;;  %v1107_v8 = vsel %vm4697_vm10, %v4729_v47, %v4683_v17 }
 0x2e3   :  { %v458_v14 = vpop.f32.mrf.mxu1 }
 0x2e4   :  { %v4759_v18 = vadd.f32 %v458_v14, %v318_v12  ;;  %v583_v21 = vsel %vm4705_vm11, %v4685_v20, %v4747_v3  ;;  %v546_v12 = vpop.f32.mrf.mxu0 }
 0x2e5   :  { %v460_v23 = vpop.f32.mrf.mxu1 }
 0x2e6   :  { %v474_v9 = vsel %vm4697_vm10, %v4757_v16, %v4759_v18  ;;  %v4775_v27 = vadd.f32 %v460_v23, %v322_v15  ;;  %v548_v15 = vpop.f32.mrf.mxu0 }
 0x2e7   :  { %v551_v31 = vadd.f32 %v546_v12, %v474_v9 }
 0x2e8   :  { %v475_v36 = vsel %vm4705_vm11, %v4769_v26, %v4775_v27 }
 0x2e9   :  { %v3721_v32 = vmul.f32 -1.442695, %v551_v31  ;;  %v552_v37 = vadd.f32 %v548_v15, %v475_v36 }
 0x2eb   :  { %4139 = vpow2.f32 %v3721_v32  ;;  %v3722_v12 = vmul.f32 -1.442695, %v552_v37 }
 0x2ec   :  { %4141 = vtanh.f32 %v552_v37 }
 0x2f8   :  { %v4140_v42 = vpop.eup %4139 }
 0x2f9   :  { %v556_v57 = vadd.f32 1.0, %v4140_v42  ;;  %v4142_v14 = vpop.eup %4141 }
 0x2fb   :  { %4143 = vrcp.f32 %v556_v57 }
 0x2fc   :  { %4145 = vpow2.f32 %v3722_v12 }
 0x308   :  { %v4144_v23 = vpop.eup %4143 }
 0x309   :  { %v567_v9 = vmul.f32 %v4144_v23, %v4142_v14  ;;  %v4146_v31 = vpop.eup %4145  ;;  %v566_v11 = vmul.f32 0.0, %v4144_v23 }
 0x30a   :  { %v563_v32 = vadd.f32 1.0, %v4146_v31 }
 0x30b   :  { %569 = vrot.lane.b32.xlu1 %v567_v9, %s4378_s27 }
 0x30c   :  { %4147 = vrcp.f32 %v563_v32 }
 0x319   :  { %v4148_v36 = vpop.eup %4147 }
 0x37d   :  { %v570_v28 = vpop.permute.xlu1 %569 }
 0x37e   :  { %v572_v22 = vadd.f32 %v570_v28, %v566_v11 }
 0x380   :  { %4149 = vtanh.f32 %v572_v22 }
 0x38d   :  { %v4150_v15 = vpop.eup %4149 }
 0x38e   :  { %v574_v42 = vmul.f32 %v4150_v15, %v4148_v36 }
 0x390   :  { %576 = vrot.lane.b32.xlu0 %v574_v42, %s4378_s27 }
 0x402   :  { %v577_v57 = vpop.permute.xlu0 %576 }
 0x403   :  { %579 = vst.msk [vmem:[#allocation2] sm:$0xff] %vm325_vm8, %v577_v57  ;;  %3723 = vmatmul.mubr.msk.f32.vlgmr.msra.gmra.mxu0 %vm476_vm13, %v577_v57 }
 0x404   :  { %581 = vst.msk [vmem:[#allocation2 + $0x38] sm:$0xff] %vm580_vm12, %v577_v57  ;;  %813 = vmatpush1.msra.mxu0 %v4527_v46  ;;  %860 = vmatprep.mubr.f32.mxu0 %v4377_v19 }
 0x405   :  { %814 = vmatprep.subr.mxu0 %v4532_v48 }
 0x406   :  { %815 = vmatpush1.msra.mxu0 %v4538_v49 }
 0x407   :  { %816 = vmatprep.subr.mxu0 %v4545_v51 }
 0x408   :  { %817 = vmatpush1.msra.mxu0 %v4551_v52 }
 0x409   :  { %818 = vmatprep.subr.mxu0 %v4557_v54 }
 0x40a   :  { %819 = vmatpush1.msra.mxu0 %v4564_v55 }
 0x40b   :  { %820 = vmatprep.subr.mxu0 %v4573_v58 }
 0x40c   :  { %821 = vmatpush1.msra.mxu0 %v4580_v59 }
 0x40d   :  { %822 = vmatprep.subr.mxu0 %v4588_v60 }
 0x40e   :  { %823 = vmatpush1.msra.mxu0 %v4595_v62 }
 0x40f   :  { %824 = vmatprep.subr.mxu0 %v4603_v63 }
 0x410   :  { %825 = vmatpush1.msra.mxu0 %v4610_v0 }
 0x411   :  { %826 = vmatprep.subr.mxu0 %v4616_v1 }
 0x412   :  { %827 = vmatpush1.msra.mxu0 %v4623_v4 }
 0x413   :  { %1022 = vmatprep.subr.mxu0 %v4520_v44 }
 0x4c3   :  { %v652_v28 = vpop.f32.mrf.mxu0 }
 0x4c4   :  { %v657_v11 = vadd.f32 %v652_v28, %v582_v6 }
 0x4c5   :  { %v654_v14 = vpop.f32.mrf.mxu0 }
 0x4c6   :  { %v3724_v37 = vmul.f32 -1.442695, %v657_v11  ;;  %v658_v23 = vadd.f32 %v654_v14, %v583_v21 }
 0x4c8   :  { %4151 = vpow2.f32 %v3724_v37  ;;  %v3725_v15 = vmul.f32 -1.442695, %v658_v23 }
 0x4c9   :  { %4153 = vtanh.f32 %v658_v23 }
 0x4d5   :  { %v4152_v9 = vpop.eup %4151 }
 0x4d6   :  { %v662_v12 = vadd.f32 1.0, %v4152_v9  ;;  %v4154_v31 = vpop.eup %4153 }
 0x4d8   :  { %4155 = vrcp.f32 %v662_v12 }
 0x4d9   :  { %4157 = vpow2.f32 %v3725_v15 }
 0x4e5   :  { %v4156_v32 = vpop.eup %4155 }
 0x4e6   :  { %v673_v36 = vmul.f32 %v4156_v32, %v4154_v31  ;;  %v4158_v6 = vpop.eup %4157  ;;  %v672_v57 = vmul.f32 %v4156_v32, %v572_v22 }
 0x4e7   :  { %v669_v42 = vadd.f32 1.0, %v4158_v6 }
 0x4e8   :  { %675 = vrot.lane.b32.xlu1 %v673_v36, %s4378_s27 }
 0x4e9   :  { %4159 = vrcp.f32 %v669_v42 }
 0x4f6   :  { %v4160_v37 = vpop.eup %4159 }
 0x55a   :  { %v676_v28 = vpop.permute.xlu1 %675 }
 0x55b   :  { %v678_v11 = vadd.f32 %v676_v28, %v672_v57 }
 0x55d   :  { %4161 = vtanh.f32 %v678_v11 }
 0x56a   :  { %v4162_v21 = vpop.eup %4161 }
 0x56b   :  { %v680_v14 = vmul.f32 %v4162_v21, %v4160_v37 }
 0x56d   :  { %682 = vrot.lane.b32.xlu0 %v680_v14, %s4378_s27 }
 0x5df   :  { %v683_v9 = vpop.permute.xlu0 %682 }
 0x5e0   :  { %685 = vst.msk [vmem:[#allocation2 + $0x8] sm:$0xff] %vm325_vm8, %v683_v9  ;;  %3726 = vmatmul.mubr.msk.f32.vlgmr.msra.gmra.mxu1 %vm476_vm13, %v683_v9 }
 0x5e1   :  { %686 = vst.msk [vmem:[#allocation2 + $0x30] sm:$0xff] %vm580_vm12, %v683_v9  ;;  %918 = vmatpush1.msra.mxu1 %v4527_v46  ;;  %965 = vmatprep.mubr.f32.mxu1 %v4377_v19 }
 0x5e2   :  { %919 = vmatprep.subr.mxu1 %v4532_v48 }
 0x5e3   :  { %920 = vmatpush1.msra.mxu1 %v4538_v49 }
 0x5e4   :  { %921 = vmatprep.subr.mxu1 %v4545_v51 }
 0x5e5   :  { %922 = vmatpush1.msra.mxu1 %v4551_v52 }
 0x5e6   :  { %923 = vmatprep.subr.mxu1 %v4557_v54 }
 0x5e7   :  { %924 = vmatpush1.msra.mxu1 %v4564_v55 }
 0x5e8   :  { %925 = vmatprep.subr.mxu1 %v4573_v58 }
 0x5e9   :  { %926 = vmatpush1.msra.mxu1 %v4580_v59 }
 0x5ea   :  { %927 = vmatprep.subr.mxu1 %v4588_v60 }
 0x5eb   :  { %928 = vmatpush1.msra.mxu1 %v4595_v62 }
 0x5ec   :  { %929 = vmatprep.subr.mxu1 %v4603_v63 }
 0x5ed   :  { %930 = vmatpush1.msra.mxu1 %v4610_v0 }
 0x5ee   :  { %931 = vmatprep.subr.mxu1 %v4616_v1 }
 0x5ef   :  { %932 = vmatpush1.msra.mxu1 %v4623_v4 }
 0x5f0   :  { %1127 = vmatprep.subr.mxu1 %v4520_v44 }
 0x6a0   :  { %v757_v22 = vpop.f32.mrf.mxu1 }
 0x6a1   :  { %v762_v23 = vadd.f32 %v757_v22, %v687_v40 }
 0x6a2   :  { %v759_v31 = vpop.f32.mrf.mxu1 }
 0x6a3   :  { %v3727_v12 = vmul.f32 -1.442695, %v762_v23  ;;  %v763_v32 = vadd.f32 %v759_v31, %v688_v50 }
 0x6a5   :  { %4163 = vpow2.f32 %v3727_v12  ;;  %v3728_v28 = vmul.f32 -1.442695, %v763_v32 }
 0x6a6   :  { %4165 = vtanh.f32 %v763_v32 }
 0x6b2   :  { %v4164_v36 = vpop.eup %4163 }
 0x6b3   :  { %v767_v15 = vadd.f32 1.0, %v4164_v36  ;;  %v4166_v6 = vpop.eup %4165 }
 0x6b5   :  { %4167 = vrcp.f32 %v767_v15 }
 0x6b6   :  { %4169 = vpow2.f32 %v3728_v28 }
 0x6c2   :  { %v4168_v42 = vpop.eup %4167 }
 0x6c3   :  { %v778_v57 = vmul.f32 %v4168_v42, %v4166_v6  ;;  %v4170_v40 = vpop.eup %4169  ;;  %v777_v21 = vmul.f32 %v4168_v42, %v678_v11 }
 0x6c4   :  { %v774_v37 = vadd.f32 1.0, %v4170_v40 }
 0x6c5   :  { %780 = vrot.lane.b32.xlu1 %v778_v57, %s4378_s27 }
 0x6c6   :  { %4171 = vrcp.f32 %v774_v37 }
 0x6d3   :  { %v4172_v22 = vpop.eup %4171 }
 0x737   :  { %v781_v14 = vpop.permute.xlu1 %780 }
 0x738   :  { %v783_v9 = vadd.f32 %v781_v14, %v777_v21 }
 0x73a   :  { %4173 = vtanh.f32 %v783_v9 }
 0x747   :  { %v4174_v50 = vpop.eup %4173 }
 0x748   :  { %v785_v23 = vmul.f32 %v4174_v50, %v4172_v22 }
 0x74a   :  { %787 = vrot.lane.b32.xlu0 %v785_v23, %s4378_s27 }
 0x7bc   :  { %v788_v12 = vpop.permute.xlu0 %787 }
 0x7bd   :  { %790 = vst.msk [vmem:[#allocation2 + $0x10] sm:$0xff] %vm325_vm8, %v788_v12  ;;  %3729 = vmatmul.mubr.msk.f32.vlgmr.msra.gmra.mxu0 %vm476_vm13, %v788_v12 }
 0x7be   :  { %791 = vst.msk [vmem:[#allocation2 + $0x28] sm:$0xff] %vm580_vm12, %v788_v12  ;;  %1023 = vmatpush1.msra.mxu0 %v4527_v46  ;;  %1070 = vmatprep.mubr.f32.mxu0 %v4377_v19 }
 0x7bf   :  { %1024 = vmatprep.subr.mxu0 %v4532_v48 }
 0x7c0   :  { %1025 = vmatpush1.msra.mxu0 %v4538_v49 }
 0x7c1   :  { %1026 = vmatprep.subr.mxu0 %v4545_v51 }
 0x7c2   :  { %1027 = vmatpush1.msra.mxu0 %v4551_v52 }
 0x7c3   :  { %1028 = vmatprep.subr.mxu0 %v4557_v54 }
 0x7c4   :  { %1029 = vmatpush1.msra.mxu0 %v4564_v55 }
 0x7c5   :  { %1030 = vmatprep.subr.mxu0 %v4573_v58 }
 0x7c6   :  { %1031 = vmatpush1.msra.mxu0 %v4580_v59 }
 0x7c7   :  { %1032 = vmatprep.subr.mxu0 %v4588_v60 }
 0x7c8   :  { %1033 = vmatpush1.msra.mxu0 %v4595_v62 }
 0x7c9   :  { %1034 = vmatprep.subr.mxu0 %v4603_v63 }
 0x7ca   :  { %1035 = vmatpush1.msra.mxu0 %v4610_v0 }
 0x7cb   :  { %1036 = vmatprep.subr.mxu0 %v4616_v1 }
 0x7cc   :  { %1037 = vmatpush1.msra.mxu0 %v4623_v4 }
 0x7cd   :  { %1232 = vmatprep.subr.mxu0 %v4520_v44 }
 0x87d   :  { %v862_v11 = vpop.f32.mrf.mxu0 }
 0x87e   :  { %v867_v31 = vadd.f32 %v862_v11, %v792_v41 }
 0x87f   :  { %v864_v36 = vpop.f32.mrf.mxu0 }
 0x880   :  { %v3730_v32 = vmul.f32 -1.442695, %v867_v31  ;;  %v868_v15 = vadd.f32 %v864_v36, %v793_v53 }
 0x882   :  { %4175 = vpow2.f32 %v3730_v32  ;;  %v3731_v40 = vmul.f32 -1.442695, %v868_v15 }
 0x883   :  { %4177 = vtanh.f32 %v868_v15 }
 0x88f   :  { %v4176_v6 = vpop.eup %4175 }
 0x890   :  { %v872_v42 = vadd.f32 1.0, %v4176_v6  ;;  %v4178_v44 = vpop.eup %4177 }
 0x892   :  { %4179 = vrcp.f32 %v872_v42 }
 0x893   :  { %4181 = vpow2.f32 %v3731_v40 }
 0x89f   :  { %v4180_v57 = vpop.eup %4179 }
 0x8a0   :  { %v883_v28 = vmul.f32 %v4180_v57, %v4178_v44  ;;  %v4182_v41 = vpop.eup %4181  ;;  %v882_v21 = vmul.f32 %v4180_v57, %v783_v9 }
 0x8a1   :  { %v879_v37 = vadd.f32 1.0, %v4182_v41 }
 0x8a2   :  { %885 = vrot.lane.b32.xlu1 %v883_v28, %s4378_s27 }
 0x8a3   :  { %4183 = vrcp.f32 %v879_v37 }
 0x8b0   :  { %v4184_v50 = vpop.eup %4183 }
 0x914   :  { %v886_v14 = vpop.permute.xlu1 %885 }
 0x915   :  { %v888_v22 = vadd.f32 %v886_v14, %v882_v21 }
 0x917   :  { %4185 = vtanh.f32 %v888_v22 }
 0x924   :  { %v4186_v53 = vpop.eup %4185 }
 0x925   :  { %v890_v23 = vmul.f32 %v4186_v53, %v4184_v50  ;;  %v5863_v50 = vsel %vm4705_vm11, %v4747_v3, %v4685_v20 }
 0x927   :  { %892 = vrot.lane.b32.xlu0 %v890_v23, %s4378_s27 }
 0x999   :  { %v893_v12 = vpop.permute.xlu0 %892 }
 0x99a   :  { %895 = vst.msk [vmem:[#allocation2 + $0x18] sm:$0xff] %vm325_vm8, %v893_v12  ;;  %3732 = vmatmul.mubr.msk.f32.vlgmr.msra.gmra.mxu1 %vm476_vm13, %v893_v12 }
 0x99b   :  { %896 = vst.msk [vmem:[#allocation2 + $0x20] sm:$0xff] %vm580_vm12, %v893_v12  ;;  %1128 = vmatpush1.msra.mxu1 %v4527_v46  ;;  %1175 = vmatprep.mubr.f32.mxu1 %v4377_v19 }
 0x99c   :  { %1129 = vmatprep.subr.mxu1 %v4532_v48 }
 0x99d   :  { %1130 = vmatpush1.msra.mxu1 %v4538_v49 }
 0x99e   :  { %1131 = vmatprep.subr.mxu1 %v4545_v51 }
 0x99f   :  { %1132 = vmatpush1.msra.mxu1 %v4551_v52 }
 0x9a0   :  { %1133 = vmatprep.subr.mxu1 %v4557_v54 }
 0x9a1   :  { %1134 = vmatpush1.msra.mxu1 %v4564_v55 }
 0x9a2   :  { %1135 = vmatprep.subr.mxu1 %v4573_v58 }
 0x9a3   :  { %1136 = vmatpush1.msra.mxu1 %v4580_v59 }
 0x9a4   :  { %1137 = vmatprep.subr.mxu1 %v4588_v60 }
 0x9a5   :  { %1138 = vmatpush1.msra.mxu1 %v4595_v62 }
 0x9a6   :  { %1139 = vmatprep.subr.mxu1 %v4603_v63 }
 0x9a7   :  { %1140 = vmatpush1.msra.mxu1 %v4610_v0 }
 0x9a8   :  { %1141 = vmatprep.subr.mxu1 %v4616_v1 }
 0x9a9   :  { %1142 = vmatpush1.msra.mxu1 %v4623_v4 }
 0xa5a   :  { %v967_v9 = vpop.f32.mrf.mxu1 }
 0xa5b   :  { %v972_v11 = vadd.f32 %v967_v9, %v897_v43 }
 0xa5c   :  { %v969_v32 = vpop.f32.mrf.mxu1 }
 0xa5d   :  { %v3733_v31 = vmul.f32 -1.442695, %v972_v11  ;;  %v973_v36 = vadd.f32 %v969_v32, %v898_v56 }
 0xa5f   :  { %4187 = vpow2.f32 %v3733_v31  ;;  %v3734_v25 = vmul.f32 -1.442695, %v973_v36 }
 0xa60   :  { %4189 = vtanh.f32 %v973_v36 }
 0xa6c   :  { %v4188_v15 = vpop.eup %4187 }
 0xa6d   :  { %v977_v6 = vadd.f32 1.0, %v4188_v15  ;;  %v4190_v42 = vpop.eup %4189 }
 0xa6f   :  { %4191 = vrcp.f32 %v977_v6 }
 0xa70   :  { %4193 = vpow2.f32 %v3734_v25 }
 0xa7c   :  { %v4192_v44 = vpop.eup %4191 }
 0xa7d   :  { %v988_v57 = vmul.f32 %v4192_v44, %v4190_v42  ;;  %v4194_v33 = vpop.eup %4193  ;;  %v987_v28 = vmul.f32 %v4192_v44, %v888_v22 }
 0xa7e   :  { %v984_v43 = vadd.f32 1.0, %v4194_v33 }
 0xa7f   :  { %990 = vrot.lane.b32.xlu1 %v988_v57, %s4378_s27  ;;  %v5864_v57 = vsel %vm4697_vm10, %v4759_v18, %v4757_v16  ;;  %v1340_v16 = vld [vmem:[%s5853_s1 + $0x138] sm:$0xff]  ;;  %v1339_v18 = vld [vmem:[%s5853_s1 + $0x130] sm:$0xff] }
 0xa80   :  { %4195 = vrcp.f32 %v984_v43  ;;  %1410 = vmatprep.subr.mxu1 %v1340_v16 }
 0xa8d   :  { %v4196_v2 = vpop.eup %4195 }
 0xaf1   :  { %v991_v40 = vpop.permute.xlu1 %990 }
 0xaf2   :  { %v993_v41 = vadd.f32 %v991_v40, %v987_v28  ;;  %v5865_v28 = vsel %vm4705_vm11, %v4775_v27, %v4769_v26  ;;  %v1338_v26 = vld [vmem:[%s5853_s1 + $0x128] sm:$0xff]  ;;  %v1337_v27 = vld [vmem:[%s5853_s1 + $0x120] sm:$0xff] }
 0xaf4   :  { %4197 = vtanh.f32 %v993_v41 }
 0xb01   :  { %v4198_v38 = vpop.eup %4197 }
 0xb02   :  { %v995_v56 = vmul.f32 %v4198_v38, %v4196_v2 }
 0xb04   :  { %997 = vrot.lane.b32.xlu0 %v995_v56, %s4378_s27 }
 0xb76   :  { %v998_v37 = vpop.permute.xlu0 %997 }
 0xb77   :  { %1000 = vst.msk [vmem:[#allocation2 + $0x20] sm:$0xff] %vm325_vm8, %v998_v37  ;;  %3735 = vmatmul.mubr.msk.f32.vlgmr.msra.gmra.mxu0 %vm476_vm13, %v998_v37 }
 0xb78   :  { %1001 = vst.msk [vmem:[#allocation2 + $0x18] sm:$0xff] %vm580_vm12, %v998_v37  ;;  %1233 = vmatpush1.msra.mxu0 %v4527_v46  ;;  %1280 = vmatprep.mubr.f32.mxu0 %v4377_v19 }
 0xb79   :  { %1234 = vmatprep.subr.mxu0 %v4532_v48 }
 0xb7a   :  { %1235 = vmatpush1.msra.mxu0 %v4538_v49 }
 0xb7b   :  { %1236 = vmatprep.subr.mxu0 %v4545_v51 }
 0xb7c   :  { %1237 = vmatpush1.msra.mxu0 %v4551_v52 }
 0xb7d   :  { %1238 = vmatprep.subr.mxu0 %v4557_v54 }
 0xb7e   :  { %1239 = vmatpush1.msra.mxu0 %v4564_v55 }
 0xb7f   :  { %1240 = vmatprep.subr.mxu0 %v4573_v58 }
 0xb80   :  { %1241 = vmatpush1.msra.mxu0 %v4580_v59 }
 0xb81   :  { %1242 = vmatprep.subr.mxu0 %v4588_v60 }
 0xb82   :  { %1243 = vmatpush1.msra.mxu0 %v4595_v62 }
 0xb83   :  { %1244 = vmatprep.subr.mxu0 %v4603_v63 }
 0xb84   :  { %1245 = vmatpush1.msra.mxu0 %v4610_v0 }
 0xb85   :  { %1246 = vmatprep.subr.mxu0 %v4616_v1 }
 0xb86   :  { %1247 = vmatpush1.msra.mxu0 %v4623_v4 }
 0xc37   :  { %v1072_v46 = vpop.f32.mrf.mxu0 }
 0xc38   :  { %v1077_v48 = vadd.f32 %v1072_v46, %v1002_v45  ;;  %v1336_v46 = vld [vmem:[%s5853_s1 + $0x118] sm:$0xff] }
 0xc39   :  { %v1074_v51 = vpop.f32.mrf.mxu0 }
 0xc3a   :  { %v3736_v49 = vmul.f32 -1.442695, %v1077_v48  ;;  %v1078_v52 = vadd.f32 %v1074_v51, %v1003_v61  ;;  %v1335_v48 = vld [vmem:[%s5853_s1 + $0x110] sm:$0xff]  ;;  %v1333_v51 = vld [vmem:[%s5853_s1 + $0x100] sm:$0xff] }
 0xc3c   :  { %4199 = vpow2.f32 %v3736_v49  ;;  %v3737_v62 = vmul.f32 -1.442695, %v1078_v52  ;;  %v1334_v49 = vld [vmem:[%s5853_s1 + $0x108] sm:$0xff] }
 0xc3d   :  { %4201 = vtanh.f32 %v1078_v52 }
 0xc49   :  { %v4200_v54 = vpop.eup %4199 }
 0xc4a   :  { %v1082_v55 = vadd.f32 1.0, %v4200_v54  ;;  %v4202_v58 = vpop.eup %4201 }
 0xc4c   :  { %4203 = vrcp.f32 %v1082_v55 }
 0xc4d   :  { %4205 = vpow2.f32 %v3737_v62  ;;  %v1332_v62 = vld [vmem:[%s5853_s1 + $0xf8] sm:$0xff] }
 0xc59   :  { %v4204_v59 = vpop.eup %4203 }
 0xc5a   :  { %v1093_v60 = vmul.f32 %v4204_v59, %v4202_v58  ;;  %v4206_v63 = vpop.eup %4205  ;;  %v1092_v1 = vmul.f32 %v4204_v59, %v993_v41 }
 0xc5b   :  { %v1089_v0 = vadd.f32 1.0, %v4206_v63  ;;  %v1331_v63 = vld [vmem:[%s5853_s1 + $0xf0] sm:$0xff] }
 0xc5c   :  { %1095 = vrot.lane.b32.xlu1 %v1093_v60, %s4378_s27 }
 0xc5d   :  { %4207 = vrcp.f32 %v1089_v0  ;;  %v1330_v0 = vld [vmem:[%s5853_s1 + $0xe8] sm:$0xff] }
 0xc6a   :  { %v4208_v29 = vpop.eup %4207 }
 0xcce   :  { %v1096_v4 = vpop.permute.xlu1 %1095 }
 0xccf   :  { %v1098_v24 = vadd.f32 %v1096_v4, %v1092_v1  ;;  %v1329_v1 = vld [vmem:[%s5853_s1 + $0xe0] sm:$0xff]  ;;  %v1328_v4 = vld [vmem:[%s5853_s1 + $0xd8] sm:$0xff] }
 0xcd1   :  { %4209 = vtanh.f32 %v1098_v24 }
 0xcde   :  { %v4210_v34 = vpop.eup %4209 }
 0xcdf   :  { %v1100_v39 = vmul.f32 %v4210_v34, %v4208_v29  ;;  %v1326_v29 = vld [vmem:[%s5853_s1 + $0xc8] sm:$0xff]  ;;  %v1325_v34 = vld [vmem:[%s5853_s1 + $0xc0] sm:$0xff] }
 0xce1   :  { %1102 = vrot.lane.b32.xlu0 %v1100_v39, %s4378_s27 }
 0xd53   :  { %v1103_v45 = vpop.permute.xlu0 %1102 }
 0xd54   :  { %1105 = vst.msk [vmem:[#allocation2 + $0x28] sm:$0xff] %vm325_vm8, %v1103_v45  ;;  %3738 = vmatmul.mubr.msk.f32.vlgmr.msra.gmra.mxu1 %vm476_vm13, %v1103_v45 }
 0xd55   :  { %1106 = vst.msk [vmem:[#allocation2 + $0x10] sm:$0xff] %vm580_vm12, %v1103_v45  ;;  %1458 = vmatprep.mubr.f32.mxu1 %v4377_v19  ;;  %1411 = vmatpush1.msra.mxu1 %v1339_v18 }
 0xd56   :  { %1412 = vmatprep.subr.mxu1 %v1338_v26 }
 0xd57   :  { %1413 = vmatpush1.msra.mxu1 %v1337_v27 }
 0xd58   :  { %1414 = vmatprep.subr.mxu1 %v1336_v46 }
 0xd59   :  { %1415 = vmatpush1.msra.mxu1 %v1335_v48 }
 0xd5a   :  { %1416 = vmatprep.subr.mxu1 %v1334_v49 }
 0xd5b   :  { %1417 = vmatpush1.msra.mxu1 %v1333_v51 }
 0xd5c   :  { %1418 = vmatprep.subr.mxu1 %v1332_v62 }
 0xd5d   :  { %1419 = vmatpush1.msra.mxu1 %v1331_v63 }
 0xd5e   :  { %1420 = vmatprep.subr.mxu1 %v1330_v0 }
 0xd5f   :  { %1421 = vmatpush1.msra.mxu1 %v1329_v1 }
 0xd60   :  { %1422 = vmatprep.subr.mxu1 %v1328_v4 }
 0xe14   :  { %v1177_v61 = vpop.f32.mrf.mxu1 }
 0xe15   :  { %v1182_v21 = vadd.f32 %v1177_v61, %v1107_v8 }
 0xe16   :  { %v1179_v22 = vpop.f32.mrf.mxu1 }
 0xe17   :  { %v3739_v14 = vmul.f32 -1.442695, %v1182_v21  ;;  %v1183_v53 = vadd.f32 %v1179_v22, %v5863_v50  ;;  %v5032_v21 = vld [vmem:[%s5853_s1 + $0x1b8] sm:$0xff]  ;;  %v5043_v22 = vld [vmem:[%s5853_s1 + $0x1a8] sm:$0xff]  ;;  %v5051_v50 = vld [vmem:[%s5853_s1 + $0x1a0] sm:$0xff] }
 0xe18   :  { %1525 = vmatprep.subr.mxu0 %v5032_v21 }
 0xe19   :  { %4211 = vpow2.f32 %v3739_v14  ;;  %v3740_v17 = vmul.f32 -1.442695, %v1183_v53  ;;  %v5037_v14 = vld [vmem:[%s5853_s1 + $0x1b0] sm:$0xff] }
 0xe1a   :  { %4213 = vtanh.f32 %v1183_v53  ;;  %v5056_v53 = vld [vmem:[%s5853_s1 + $0x198] sm:$0xff] }
 0xe26   :  { %v4212_v23 = vpop.eup %4211 }
 0xe27   :  { %v1187_v12 = vadd.f32 1.0, %v4212_v23  ;;  %v4214_v9 = vpop.eup %4213  ;;  %v5061_v23 = vld [vmem:[%s5853_s1 + $0x190] sm:$0xff] }
 0xe29   :  { %4215 = vrcp.f32 %v1187_v12  ;;  %v5067_v12 = vld [vmem:[%s5853_s1 + $0x188] sm:$0xff] }
 0xe2a   :  { %4217 = vpow2.f32 %v3740_v17  ;;  %v5091_v17 = vld [vmem:[%s5853_s1 + $0x168] sm:$0xff] }
 0xe36   :  { %v4216_v11 = vpop.eup %4215 }
 0xe37   :  { %v1198_v31 = vmul.f32 %v4216_v11, %v4214_v9  ;;  %v4218_v47 = vpop.eup %4217  ;;  %v1197_v32 = vmul.f32 %v4216_v11, %v1098_v24  ;;  %v1327_v24 = vld [vmem:[%s5853_s1 + $0xd0] sm:$0xff]  ;;  %v5075_v9 = vld [vmem:[%s5853_s1 + $0x180] sm:$0xff]  ;;  %v5080_v11 = vld [vmem:[%s5853_s1 + $0x178] sm:$0xff] }
 0xe38   :  { %v1194_v8 = vadd.f32 1.0, %v4218_v47  ;;  %1423 = vmatpush1.msra.mxu1 %v1327_v24  ;;  %v5099_v47 = vld [vmem:[%s5853_s1 + $0x160] sm:$0xff] }
 0xe39   :  { %1200 = vrot.lane.b32.xlu1 %v1198_v31, %s4378_s27  ;;  %1424 = vmatprep.subr.mxu1 %v1326_v29  ;;  %v5085_v31 = vld [vmem:[%s5853_s1 + $0x170] sm:$0xff] }
 0xe3a   :  { %4219 = vrcp.f32 %v1194_v8  ;;  %1425 = vmatpush1.msra.mxu1 %v1325_v34  ;;  %v5104_v8 = vld [vmem:[%s5853_s1 + $0x158] sm:$0xff] }
 0xe3b   :  { %1735 = vmatprep.subr.mxu1 %v5032_v21 }
 0xe47   :  { %v4220_v20 = vpop.eup %4219 }
 0xeab   :  { %v1201_v36 = vpop.permute.xlu1 %1200 }
 0xeac   :  { %v1203_v15 = vadd.f32 %v1201_v36, %v1197_v32  ;;  %v5109_v32 = vld [vmem:[%s5853_s1 + $0x150] sm:$0xff]  ;;  %v5115_v36 = vld [vmem:[%s5853_s1 + $0x148] sm:$0xff] }
 0xeae   :  { %4221 = vtanh.f32 %v1203_v15 }
 0xebb   :  { %v4222_v3 = vpop.eup %4221 }
 0xebc   :  { %v1205_v6 = vmul.f32 %v4222_v3, %v4220_v20 }
 0xebe   :  { %1207 = vrot.lane.b32.xlu0 %v1205_v6, %s4378_s27 }
 0xf30   :  { %v1208_v42 = vpop.permute.xlu0 %1207 }
 0xf31   :  { %1210 = vst.msk [vmem:[#allocation2 + $0x30] sm:$0xff] %vm325_vm8, %v1208_v42  ;;  %3741 = vmatmul.mubr.msk.f32.vlgmr.msra.gmra.mxu0 %vm476_vm13, %v1208_v42 }
 0xf32   :  { %1211 = vst.msk [vmem:[#allocation2 + $0x8] sm:$0xff] %vm580_vm12, %v1208_v42  ;;  %1573 = vmatprep.mubr.f32.mxu0 %v4377_v19  ;;  %1526 = vmatpush1.msra.mxu0 %v5037_v14  ;;  %v1319_v42 = vld [vmem:[#allocation2 + $0x10] sm:$0xff] }
 0xf33   :  { %1527 = vmatprep.subr.mxu0 %v5043_v22 }
 0xf34   :  { %1528 = vmatpush1.msra.mxu0 %v5051_v50 }
 0xf35   :  { %1529 = vmatprep.subr.mxu0 %v5056_v53 }
 0xf36   :  { %1530 = vmatpush1.msra.mxu0 %v5061_v23 }
 0xf37   :  { %1531 = vmatprep.subr.mxu0 %v5067_v12 }
 0xf38   :  { %1532 = vmatpush1.msra.mxu0 %v5075_v9 }
 0xf39   :  { %1533 = vmatprep.subr.mxu0 %v5080_v11  ;;  %v1318_v6 = vld [vmem:[#allocation2 + $0x8] sm:$0xff] }
 0xf3a   :  { %1534 = vmatpush1.msra.mxu0 %v5085_v31 }
 0xf3b   :  { %1535 = vmatprep.subr.mxu0 %v5091_v17 }
 0xf3c   :  { %1536 = vmatpush1.msra.mxu0 %v5099_v47 }
 0xf3d   :  { %1537 = vmatprep.subr.mxu0 %v5104_v8 }
 0xf3e   :  { %1538 = vmatpush1.msra.mxu0 %v5109_v32 }
 0xf3f   :  { %1539 = vmatprep.subr.mxu0 %v5115_v36 }
 0xff1   :  { %v1282_v44 = vpop.f32.mrf.mxu0 }
 0xff2   :  { %v1287_v25 = vadd.f32 %v1282_v44, %v5864_v57  ;;  %v1320_v44 = vld [vmem:[#allocation2 + $0x18] sm:$0xff]  ;;  %v1321_v57 = vld [vmem:[#allocation2 + $0x20] sm:$0xff] }
 0xff3   :  { %v1284_v43 = vpop.f32.mrf.mxu0 }
 0xff4   :  { %v3742_v33 = vmul.f32 -1.442695, %v1287_v25  ;;  %v1288_v40 = vadd.f32 %v1284_v43, %v5865_v28  ;;  %v1322_v25 = vld [vmem:[#allocation2 + $0x28] sm:$0xff] }
 0xff5   :  { %v3744_v28 = vld [vmem:[%s5853_s1 + $0x1c1] ss:$8 sm:$0x3] }
 0xff6   :  { %4223 = vpow2.f32 %v3742_v33  ;;  %v3743_v52 = vmul.f32 -1.442695, %v1288_v40  ;;  %v1323_v33 = vld [vmem:[#allocation2 + $0x30] sm:$0xff] }
 0xff7   :  { %4225 = vtanh.f32 %v1288_v40 }
0x1003   :  { %v4224_v41 = vpop.eup %4223 }
0x1004   :  { %v1292_v2 = vadd.f32 1.0, %v4224_v41  ;;  %v4226_v38 = vpop.eup %4225 }
0x1006   :  { %4227 = vrcp.f32 %v1292_v2  ;;  %v1363_v2 = vrot.slane %v3744_v28, %v4672_v7 }
0x1007   :  { %4229 = vpow2.f32 %v3743_v52 }
0x1013   :  { %v4228_v56 = vpop.eup %4227 }
0x1014   :  { %v1303_v37 = vmul.f32 %v4228_v56, %v4226_v38  ;;  %v4230_v54 = vpop.eup %4229  ;;  %v1302_v58 = vmul.f32 %v4228_v56, %v1203_v15  ;;  %v5123_v15 = vld [vmem:[%s5853_s1 + $0x140] sm:$0xff]  ;;  %v1367_v56 = vrot.slane %v3744_v28, %v4678_v10 }
0x1015   :  { %v1299_v55 = vadd.f32 1.0, %v4230_v54  ;;  %1540 = vmatpush1.msra.mxu0 %v5123_v15 }
0x1016   :  { %1305 = vrot.lane.b32.xlu1 %v1303_v37, %s4378_s27  ;;  %1574 = vmatmul.mubr.f32.vlgmr.msra.gmra.mxu0 %v4377_v19 }
0x1017   :  { %4231 = vrcp.f32 %v1299_v55  ;;  %1630 = vmatprep.subr.mxu0 %v5032_v21  ;;  %1678 = vmatprep.mubr.f32.mxu0 %v4377_v19 }
0x1018   :  { %1631 = vmatpush1.msra.mxu0 %v5037_v14 }
0x1019   :  { %1632 = vmatprep.subr.mxu0 %v5043_v22 }
0x101a   :  { %1633 = vmatpush1.msra.mxu0 %v5051_v50 }
0x101b   :  { %1634 = vmatprep.subr.mxu0 %v5056_v53 }
0x101c   :  { %1635 = vmatpush1.msra.mxu0 %v5061_v23 }
0x101d   :  { %1636 = vmatprep.subr.mxu0 %v5067_v12 }
0x101e   :  { %1637 = vmatpush1.msra.mxu0 %v5075_v9 }
0x101f   :  { %1638 = vmatprep.subr.mxu0 %v5080_v11 }
0x1020   :  { %1639 = vmatpush1.msra.mxu0 %v5085_v31 }
0x1021   :  { %1640 = vmatprep.subr.mxu0 %v5091_v17 }
0x1022   :  { %1641 = vmatpush1.msra.mxu0 %v5099_v47 }
0x1023   :  { %1642 = vmatprep.subr.mxu0 %v5104_v8 }
0x1024   :  { %v4232_v39 = vpop.eup %4231  ;;  %1643 = vmatpush1.msra.mxu0 %v5109_v32 }
0x1025   :  { %1644 = vmatprep.subr.mxu0 %v5115_v36 }
0x1026   :  { %1645 = vmatpush1.msra.mxu0 %v5123_v15 }
0x1027   :  { %1840 = vmatprep.subr.mxu0 %v5032_v21 }
0x1088   :  { %v1306_v59 = vpop.permute.xlu1 %1305 }
0x1089   :  { %v1308_v60 = vadd.f32 %v1306_v59, %v1302_v58 }
0x108b   :  { %4233 = vtanh.f32 %v1308_v60 }
0x1098   :  { %v4234_v45 = vpop.eup %4233 }
0x1099   :  { %v1310_v61 = vmul.f32 %v4234_v45, %v4232_v39 }
0x109b   :  { %1312 = vrot.lane.b32.xlu0 %v1310_v61, %s4378_s27 }
0x110d   :  { %v1313_v20 = vpop.permute.xlu0 %1312 }
0x110e   :  { %1315 = vst.msk [vmem:[#allocation2 + $0x38] sm:$0xff] %vm325_vm8, %v1313_v20 }
0x110f   :  { %1316 = vst.msk [vmem:[#allocation2] sm:$0xff] %vm580_vm12, %v1313_v20 }
0x1115   :  { %v1324_v43 = vld [vmem:[#allocation2 + $0x38] sm:$0xff] }
0x1116   :  { %v1317_v3 = vld [vmem:[#allocation2] sm:$0xff] }
0x1117   :  { %3745 = vmatmul.mubr.msk.f32.vlgmr.msra.gmra.mxu1 %vm476_vm13, %v1317_v3 }
0x1118   :  { %1464 = vmatprep.mubr.f32.mxu1 %v4377_v19  ;;  %1736 = vmatpush1.msra.mxu1 %v5037_v14 }
0x1119   :  { %1737 = vmatprep.subr.mxu1 %v5043_v22 }
0x111a   :  { %1738 = vmatpush1.msra.mxu1 %v5051_v50 }
0x111b   :  { %3746 = vmatmul.mubr.msk.f32.gmra.mxu1 %vm476_vm13, %v1318_v6  ;;  %1739 = vmatprep.subr.mxu1 %v5056_v53 }
0x111c   :  { %1470 = vmatprep.mubr.f32.mxu1 %v4377_v19  ;;  %1740 = vmatpush1.msra.mxu1 %v5061_v23 }
0x111d   :  { %1741 = vmatprep.subr.mxu1 %v5067_v12 }
0x111e   :  { %1742 = vmatpush1.msra.mxu1 %v5075_v9 }
0x111f   :  { %3747 = vmatmul.mubr.msk.f32.gmra.mxu1 %vm476_vm13, %v1319_v42  ;;  %1743 = vmatprep.subr.mxu1 %v5080_v11 }
0x1120   :  { %1476 = vmatprep.mubr.f32.mxu1 %v4377_v19  ;;  %1744 = vmatpush1.msra.mxu1 %v5085_v31 }
0x1121   :  { %1745 = vmatprep.subr.mxu1 %v5091_v17 }
0x1122   :  { %1746 = vmatpush1.msra.mxu1 %v5099_v47 }
0x1123   :  { %3748 = vmatmul.mubr.msk.f32.gmra.mxu1 %vm476_vm13, %v1320_v44  ;;  %1747 = vmatprep.subr.mxu1 %v5104_v8 }
0x1124   :  { %1482 = vmatprep.mubr.f32.mxu1 %v4377_v19  ;;  %1748 = vmatpush1.msra.mxu1 %v5109_v32 }
0x1125   :  { %1749 = vmatprep.subr.mxu1 %v5115_v36 }
0x1126   :  { %1750 = vmatpush1.msra.mxu1 %v5123_v15 }
0x1127   :  { %3749 = vmatmul.mubr.msk.f32.gmra.mxu1 %vm476_vm13, %v1321_v57  ;;  %1945 = vmatprep.subr.mxu1 %v5032_v21 }
0x1128   :  { %1488 = vmatprep.mubr.f32.mxu1 %v4377_v19 }
0x112b   :  { %3750 = vmatmul.mubr.msk.f32.gmra.mxu1 %vm476_vm13, %v1322_v25 }
0x112c   :  { %1494 = vmatprep.mubr.f32.mxu1 %v4377_v19 }
0x112f   :  { %3751 = vmatmul.mubr.msk.f32.gmra.mxu1 %vm476_vm13, %v1323_v33 }
0x1130   :  { %1500 = vmatprep.mubr.f32.mxu1 %v4377_v19 }
0x1133   :  { %3752 = vmatmul.mubr.msk.f32.gmra.mxu1 %vm476_vm13, %v1324_v43 }
0x1134   :  { %1783 = vmatprep.mubr.f32.mxu1 %v4377_v19 }
0x11d7   :  { %v1460_v40 = vpop.f32.mrf.mxu1 }
0x11d8   :  { %v5248_v43 = vadd.f32 %v1460_v40, %v1363_v2 }
0x11d9   :  { %v1462_v41 = vpop.f32.mrf.mxu1 }
0x11db   :  { %v1466_v38 = vpop.f32.mrf.mxu1 }
0x11dc   :  { %v5184_v37 = vadd.f32 %v1466_v38, %v1363_v2 }
0x11dd   :  { %v1468_v16 = vpop.f32.mrf.mxu1 }
0x11de   :  { %v5186_v18 = vadd.f32 %v1468_v16, %v1367_v56 }
0x11df   :  { %v1472_v26 = vpop.f32.mrf.mxu1 }
0x11e0   :  { %v5188_v27 = vadd.f32 %v1472_v26, %v1363_v2 }
0x11e1   :  { %v1474_v46 = vpop.f32.mrf.mxu1 }
0x11e2   :  { %v5190_v48 = vadd.f32 %v1474_v46, %v1367_v56  ;;  %v5260_v46 = vadd.f32 %v1462_v41, %v1367_v56 }
0x11e3   :  { %v1478_v49 = vpop.f32.mrf.mxu1 }
0x11e4   :  { %v5192_v51 = vadd.f32 %v1478_v49, %v1363_v2 }
0x11e5   :  { %v1480_v52 = vpop.f32.mrf.mxu1 }
0x11e6   :  { %v5194_v54 = vadd.f32 %v1480_v52, %v1367_v56 }
0x11e7   :  { %v1484_v55 = vpop.f32.mrf.mxu1 }
0x11e8   :  { %v5196_v58 = vadd.f32 %v1484_v55, %v1363_v2 }
0x11e9   :  { %v1486_v59 = vpop.f32.mrf.mxu1 }
0x11ea   :  { %v5198_v60 = vadd.f32 %v1486_v59, %v1367_v56  ;;  %v1820_v62 = vsel %vm4697_vm10, %v5192_v51, %v5196_v58  ;;  %v1925_v63 = vsel %vm4697_vm10, %v5196_v58, %v5192_v51 }
0x11eb   :  { %v1490_v0 = vpop.f32.mrf.mxu1 }
0x11ec   :  { %v5208_v1 = vadd.f32 %v1490_v0, %v1363_v2  ;;  %v1821_v4 = vsel %vm4705_vm11, %v5194_v54, %v5198_v60  ;;  %v1926_v24 = vsel %vm4705_vm11, %v5198_v60, %v5194_v54 }
0x11ed   :  { %v1492_v29 = vpop.f32.mrf.mxu1 }
0x11ee   :  { %v5218_v34 = vadd.f32 %v1492_v29, %v1367_v56  ;;  %v1715_v39 = vsel %vm4697_vm10, %v5188_v27, %v5208_v1  ;;  %v2030_v45 = vsel %vm4697_vm10, %v5208_v1, %v5188_v27 }
0x11ef   :  { %v1496_v61 = vpop.f32.mrf.mxu1 }
0x11f0   :  { %v5228_v20 = vadd.f32 %v1496_v61, %v1363_v2  ;;  %v1716_v3 = vsel %vm4705_vm11, %v5190_v48, %v5218_v34 }
0x11f1   :  { %v1498_v42 = vpop.f32.mrf.mxu1 }
0x11f2   :  { %v5238_v44 = vadd.f32 %v1498_v42, %v1367_v56  ;;  %v1610_v57 = vsel %vm4697_vm10, %v5184_v37, %v5228_v20 }
0x11f3   :  { %v1502_v33 = vpop.f32.mrf.mxu1 }
0x11f4   :  { %v5250_v28 = vadd.f32 %v1502_v33, %v1363_v2  ;;  %v1611_v38 = vsel %vm4705_vm11, %v5186_v18, %v5238_v44  ;;  %v1575_v2 = vpop.f32.mrf.mxu0 }
0x11f5   :  { %v1504_v26 = vpop.f32.mrf.mxu1 }
0x11f6   :  { %v1507_v40 = vsel %vm4697_vm10, %v5248_v43, %v5250_v28  ;;  %v5266_v49 = vadd.f32 %v1504_v26, %v1367_v56  ;;  %v1577_v56 = vpop.f32.mrf.mxu0 }
0x11f7   :  { %v1580_v55 = vadd.f32 %v1575_v2, %v1507_v40 }
0x11f8   :  { %v1508_v0 = vsel %vm4705_vm11, %v5260_v46, %v5266_v49 }
0x11f9   :  { %v3753_v59 = vmul.f32 -1.442695, %v1580_v55  ;;  %v1581_v29 = vadd.f32 %v1577_v56, %v1508_v0 }
0x11fb   :  { %4235 = vpow2.f32 %v3753_v59  ;;  %v3754_v2 = vmul.f32 -1.442695, %v1581_v29 }
0x11fc   :  { %4237 = vtanh.f32 %v1581_v29 }
0x1208   :  { %v4236_v61 = vpop.eup %4235 }
0x1209   :  { %v1585_v42 = vadd.f32 1.0, %v4236_v61  ;;  %v4238_v33 = vpop.eup %4237 }
0x120b   :  { %4239 = vrcp.f32 %v1585_v42 }
0x120c   :  { %4241 = vpow2.f32 %v3754_v2 }
0x1218   :  { %v4240_v26 = vpop.eup %4239 }
0x1219   :  { %v1596_v40 = vmul.f32 %v4240_v26, %v4238_v33  ;;  %v4242_v55 = vpop.eup %4241  ;;  %v1595_v41 = vmul.f32 0.0, %v4240_v26 }
0x121a   :  { %v1592_v59 = vadd.f32 1.0, %v4242_v55 }
0x121b   :  { %1598 = vrot.lane.b32.xlu1 %v1596_v40, %s4378_s27 }
0x121c   :  { %4243 = vrcp.f32 %v1592_v59 }
0x1229   :  { %v4244_v25 = vpop.eup %4243 }
0x128d   :  { %v1599_v52 = vpop.permute.xlu1 %1598 }
0x128e   :  { %v1601_v16 = vadd.f32 %v1599_v52, %v1595_v41 }
0x1290   :  { %4245 = vtanh.f32 %v1601_v16 }
0x129d   :  { %v4246_v0 = vpop.eup %4245 }
0x129e   :  { %v1603_v56 = vmul.f32 %v4246_v0, %v4244_v25 }
0x12a0   :  { %1605 = vrot.lane.b32.xlu0 %v1603_v56, %s4378_s27 }
0x1312   :  { %v1606_v61 = vpop.permute.xlu0 %1605 }
0x1313   :  { %1608 = vst.msk [vmem:[#allocation3] sm:$0xff] %vm325_vm8, %v1606_v61  ;;  %3755 = vmatmul.mubr.msk.f32.vlgmr.msra.gmra.mxu0 %vm476_vm13, %v1606_v61 }
0x1314   :  { %1609 = vst.msk [vmem:[#allocation3 + $0x38] sm:$0xff] %vm580_vm12, %v1606_v61  ;;  %1841 = vmatpush1.msra.mxu0 %v5037_v14  ;;  %1888 = vmatprep.mubr.f32.mxu0 %v4377_v19 }
0x1315   :  { %1842 = vmatprep.subr.mxu0 %v5043_v22 }
0x1316   :  { %1843 = vmatpush1.msra.mxu0 %v5051_v50 }
0x1317   :  { %1844 = vmatprep.subr.mxu0 %v5056_v53 }
0x1318   :  { %1845 = vmatpush1.msra.mxu0 %v5061_v23 }
0x1319   :  { %1846 = vmatprep.subr.mxu0 %v5067_v12 }
0x131a   :  { %1847 = vmatpush1.msra.mxu0 %v5075_v9 }
0x131b   :  { %1848 = vmatprep.subr.mxu0 %v5080_v11 }
0x131c   :  { %1849 = vmatpush1.msra.mxu0 %v5085_v31 }
0x131d   :  { %1850 = vmatprep.subr.mxu0 %v5091_v17 }
0x131e   :  { %1851 = vmatpush1.msra.mxu0 %v5099_v47 }
0x131f   :  { %1852 = vmatprep.subr.mxu0 %v5104_v8 }
0x1320   :  { %1853 = vmatpush1.msra.mxu0 %v5109_v32 }
0x1321   :  { %1854 = vmatprep.subr.mxu0 %v5115_v36 }
0x1322   :  { %1855 = vmatpush1.msra.mxu0 %v5123_v15 }
0x1323   :  { %2050 = vmatprep.subr.mxu0 %v5032_v21 }
0x13d3   :  { %v1680_v25 = vpop.f32.mrf.mxu0 }
0x13d4   :  { %v1685_v52 = vadd.f32 %v1680_v25, %v1610_v57 }
0x13d5   :  { %v1682_v29 = vpop.f32.mrf.mxu0 }
0x13d6   :  { %v3756_v41 = vmul.f32 -1.442695, %v1685_v52  ;;  %v1686_v42 = vadd.f32 %v1682_v29, %v1611_v38 }
0x13d8   :  { %4247 = vpow2.f32 %v3756_v41  ;;  %v3757_v59 = vmul.f32 -1.442695, %v1686_v42 }
0x13d9   :  { %4249 = vtanh.f32 %v1686_v42 }
0x13e5   :  { %v4248_v33 = vpop.eup %4247 }
0x13e6   :  { %v1690_v26 = vadd.f32 1.0, %v4248_v33  ;;  %v4250_v40 = vpop.eup %4249 }
0x13e8   :  { %4251 = vrcp.f32 %v1690_v26 }
0x13e9   :  { %4253 = vpow2.f32 %v3757_v59 }
0x13f5   :  { %v4252_v2 = vpop.eup %4251 }
0x13f6   :  { %v1701_v55 = vmul.f32 %v4252_v2, %v4250_v40  ;;  %v4254_v0 = vpop.eup %4253  ;;  %v1700_v61 = vmul.f32 %v4252_v2, %v1601_v16 }
0x13f7   :  { %v1697_v56 = vadd.f32 1.0, %v4254_v0 }
0x13f8   :  { %1703 = vrot.lane.b32.xlu1 %v1701_v55, %s4378_s27 }
0x13f9   :  { %4255 = vrcp.f32 %v1697_v56 }
0x1406   :  { %v4256_v25 = vpop.eup %4255 }
0x146a   :  { %v1704_v6 = vpop.permute.xlu1 %1703 }
0x146b   :  { %v1706_v57 = vadd.f32 %v1704_v6, %v1700_v61 }
0x146d   :  { %4257 = vtanh.f32 %v1706_v57 }
0x147a   :  { %v4258_v38 = vpop.eup %4257 }
0x147b   :  { %v1708_v52 = vmul.f32 %v4258_v38, %v4256_v25 }
0x147d   :  { %1710 = vrot.lane.b32.xlu0 %v1708_v52, %s4378_s27 }
0x14ef   :  { %v1711_v41 = vpop.permute.xlu0 %1710 }
0x14f0   :  { %1713 = vst.msk [vmem:[#allocation3 + $0x8] sm:$0xff] %vm325_vm8, %v1711_v41  ;;  %3758 = vmatmul.mubr.msk.f32.vlgmr.msra.gmra.mxu1 %vm476_vm13, %v1711_v41 }
0x14f1   :  { %1714 = vst.msk [vmem:[#allocation3 + $0x30] sm:$0xff] %vm580_vm12, %v1711_v41  ;;  %1946 = vmatpush1.msra.mxu1 %v5037_v14  ;;  %1993 = vmatprep.mubr.f32.mxu1 %v4377_v19 }
0x14f2   :  { %1947 = vmatprep.subr.mxu1 %v5043_v22 }
0x14f3   :  { %1948 = vmatpush1.msra.mxu1 %v5051_v50 }
0x14f4   :  { %1949 = vmatprep.subr.mxu1 %v5056_v53 }
0x14f5   :  { %1950 = vmatpush1.msra.mxu1 %v5061_v23 }
0x14f6   :  { %1951 = vmatprep.subr.mxu1 %v5067_v12 }
0x14f7   :  { %1952 = vmatpush1.msra.mxu1 %v5075_v9 }
0x14f8   :  { %1953 = vmatprep.subr.mxu1 %v5080_v11 }
0x14f9   :  { %1954 = vmatpush1.msra.mxu1 %v5085_v31 }
0x14fa   :  { %1955 = vmatprep.subr.mxu1 %v5091_v17 }
0x14fb   :  { %1956 = vmatpush1.msra.mxu1 %v5099_v47 }
0x14fc   :  { %1957 = vmatprep.subr.mxu1 %v5104_v8 }
0x14fd   :  { %1958 = vmatpush1.msra.mxu1 %v5109_v32 }
0x14fe   :  { %1959 = vmatprep.subr.mxu1 %v5115_v36 }
0x14ff   :  { %1960 = vmatpush1.msra.mxu1 %v5123_v15 }
0x1500   :  { %2155 = vmatprep.subr.mxu1 %v5032_v21 }
0x15b0   :  { %v1785_v6 = vpop.f32.mrf.mxu1 }
0x15b1   :  { %v1790_v16 = vadd.f32 %v1785_v6, %v1715_v39 }
0x15b2   :  { %v1787_v42 = vpop.f32.mrf.mxu1 }
0x15b3   :  { %v3759_v29 = vmul.f32 -1.442695, %v1790_v16  ;;  %v1791_v33 = vadd.f32 %v1787_v42, %v1716_v3 }
0x15b5   :  { %4259 = vpow2.f32 %v3759_v29  ;;  %v3760_v0 = vmul.f32 -1.442695, %v1791_v33 }
0x15b6   :  { %4261 = vtanh.f32 %v1791_v33 }
0x15c2   :  { %v4260_v26 = vpop.eup %4259 }
0x15c3   :  { %v1795_v40 = vadd.f32 1.0, %v4260_v26  ;;  %v4262_v2 = vpop.eup %4261 }
0x15c5   :  { %4263 = vrcp.f32 %v1795_v40 }
0x15c6   :  { %4265 = vpow2.f32 %v3760_v0 }
0x15d2   :  { %v4264_v55 = vpop.eup %4263 }
0x15d3   :  { %v1806_v59 = vmul.f32 %v4264_v55, %v4262_v2  ;;  %v4266_v39 = vpop.eup %4265  ;;  %v1805_v61 = vmul.f32 %v4264_v55, %v1706_v57 }
0x15d4   :  { %v1802_v56 = vadd.f32 1.0, %v4266_v39 }
0x15d5   :  { %1808 = vrot.lane.b32.xlu1 %v1806_v59, %s4378_s27 }
0x15d6   :  { %4267 = vrcp.f32 %v1802_v56 }
0x15e3   :  { %v4268_v52 = vpop.eup %4267 }
0x1647   :  { %v1809_v25 = vpop.permute.xlu1 %1808 }
0x1648   :  { %v1811_v38 = vadd.f32 %v1809_v25, %v1805_v61 }
0x164a   :  { %4269 = vtanh.f32 %v1811_v38 }
0x1657   :  { %v4270_v3 = vpop.eup %4269 }
0x1658   :  { %v1813_v41 = vmul.f32 %v4270_v3, %v4268_v52 }
0x165a   :  { %1815 = vrot.lane.b32.xlu0 %v1813_v41, %s4378_s27 }
0x16cc   :  { %v1816_v6 = vpop.permute.xlu0 %1815 }
0x16cd   :  { %1818 = vst.msk [vmem:[#allocation3 + $0x10] sm:$0xff] %vm325_vm8, %v1816_v6  ;;  %3761 = vmatmul.mubr.msk.f32.vlgmr.msra.gmra.mxu0 %vm476_vm13, %v1816_v6 }
0x16ce   :  { %1819 = vst.msk [vmem:[#allocation3 + $0x28] sm:$0xff] %vm580_vm12, %v1816_v6  ;;  %2051 = vmatpush1.msra.mxu0 %v5037_v14  ;;  %2098 = vmatprep.mubr.f32.mxu0 %v4377_v19 }
0x16cf   :  { %2052 = vmatprep.subr.mxu0 %v5043_v22 }
0x16d0   :  { %2053 = vmatpush1.msra.mxu0 %v5051_v50 }
0x16d1   :  { %2054 = vmatprep.subr.mxu0 %v5056_v53 }
0x16d2   :  { %2055 = vmatpush1.msra.mxu0 %v5061_v23 }
0x16d3   :  { %2056 = vmatprep.subr.mxu0 %v5067_v12 }
0x16d4   :  { %2057 = vmatpush1.msra.mxu0 %v5075_v9 }
0x16d5   :  { %2058 = vmatprep.subr.mxu0 %v5080_v11 }
0x16d6   :  { %2059 = vmatpush1.msra.mxu0 %v5085_v31 }
0x16d7   :  { %2060 = vmatprep.subr.mxu0 %v5091_v17 }
0x16d8   :  { %2061 = vmatpush1.msra.mxu0 %v5099_v47 }
0x16d9   :  { %2062 = vmatprep.subr.mxu0 %v5104_v8 }
0x16da   :  { %2063 = vmatpush1.msra.mxu0 %v5109_v32 }
0x16db   :  { %2064 = vmatprep.subr.mxu0 %v5115_v36 }
0x16dc   :  { %2065 = vmatpush1.msra.mxu0 %v5123_v15 }
0x16dd   :  { %2260 = vmatprep.subr.mxu0 %v5032_v21 }
0x178d   :  { %v1890_v57 = vpop.f32.mrf.mxu0 }
0x178e   :  { %v1895_v16 = vadd.f32 %v1890_v57, %v1820_v62 }
0x178f   :  { %v1892_v42 = vpop.f32.mrf.mxu0 }
0x1790   :  { %v3762_v29 = vmul.f32 -1.442695, %v1895_v16  ;;  %v1896_v33 = vadd.f32 %v1892_v42, %v1821_v4 }
0x1792   :  { %4271 = vpow2.f32 %v3762_v29  ;;  %v3763_v59 = vmul.f32 -1.442695, %v1896_v33 }
0x1793   :  { %4273 = vtanh.f32 %v1896_v33 }
0x179f   :  { %v4272_v26 = vpop.eup %4271 }
0x17a0   :  { %v1900_v40 = vadd.f32 1.0, %v4272_v26  ;;  %v4274_v21 = vpop.eup %4273 }
0x17a2   :  { %4275 = vrcp.f32 %v1900_v40 }
0x17a3   :  { %4277 = vpow2.f32 %v3763_v59 }
0x17af   :  { %v4276_v2 = vpop.eup %4275 }
0x17b0   :  { %v1911_v55 = vmul.f32 %v4276_v2, %v4274_v21  ;;  %v4278_v62 = vpop.eup %4277  ;;  %v1910_v39 = vmul.f32 %v4276_v2, %v1811_v38 }
0x17b1   :  { %v1907_v0 = vadd.f32 1.0, %v4278_v62 }
0x17b2   :  { %1913 = vrot.lane.b32.xlu1 %v1911_v55, %s4378_s27 }
0x17b3   :  { %4279 = vrcp.f32 %v1907_v0 }
0x17c0   :  { %v4280_v25 = vpop.eup %4279 }
0x1824   :  { %v1914_v56 = vpop.permute.xlu1 %1913 }
0x1825   :  { %v1916_v61 = vadd.f32 %v1914_v56, %v1910_v39  ;;  %v5867_v39 = vsel %vm4697_vm10, %v5228_v20, %v5184_v37 }
0x1827   :  { %4281 = vtanh.f32 %v1916_v61 }
0x1834   :  { %v4282_v4 = vpop.eup %4281 }
0x1835   :  { %v1918_v52 = vmul.f32 %v4282_v4, %v4280_v25  ;;  %v5868_v4 = vsel %vm4705_vm11, %v5238_v44, %v5186_v18 }
0x1837   :  { %1920 = vrot.lane.b32.xlu0 %v1918_v52, %s4378_s27 }
0x18a9   :  { %v1921_v3 = vpop.permute.xlu0 %1920 }
0x18aa   :  { %1923 = vst.msk [vmem:[#allocation3 + $0x18] sm:$0xff] %vm325_vm8, %v1921_v3  ;;  %3764 = vmatmul.mubr.msk.f32.vlgmr.msra.gmra.mxu1 %vm476_vm13, %v1921_v3 }
0x18ab   :  { %1924 = vst.msk [vmem:[#allocation3 + $0x20] sm:$0xff] %vm580_vm12, %v1921_v3  ;;  %2156 = vmatpush1.msra.mxu1 %v5037_v14  ;;  %2203 = vmatprep.mubr.f32.mxu1 %v4377_v19 }
0x18ac   :  { %2157 = vmatprep.subr.mxu1 %v5043_v22 }
0x18ad   :  { %2158 = vmatpush1.msra.mxu1 %v5051_v50 }
0x18ae   :  { %2159 = vmatprep.subr.mxu1 %v5056_v53 }
0x18af   :  { %2160 = vmatpush1.msra.mxu1 %v5061_v23 }
0x18b0   :  { %2161 = vmatprep.subr.mxu1 %v5067_v12 }
0x18b1   :  { %2162 = vmatpush1.msra.mxu1 %v5075_v9 }
0x18b2   :  { %2163 = vmatprep.subr.mxu1 %v5080_v11 }
0x18b3   :  { %2164 = vmatpush1.msra.mxu1 %v5085_v31 }
0x18b4   :  { %2165 = vmatprep.subr.mxu1 %v5091_v17 }
0x18b5   :  { %2166 = vmatpush1.msra.mxu1 %v5099_v47 }
0x18b6   :  { %2167 = vmatprep.subr.mxu1 %v5104_v8 }
0x18b7   :  { %2168 = vmatpush1.msra.mxu1 %v5109_v32 }
0x18b8   :  { %2169 = vmatprep.subr.mxu1 %v5115_v36 }
0x18b9   :  { %2170 = vmatpush1.msra.mxu1 %v5123_v15 }
0x196a   :  { %v1995_v38 = vpop.f32.mrf.mxu1 }
0x196b   :  { %v2000_v41 = vadd.f32 %v1995_v38, %v1925_v63 }
0x196c   :  { %v1997_v57 = vpop.f32.mrf.mxu1 }
0x196d   :  { %v3765_v6 = vmul.f32 -1.442695, %v2000_v41  ;;  %v2001_v16 = vadd.f32 %v1997_v57, %v1926_v24 }
0x196f   :  { %4283 = vpow2.f32 %v3765_v6  ;;  %v3766_v51 = vmul.f32 -1.442695, %v2001_v16 }
0x1970   :  { %4285 = vtanh.f32 %v2001_v16 }
0x197c   :  { %v4284_v29 = vpop.eup %4283 }
0x197d   :  { %v2005_v42 = vadd.f32 1.0, %v4284_v29  ;;  %v4286_v33 = vpop.eup %4285 }
0x197f   :  { %4287 = vrcp.f32 %v2005_v42 }
0x1980   :  { %4289 = vpow2.f32 %v3766_v51 }
0x198c   :  { %v4288_v26 = vpop.eup %4287 }
0x198d   :  { %v2016_v40 = vmul.f32 %v4288_v26, %v4286_v33  ;;  %v4290_v58 = vpop.eup %4289  ;;  %v2015_v21 = vmul.f32 %v4288_v26, %v1916_v61 }
0x198e   :  { %v2012_v63 = vadd.f32 1.0, %v4290_v58  ;;  %v5869_v58 = vsel %vm4697_vm10, %v5250_v28, %v5248_v43 }
0x198f   :  { %2018 = vrot.lane.b32.xlu1 %v2016_v40, %s4378_s27 }
0x1990   :  { %4291 = vrcp.f32 %v2012_v63 }
0x199d   :  { %v4292_v54 = vpop.eup %4291 }
0x1a01   :  { %v2019_v2 = vpop.permute.xlu1 %2018 }
0x1a02   :  { %v2021_v55 = vadd.f32 %v2019_v2, %v2015_v21 }
0x1a04   :  { %4293 = vtanh.f32 %v2021_v55 }
0x1a11   :  { %v4294_v60 = vpop.eup %4293 }
0x1a12   :  { %v2023_v24 = vmul.f32 %v4294_v60, %v4292_v54 }
0x1a14   :  { %2025 = vrot.lane.b32.xlu0 %v2023_v24, %s4378_s27 }
0x1a86   :  { %v2026_v59 = vpop.permute.xlu0 %2025 }
0x1a87   :  { %2028 = vst.msk [vmem:[#allocation3 + $0x20] sm:$0xff] %vm325_vm8, %v2026_v59  ;;  %3767 = vmatmul.mubr.msk.f32.vlgmr.msra.gmra.mxu0 %vm476_vm13, %v2026_v59 }
0x1a88   :  { %2029 = vst.msk [vmem:[#allocation3 + $0x18] sm:$0xff] %vm580_vm12, %v2026_v59  ;;  %2261 = vmatpush1.msra.mxu0 %v5037_v14  ;;  %2308 = vmatprep.mubr.f32.mxu0 %v4377_v19 }
0x1a89   :  { %2262 = vmatprep.subr.mxu0 %v5043_v22 }
0x1a8a   :  { %2263 = vmatpush1.msra.mxu0 %v5051_v50 }
0x1a8b   :  { %2264 = vmatprep.subr.mxu0 %v5056_v53 }
0x1a8c   :  { %2265 = vmatpush1.msra.mxu0 %v5061_v23  ;;  %v5866_v23 = vsel %vm4705_vm11, %v5218_v34, %v5190_v48 }
0x1a8d   :  { %2266 = vmatprep.subr.mxu0 %v5067_v12 }
0x1a8e   :  { %2267 = vmatpush1.msra.mxu0 %v5075_v9 }
0x1a8f   :  { %2268 = vmatprep.subr.mxu0 %v5080_v11 }
0x1a90   :  { %2269 = vmatpush1.msra.mxu0 %v5085_v31 }
0x1a91   :  { %2270 = vmatprep.subr.mxu0 %v5091_v17 }
0x1a92   :  { %2271 = vmatpush1.msra.mxu0 %v5099_v47 }
0x1a93   :  { %2272 = vmatprep.subr.mxu0 %v5104_v8 }
0x1a94   :  { %2273 = vmatpush1.msra.mxu0 %v5109_v32 }
0x1a95   :  { %2274 = vmatprep.subr.mxu0 %v5115_v36 }
0x1a96   :  { %2275 = vmatpush1.msra.mxu0 %v5123_v15 }
0x1b47   :  { %v2100_v14 = vpop.f32.mrf.mxu0 }
0x1b48   :  { %v2105_v22 = vadd.f32 %v2100_v14, %v2030_v45 }
0x1b49   :  { %v2102_v53 = vpop.f32.mrf.mxu0 }
0x1b4a   :  { %v3768_v50 = vmul.f32 -1.442695, %v2105_v22  ;;  %v2106_v12 = vadd.f32 %v2102_v53, %v5866_v23 }
0x1b4c   :  { %4295 = vpow2.f32 %v3768_v50  ;;  %v3769_v8 = vmul.f32 -1.442695, %v2106_v12 }
0x1b4d   :  { %4297 = vtanh.f32 %v2106_v12  ;;  %v2345_v12 = vld [vmem:[%s5854_s2 + $0x88] sm:$0xff] }
0x1b59   :  { %v4296_v9 = vpop.eup %4295 }
0x1b5a   :  { %v2110_v11 = vadd.f32 1.0, %v4296_v9  ;;  %v4298_v31 = vpop.eup %4297  ;;  %v2443_v9 = vld [vmem:[%s5854_s2 + $0x38] sm:$0xff] }
0x1b5b   :  { %4038 = vmatprep.subr.mxu0 %v2443_v9 }
0x1b5c   :  { %4299 = vrcp.f32 %v2110_v11  ;;  %v2442_v11 = vld [vmem:[%s5854_s2 + $0x30] sm:$0xff] }
0x1b5d   :  { %4301 = vpow2.f32 %v3769_v8  ;;  %v2438_v8 = vld [vmem:[%s5854_s2 + $0x10] sm:$0xff] }
0x1b69   :  { %v4300_v17 = vpop.eup %4299 }
0x1b6a   :  { %v2121_v47 = vmul.f32 %v4300_v17, %v4298_v31  ;;  %v4302_v32 = vpop.eup %4301  ;;  %v2120_v15 = vmul.f32 %v4300_v17, %v2021_v55  ;;  %v5870_v55 = vsel %vm4705_vm11, %v5266_v49, %v5260_v46  ;;  %v2441_v31 = vld [vmem:[%s5854_s2 + $0x28] sm:$0xff]  ;;  %v2440_v17 = vld [vmem:[%s5854_s2 + $0x20] sm:$0xff] }
0x1b6b   :  { %v2117_v36 = vadd.f32 1.0, %v4302_v32 }
0x1b6c   :  { %2123 = vrot.lane.b32.xlu1 %v2121_v47, %s4378_s27  ;;  %v2439_v47 = vld [vmem:[%s5854_s2 + $0x18] sm:$0xff] }
0x1b6d   :  { %4303 = vrcp.f32 %v2117_v36 }
0x1b7a   :  { %v4304_v48 = vpop.eup %4303 }
0x1bde   :  { %v2124_v27 = vpop.permute.xlu1 %2123 }
0x1bdf   :  { %v2126_v1 = vadd.f32 %v2124_v27, %v2120_v15 }
0x1be1   :  { %4305 = vtanh.f32 %v2126_v1 }
0x1bee   :  { %v4306_v34 = vpop.eup %4305 }
0x1bef   :  { %v2128_v45 = vmul.f32 %v4306_v34, %v4304_v48  ;;  %v2350_v48 = vld [vmem:[#allocation3 + $0x18] sm:$0xff] }
0x1bf1   :  { %2130 = vrot.lane.b32.xlu0 %v2128_v45, %s4378_s27 }
0x1c63   :  { %v2131_v62 = vpop.permute.xlu0 %2130 }
0x1c64   :  { %2133 = vst.msk [vmem:[#allocation3 + $0x28] sm:$0xff] %vm325_vm8, %v2131_v62  ;;  %3770 = vmatmul.mubr.msk.f32.vlgmr.msra.gmra.mxu1 %vm476_vm13, %v2131_v62 }
0x1c65   :  { %2134 = vst.msk [vmem:[#allocation3 + $0x10] sm:$0xff] %vm580_vm12, %v2131_v62  ;;  %4035 = vmatprep.mubr.msk.f32.mxu1 %vm476_vm13, %v2345_v12  ;;  %v2925_v12 = vld [vmem:[%s5855_s3 + $0x48] sm:$0xff] }
0x1c6b   :  { %v2352_v27 = vld [vmem:[#allocation3 + $0x28] sm:$0xff] }
0x1c6c   :  { %v2349_v34 = vld [vmem:[#allocation3 + $0x10] sm:$0xff] }
0x1d24   :  { %v2205_v0 = vpop.f32.mrf.mxu1 }
0x1d25   :  { %v2210_v56 = vadd.f32 %v2205_v0, %v5867_v39  ;;  %v2346_v0 = vld [vmem:[%s5854_s2 + $0x90] sm:$0xff]  ;;  %v2437_v39 = vld [vmem:[%s5854_s2 + $0x8] sm:$0xff] }
0x1d26   :  { %v2207_v25 = vpop.f32.mrf.mxu1 }
0x1d27   :  { %v3771_v61 = vmul.f32 -1.442695, %v2210_v56  ;;  %v2211_v52 = vadd.f32 %v2207_v25, %v5868_v4  ;;  %v2436_v56 = vld [vmem:[%s5854_s2] sm:$0xff]  ;;  %v2535_v4 = vld [vmem:[%s5854_s2 + $0xb0] sm:$0xff] }
0x1d29   :  { %4307 = vpow2.f32 %v3771_v61  ;;  %v3772_v37 = vmul.f32 -1.442695, %v2211_v52 }
0x1d2a   :  { %4309 = vtanh.f32 %v2211_v52  ;;  %v2534_v52 = vld [vmem:[%s5854_s2 + $0xa8] sm:$0xff] }
0x1d36   :  { %v4308_v3 = vpop.eup %4307 }
0x1d37   :  { %v2215_v38 = vadd.f32 1.0, %v4308_v3  ;;  %v4310_v41 = vpop.eup %4309  ;;  %v2533_v3 = vld [vmem:[%s5854_s2 + $0xa0] sm:$0xff] }
0x1d39   :  { %4311 = vrcp.f32 %v2215_v38  ;;  %v2532_v38 = vld [vmem:[%s5854_s2 + $0x98] sm:$0xff] }
0x1d3a   :  { %4313 = vpow2.f32 %v3772_v37 }
0x1d46   :  { %v4312_v6 = vpop.eup %4311 }
0x1d47   :  { %v2226_v57 = vmul.f32 %v4312_v6, %v4310_v41  ;;  %v4314_v20 = vpop.eup %4313  ;;  %v2225_v29 = vmul.f32 %v4312_v6, %v2126_v1  ;;  %v2351_v1 = vld [vmem:[#allocation3 + $0x20] sm:$0xff] }
0x1d48   :  { %v2222_v16 = vadd.f32 1.0, %v4314_v20  ;;  %v3778_v41 = vld [vmem:[%s5854_s2 + $0x40] ss:$0 sm:$0xff] }
0x1d49   :  { %2228 = vrot.lane.b32.xlu1 %v2226_v57, %s4378_s27 }
0x1d4a   :  { %4315 = vrcp.f32 %v2222_v16 }
0x1d57   :  { %v4316_v18 = vpop.eup %4315 }
0x1dbb   :  { %v2229_v42 = vpop.permute.xlu1 %2228 }
0x1dbc   :  { %v2231_v33 = vadd.f32 %v2229_v42, %v2225_v29 }
0x1dbe   :  { %4317 = vtanh.f32 %v2231_v33 }
0x1dcb   :  { %v4318_v44 = vpop.eup %4317 }
0x1dcc   :  { %v2233_v26 = vmul.f32 %v4318_v44, %v4316_v18  ;;  %v3781_v44 = vld [vmem:[%s5854_s2 + $0xb8] ss:$0 sm:$0xff] }
0x1dce   :  { %2235 = vrot.lane.b32.xlu0 %v2233_v26, %s4378_s27 }
0x1e40   :  { %v2236_v40 = vpop.permute.xlu0 %2235 }
0x1e41   :  { %2238 = vst.msk [vmem:[#allocation3 + $0x30] sm:$0xff] %vm325_vm8, %v2236_v40  ;;  %3773 = vmatmul.mubr.msk.f32.vlgmr.msra.gmra.mxu0 %vm476_vm13, %v2236_v40 }
0x1e42   :  { %2239 = vst.msk [vmem:[#allocation3 + $0x8] sm:$0xff] %vm580_vm12, %v2236_v40  ;;  %4039 = vmatpush3.msra.mxu0 %v2443_v9  ;;  %v2923_v9 = vld [vmem:[%s5855_s3 + $0x38] sm:$0xff] }
0x1e43   :  { %4040 = vmatprep.subr.mxu0 %v2442_v11 }
0x1e44   :  { %4041 = vmatpush3.msra.mxu0 %v2442_v11  ;;  %v2922_v11 = vld [vmem:[%s5855_s3 + $0x30] sm:$0xff] }
0x1e45   :  { %4042 = vmatprep.subr.mxu0 %v2441_v31 }
0x1e46   :  { %4043 = vmatpush3.msra.mxu0 %v2441_v31  ;;  %v2920_v31 = vld [vmem:[%s5855_s3 + $0x20] sm:$0xff] }
0x1e47   :  { %4044 = vmatprep.subr.mxu0 %v2440_v17 }
0x1e48   :  { %4045 = vmatpush3.msra.mxu0 %v2440_v17  ;;  %v2353_v15 = vld [vmem:[#allocation3 + $0x30] sm:$0xff]  ;;  %v3790_v17 = vld [vmem:[%s5854_s2 + $0x120] ss:$0 sm:$0xff] }
0x1e49   :  { %4046 = vmatprep.subr.mxu0 %v2439_v47  ;;  %v2348_v45 = vld [vmem:[#allocation3 + $0x8] sm:$0xff] }
0x1e4a   :  { %4047 = vmatpush3.msra.mxu0 %v2439_v47 }
0x1e4b   :  { %4048 = vmatprep.subr.mxu0 %v2438_v8 }
0x1e4c   :  { %4049 = vmatpush3.msra.mxu0 %v2438_v8 }
0x1e4d   :  { %4050 = vmatprep.subr.mxu0 %v2437_v39 }
0x1e4e   :  { %4051 = vmatpush3.msra.mxu0 %v2437_v39  ;;  %v2917_v39 = vld [vmem:[%s5855_s3 + $0x8] sm:$0xff] }
0x1e4f   :  { %4052 = vmatprep.subr.mxu0 %v2436_v56 }
0x1e50   :  { %4053 = vmatpush3.msra.mxu0 %v2436_v56  ;;  %v2918_v56 = vld [vmem:[%s5855_s3 + $0x10] sm:$0xff] }
0x1f01   :  { %v2310_v51 = vpop.f32.mrf.mxu0 }
0x1f02   :  { %v2315_v63 = vadd.f32 %v2310_v51, %v5869_v58  ;;  %v2540_v58 = vld [vmem:[%s5854_s2 + $0x118] sm:$0xff] }
0x1f03   :  { %v2312_v2 = vpop.f32.mrf.mxu0  ;;  %4075 = vmatprep.subr.mxu0 %v2540_v58 }
0x1f04   :  { %v3774_v21 = vmul.f32 -1.442695, %v2315_v63  ;;  %v2316_v54 = vadd.f32 %v2312_v2, %v5870_v55  ;;  %v2539_v63 = vld [vmem:[%s5854_s2 + $0x110] sm:$0xff]  ;;  %v2537_v2 = vld [vmem:[%s5854_s2 + $0x100] sm:$0xff]  ;;  %v2538_v55 = vld [vmem:[%s5854_s2 + $0x108] sm:$0xff] }
0x1f06   :  { %4319 = vpow2.f32 %v3774_v21  ;;  %v3775_v43 = vmul.f32 -1.442695, %v2316_v54 }
0x1f07   :  { %4321 = vtanh.f32 %v2316_v54 }
0x1f13   :  { %v4320_v60 = vpop.eup %4319 }
0x1f14   :  { %v2320_v24 = vadd.f32 1.0, %v4320_v60  ;;  %v4322_v59 = vpop.eup %4321 }
0x1f16   :  { %4323 = vrcp.f32 %v2320_v24 }
0x1f17   :  { %4325 = vpow2.f32 %v3775_v43 }
0x1f23   :  { %v4324_v14 = vpop.eup %4323 }
0x1f24   :  { %v2331_v30 = vmul.f32 %v4324_v14, %v4322_v59  ;;  %v4326_v28 = vpop.eup %4325  ;;  %v2330_v50 = vmul.f32 %v4324_v14, %v2231_v33 }
0x1f25   :  { %v2327_v22 = vadd.f32 1.0, %v4326_v28  ;;  %v2799_v28 = vcvt.s32.f32 %v4449_v13 }
0x1f26   :  { %2333 = vrot.lane.b32.xlu1 %v2331_v30, %s4378_s27 }
0x1f27   :  { %4327 = vrcp.f32 %v2327_v22 }
0x1f34   :  { %v4328_v46 = vpop.eup %4327 }
0x1f98   :  { %v2334_v53 = vpop.permute.xlu1 %2333 }
0x1f99   :  { %v2336_v35 = vadd.f32 %v2334_v53, %v2330_v50 }
0x1f9b   :  { %4329 = vtanh.f32 %v2336_v35 }
0x1fa8   :  { %v4330_v49 = vpop.eup %4329 }
0x1fa9   :  { %v2338_v23 = vmul.f32 %v4330_v49, %v4328_v46 }
0x1fab   :  { %2340 = vrot.lane.b32.xlu0 %v2338_v23, %s4378_s27  ;;  %v2926_v23 = vld [vmem:[%s5855_s3 + $0x50] sm:$0xff] }
0x201d   :  { %v2341_v32 = vpop.permute.xlu0 %2340 }
0x201e   :  { %2343 = vst.msk [vmem:[#allocation3 + $0x38] sm:$0xff] %vm325_vm8, %v2341_v32 }
0x201f   :  { %2344 = vst.msk [vmem:[#allocation3] sm:$0xff] %vm580_vm12, %v2341_v32 }
0x2025   :  { %v2354_v36 = vld [vmem:[#allocation3 + $0x38] sm:$0xff] }
0x2026   :  { %4019 = vmatprep.subr.mxu1 %v2354_v36  ;;  %v2347_v62 = vld [vmem:[#allocation3] sm:$0xff] }
0x2027   :  { %4020 = vmatpush3.msra.mxu1 %v2354_v36 }
0x2028   :  { %4021 = vmatprep.subr.mxu1 %v2353_v15 }
0x2029   :  { %4022 = vmatpush3.msra.mxu1 %v2353_v15 }
0x202a   :  { %4023 = vmatprep.subr.mxu1 %v2352_v27 }
0x202b   :  { %4024 = vmatpush3.msra.mxu1 %v2352_v27 }
0x202c   :  { %4025 = vmatprep.subr.mxu1 %v2351_v1 }
0x202d   :  { %4026 = vmatpush3.msra.mxu1 %v2351_v1 }
0x202e   :  { %4027 = vmatprep.subr.mxu1 %v2350_v48 }
0x202f   :  { %4028 = vmatpush3.msra.mxu1 %v2350_v48  ;;  %v2927_v48 = vld [vmem:[%s5855_s3 + $0x58] sm:$0xff] }
0x2030   :  { %4029 = vmatprep.subr.mxu1 %v2349_v34 }
0x2031   :  { %4030 = vmatpush3.msra.mxu1 %v2349_v34 }
0x2032   :  { %4031 = vmatprep.subr.mxu1 %v2348_v45 }
0x2033   :  { %4032 = vmatpush3.msra.mxu1 %v2348_v45  ;;  %v2924_v45 = vld [vmem:[%s5855_s3 + $0x40] sm:$0xff] }
0x2034   :  { %4033 = vmatprep.subr.mxu1 %v2347_v62 }
0x2035   :  { %4034 = vmatpush3.msra.mxu1 %v2347_v62  ;;  %v2921_v62 = vld [vmem:[%s5855_s3 + $0x28] sm:$0xff] }
0x2036   :  { %4036 = vmatmul.mubr.msk.f32.vlgmr.msra.gmra.mxu1 %vm476_vm13, %v2346_v0  ;;  %4057 = vmatprep.subr.mxu1 %v2535_v4  ;;  %v2919_v0 = vld [vmem:[%s5855_s3 + $0x18] sm:$0xff] }
0x2037   :  { %4058 = vmatpush3.msra.mxu1 %v2535_v4  ;;  %v2943_v4 = vld [vmem:[%s5855_s3 + $0xd0] sm:$0xff] }
0x2038   :  { %4059 = vmatprep.subr.mxu1 %v2534_v52 }
0x2039   :  { %4060 = vmatpush3.msra.mxu1 %v2534_v52 }
0x203a   :  { %4061 = vmatprep.subr.mxu1 %v2533_v3 }
0x203b   :  { %4062 = vmatpush3.msra.mxu1 %v2533_v3  ;;  %v5607_v3 = vmul.u32 33, %v4449_v13  ;;  %v2938_v13 = vld [vmem:[%s5855_s3 + $0xa8] sm:$0xff] }
0x203c   :  { %4063 = vmatprep.subr.mxu1 %v2532_v38 }
0x203d   :  { %4064 = vmatpush3.msra.mxu1 %v2532_v38  ;;  %v2941_v38 = vld [vmem:[%s5855_s3 + $0xc0] sm:$0xff] }
0x20f6   :  { %v4037_v61 = vpop.f32.mrf.mxu1 }
0x20f8   :  { %v2427_v25 = vpop.f32.mrf.mxu1 }
0x20f9   :  { %4054 = vmatprep.mubr.msk.f32.mxu0 %vm476_vm13, %v2427_v25  ;;  %v2942_v25 = vld [vmem:[%s5855_s3 + $0xc8] sm:$0xff] }
0x20fa   :  { %4055 = vmatmul.mubr.msk.f32.vlgmr.msra.gmra.mxu0 %vm476_vm13, %v4037_v61  ;;  %v2916_v61 = vld [vmem:[%s5855_s3] sm:$0xff] }
0x20fb   :  { %4076 = vmatpush3.msra.mxu0 %v2540_v58  ;;  %v2932_v58 = vld [vmem:[%s5855_s3 + $0x78] sm:$0xff] }
0x20fc   :  { %4077 = vmatprep.subr.mxu0 %v2539_v63 }
0x20fd   :  { %4078 = vmatpush3.msra.mxu0 %v2539_v63  ;;  %v3324_v63 = vadd.s32 232, %v4666_v5 }
0x21ba   :  { %v4056_v6 = vpop.f32.mrf.mxu0 }
0x21bb   :  { %v2527_v57 = vadd.f32 %v4056_v6, %v3778_v41  ;;  %v2939_v6 = vld [vmem:[%s5855_s3 + $0xb0] sm:$0xff] }
0x21bc   :  { %v2521_v37 = vpop.f32.mrf.mxu0 }
0x21bd   :  { %v5516_v20 = vmax.f32 %v2527_v57, 0.0  ;;  %v2522_v16 = vadd.f32 %v3778_v41, %v2521_v37  ;;  %v2940_v57 = vld [vmem:[%s5855_s3 + $0xb8] sm:$0xff] }
0x21bf   :  { %v2530_v29 = vmax.f32 %v2522_v16, 0.0  ;;  %2629 = vrot.lane.b32.xlu1 %v5516_v20, %s4379_s22  ;;  %v5626_v16 = vadd.s32 33, %v5607_v3 }
0x21c1   :  { %2627 = vrot.lane.b32.xlu0 %v2530_v29, %s4379_s22  ;;  %4065 = vmatprep.mubr.msk.f32.mxu1 %vm325_vm8, %v2530_v29 }
0x21c2   :  { %4066 = vmatmul.mubr.msk.f32.vlgmr.msra.gmra.mxu1 %vm325_vm8, %v5516_v20 }
0x2231   :  { %v2630_v42 = vpop.permute.xlu1 %2629 }
0x2232   :  { %4068 = vmatprep.subr.msk.mxu1 %vm325_vm8, %v2630_v42 }
0x2233   :  { %v2628_v33 = vpop.permute.xlu0 %2627  ;;  %4069 = vmatpush3.xpose.msk.msra.mxu1 %vm325_vm8, %v2630_v42  ;;  %v2937_v42 = vld [vmem:[%s5855_s3 + $0xa0] sm:$0xff] }
0x2234   :  { %4070 = vmatprep.subr.msk.mxu1 %vm325_vm8, %v2628_v33 }
0x2237   :  { %4071 = vmatpush3.xpose.msk.msra.mxu1 %vm325_vm8, %v2628_v33  ;;  %v3310_v33 = vadd.s32 120, %v4666_v5 }
0x2238   :  { %2990 = vmatprep.subr.mxu1 %v2926_v23  ;;  %v3317_v23 = vadd.s32 176, %v4666_v5 }
0x2239   :  { %vm3344_vm5 = vcmp.ge.s32.totalorder %v3310_v33, %v5607_v3  ;;  %vm3378_vm6 = vcmp.lt.s32.totalorder %v3310_v33, %v5626_v16 }
0x223a   :  { %vm5676_vm13 = vmand %vm3344_vm5, %vm3378_vm6 }
0x2282   :  { %v4067_v18 = vpop.f32.mrf.mxu1 }
0x2283   :  { %v2624_v51 = vadd.f32 %v4067_v18, %v3781_v44  ;;  %v2935_v18 = vld [vmem:[%s5855_s3 + $0x90] sm:$0xff] }
0x2284   :  { %v2618_v26 = vpop.f32.mrf.mxu1 }
0x2285   :  { %v2619_v40 = vadd.f32 %v3781_v44, %v2618_v26  ;;  %v3325_v44 = vadd.s32 240, %v4666_v5  ;;  %v2933_v26 = vld [vmem:[%s5855_s3 + $0x80] sm:$0xff] }
0x2287   :  { %4072 = vmatprep.mubr.msk.f32.mxu1 %vm325_vm8, %v2619_v40  ;;  %v2934_v40 = vld [vmem:[%s5855_s3 + $0x88] sm:$0xff]  ;;  %vm3393_vm9 = vcmp.lt.s32.totalorder %v3325_v44, %v5626_v16 }
0x2288   :  { %4073 = vmatmul.mubr.msk.f32.vlgmr.msra.gmra.mxu1 %vm325_vm8, %v2624_v51  ;;  %v3309_v51 = vadd.s32 112, %v4666_v5 }
0x2289   :  { %3030 = vmatprep.mubr.f32.mxu1 %v4377_v19  ;;  %2991 = vmatpush1.msra.mxu1 %v2925_v12  ;;  %v3301_v12 = vadd.s32 48, %v4666_v5 }
0x228a   :  { %2992 = vmatprep.subr.mxu1 %v2923_v9  ;;  %vm3343_vm11 = vcmp.ge.s32.totalorder %v3309_v51, %v5607_v3  ;;  %vm3377_vm12 = vcmp.lt.s32.totalorder %v3309_v51, %v5626_v16  ;;  %v3316_v9 = vadd.s32 168, %v4666_v5 }
0x228b   :  { %2993 = vmatpush1.msra.mxu1 %v2922_v11  ;;  %v3300_v11 = vadd.s32 40, %v4666_v5 }
0x228c   :  { %2994 = vmatprep.subr.mxu1 %v2920_v31  ;;  %v3315_v31 = vadd.s32 160, %v4666_v5 }
0x228d   :  { %2995 = vmatpush1.msra.mxu1 %v2919_v0 }
0x228e   :  { %2996 = vmatprep.subr.mxu1 %v2917_v39  ;;  %v3796_v39 = vld [vmem:[%s5855_s3 + $0x61] ss:$8 sm:$0x7] }
0x228f   :  { %2997 = vmatpush1.msra.mxu1 %v2916_v61  ;;  %v2955_v61 = vsub.s32 2, %v4666_v5 }
0x2290   :  { %3166 = vmatprep.subr.mxu1 %v2942_v25 }
0x2348   :  { %v4074_v21 = vpop.f32.mrf.mxu1 }
0x2349   :  { %v2717_v24 = vmul.f32 %v4074_v21, %v2538_v55  ;;  %v3308_v21 = vadd.s32 104, %v4666_v5 }
0x234a   :  { %v2707_v54 = vpop.f32.mrf.mxu1 }
0x234b   :  { %v2716_v60 = vmul.f32 %v2707_v54, %v2537_v2  ;;  %v3307_v54 = vadd.s32 96, %v4666_v5 }
0x234d   :  { %4079 = vmatprep.mubr.msk.f32.mxu0 %vm155_vm7, %v2716_v60 }
0x234e   :  { %4080 = vmatmul.mubr.msk.f32.vlgmr.msra.gmra.mxu0 %vm155_vm7, %v2717_v24 }
0x240e   :  { %v4081_v59 = vpop.f32.mrf.mxu0 }
0x240f   :  { %3660 = vst.msk [vmem:[#allocation4 + $0x8] sm:$0xff] %vm5858_vm14, %v4081_v59  ;;  %v2804_v14 = vsel %vm5858_vm14, %v4081_v59, -inf }
0x2410   :  { %2805 = vmax.xlane.f32.xlu0 %v2804_v14  ;;  %v2790_v30 = vpop.f32.mrf.mxu0 }
0x2411   :  { %3657 = vst.msk [vmem:[#allocation4] sm:$0xff] %vm5858_vm14, %v2790_v30  ;;  %v2801_v43 = vsel %vm5858_vm14, %v2790_v30, -inf }
0x2412   :  { %2802 = vmax.xlane.f32.xlu1 %v2801_v43  ;;  %v4381_v43 = vmov 1.0  }
0x2499   :  { %v2806_v22 = vpop.xlane.xlu0 %2805 }
0x249a   :  { %vm2808_vm15 = vcmp.ge.f32.partialorder %v4081_v59, %v2806_v22  ;;  %v3322_v59 = vadd.s32 216, %v4666_v5  ;;  %v3320_v22 = vadd.s32 200, %v4666_v5 }
0x249b   :  { %v2803_v50 = vpop.xlane.xlu1 %2802  ;;  %v2810_v53 = vsel %vm2808_vm15, %v2799_v28, 8.0  ;;  %vm3358_vm15 = vcmp.ge.s32.totalorder %v3324_v63, %v5607_v3 }
0x249c   :  { %vm2807_vm0 = vcmp.ge.f32.partialorder %v2790_v30, %v2803_v50  ;;  %v2814_v35 = vsel %vm5858_vm14, %v2810_v53, inf  ;;  %v3306_v30 = vadd.s32 88, %v4666_v5  ;;  %v3304_v50 = vadd.s32 72, %v4666_v5 }
0x249d   :  { %2815 = vmin.xlane.f32.xlu1 %v2814_v35  ;;  %v2809_v46 = vsel %vm2807_vm0, %v2799_v28, 8.0  ;;  %vm3392_vm0 = vcmp.lt.s32.totalorder %v3324_v63, %v5626_v16  ;;  %v3305_v28 = vadd.s32 80, %v4666_v5  ;;  %v3319_v53 = vadd.s32 192, %v4666_v5 }
0x249e   :  { %v2811_v49 = vsel %vm5858_vm14, %v2809_v46, inf  ;;  %v3303_v35 = vadd.s32 64, %v4666_v5  ;;  %v3318_v46 = vadd.s32 184, %v4666_v5 }
0x249f   :  { %2812 = vmin.xlane.f32.xlu0 %v2811_v49  ;;  %v3302_v49 = vadd.s32 56, %v4666_v5 }
0x24ae   :  { %2829 = vrot.lane.b32.xlu1 %v2530_v29, %s4378_s27 }
0x24b2   :  { %3134 = vrot.lane.b32.xlu1 %v2530_v29, %s4380_s12  ;;  %v2936_v29 = vld [vmem:[%s5855_s3 + $0x98] sm:$0xff] }
0x24b5   :  { %2831 = vrot.lane.b32.xlu0 %v5516_v20, %s4378_s27 }
0x24b9   :  { %3136 = vrot.lane.b32.xlu0 %v5516_v20, %s4380_s12  ;;  %v3326_v20 = vadd.s32 248, %v4666_v5 }
0x24bb   :  { %vm3360_vm3 = vcmp.ge.s32.totalorder %v3326_v20, %v5607_v3  ;;  %vm3394_vm4 = vcmp.lt.s32.totalorder %v3326_v20, %v5626_v16 }
0x24bc   :  { %vm5664_vm10 = vmand %vm3360_vm3, %vm3394_vm4  ;;  %vm3376_vm3 = vcmp.lt.s32.totalorder %v3308_v21, %v5626_v16 }
0x24bd   :  { %vm3410_vm4 = vmand %vm3343_vm11, %vm3377_vm12  ;;  %vm3356_vm12 = vcmp.ge.s32.totalorder %v3322_v59, %v5607_v3 }
0x2526   :  { %v2816_v47 = vpop.xlane.xlu1 %2815 }
0x2527   :  { %vm2822_vm1 = vcmp.eq.f32.partialorder %v3790_v17, %v2816_v47  ;;  %v3314_v47 = vadd.s32 152, %v4666_v5 }
0x2528   :  { %v2813_v8 = vpop.xlane.xlu0 %2812  ;;  %v3792_v15 = vsel %vm2822_vm1, 1.0, %v4377_v19 }
0x2529   :  { %vm2821_vm2 = vcmp.eq.f32.partialorder %v3790_v17, %v2813_v8  ;;  %v2828_v34 = vmul.f32 %v3792_v15, %v2538_v55  ;;  %v3299_v17 = vadd.s32 32, %v4666_v5  ;;  %v3298_v8 = vadd.s32 24, %v4666_v5 }
0x252a   :  { %v3791_v32 = vsel %vm2821_vm2, 1.0, %v4377_v19  ;;  %v2830_v1 = vpop.permute.xlu1 %2829  ;;  %vm3342_vm2 = vcmp.ge.s32.totalorder %v3308_v21, %v5607_v3  ;;  %v3312_v15 = vadd.s32 136, %v4666_v5 }
0x252b   :  { %v2827_v36 = vmul.f32 %v3791_v32, %v2537_v2  ;;  %v3323_v2 = vadd.s32 224, %v4666_v5  ;;  %vm3409_vm11 = vmand %vm3342_vm2, %vm3376_vm3  ;;  %v3313_v32 = vadd.s32 144, %v4666_v5 }
0x252c   :  { %v2832_v27 = vpop.permute.xlu0 %2831 }
0x252d   :  { %4082 = vmatprep.subr.mxu0 %v2832_v27  ;;  %4086 = vmatprep.mubr.msk.f32.mxu0 %vm155_vm7, %v2827_v36  ;;  %vm3357_vm5 = vcmp.ge.s32.totalorder %v3323_v2, %v5607_v3  ;;  %vm3391_vm6 = vcmp.lt.s32.totalorder %v3323_v2, %v5626_v16  ;;  %v3297_v36 = vadd.s32 16, %v4666_v5 }
0x252e   :  { %4083 = vmatpush3.msra.mxu0 %v2832_v27  ;;  %v3135_v37 = vpop.permute.xlu1 %3134  ;;  %v3296_v27 = vadd.s32 8, %v4666_v5 }
0x252f   :  { %4084 = vmatprep.subr.mxu0 %v2830_v1 }
0x2530   :  { %4085 = vmatpush3.msra.mxu0 %v2830_v1  ;;  %v3137_v60 = vpop.permute.xlu0 %3136  ;;  %v3311_v1 = vadd.s32 128, %v4666_v5 }
0x2531   :  { %4087 = vmatmul.mubr.msk.f32.vlgmr.msra.gmra.mxu0 %vm155_vm7, %v2828_v34  ;;  %4089 = vmatprep.subr.mxu0 %v2927_v48  ;;  %vm3359_vm7 = vcmp.ge.s32.totalorder %v3325_v44, %v5607_v3 }
0x2532   :  { %4090 = vmatpush3.msra.mxu0 %v2927_v48  ;;  %vm5689_vm1 = vmand %vm3359_vm7, %vm3393_vm9  ;;  %vm3341_vm9 = vcmp.ge.s32.totalorder %v3307_v54, %v5607_v3  ;;  %v3327_v48 = vadd.s32 256, %v4666_v5 }
0x2533   :  { %4091 = vmatprep.subr.mxu0 %v2924_v45  ;;  %vm3425_vm7 = vmand %vm3358_vm15, %vm3392_vm0  ;;  %vm3340_vm15 = vcmp.ge.s32.totalorder %v3306_v30, %v5607_v3  ;;  %vm3374_vm0 = vcmp.lt.s32.totalorder %v3306_v30, %v5626_v16 }
0x2534   :  { %4092 = vmatpush3.msra.mxu0 %v2924_v45 }
0x2535   :  { %4093 = vmatprep.subr.mxu0 %v2921_v62 }
0x2536   :  { %4094 = vmatpush3.msra.mxu0 %v2921_v62 }
0x2537   :  { %4095 = vmatprep.subr.mxu0 %v2918_v56 }
0x2538   :  { %4096 = vmatpush3.msra.mxu0 %v2918_v56  ;;  %v3795_v56 = vld [vmem:[%s5855_s3 + $0x60] ss:$8 sm:$0x7]  ;;  %s4382_s3 = smov [#allocation4]  }
0x2539   :  { %4100 = vmatprep.subr.mxu0 %v2943_v4  ;;  %s3668_s7 = sshll.u32 %s4382_s3, 4  ;;  %s3669_s7 = int_to_ptr.vmem [resolvable:$true] %s3668_s7 }
0x253a   :  { %s4331_s8 = scalar_lea.vmem %s3669_s7, 256  ;;  %p4336_p1 = scmp.lt.s32.totalorder %s3669_s7, %s3669_s7 }
0x253b   :  { %p4332_p0 = scmp.ne.s32.totalorder %s3669_s7, %s4331_s8  ;;  %p4337_p2 = scmp.lt.s32.totalorder %s4331_s8, %s4331_s8 }
0x253d   :  { %p4338_p3 = por %p4337_p2, %p4336_p1 }
0x253f   :  { %p4339_p4 = pnand %p4338_p3, %p4332_p0 }
0x25f1   :  { %v4088_v52 = vpop.f32.mrf.mxu0 }
0x25f3   :  { %v2907_v41 = vpop.f32.mrf.mxu0 }
0x25f4   :  { %3797 = vmatmul.mubr.msk.f32.vlgmr.msra.gmra.mxu1 %vm325_vm8, %v2907_v41  ;;  %4097 = vmatprep.mubr.msk.f32.mxu0 %vm325_vm8, %v2907_v41  ;;  %v3126_v41 = vrot.slane %v3796_v39, %v4678_v10 }
0x25f5   :  { %4098 = vmatmul.mubr.msk.f32.vlgmr.msra.gmra.mxu0 %vm325_vm8, %v4088_v52  ;;  %3167 = vmatpush1.msra.mxu1 %v2941_v38  ;;  %v3130_v38 = vrot.slane %v3796_v39, %v2955_v61 }
0x25f6   :  { %4101 = vmatpush3.msra.mxu0 %v2943_v4  ;;  %3168 = vmatprep.subr.mxu1 %v2939_v6  ;;  %v3122_v4 = vrot.slane %v3796_v39, %v4672_v7  ;;  %v2948_v6 = vrot.slane %v3795_v56, %v4672_v7 }
0x25f7   :  { %4102 = vmatprep.subr.mxu0 %v2940_v57  ;;  %4108 = vmatprep.mubr.msk.f32.mxu0 %vm325_vm8, %v3135_v37 }
0x25f8   :  { %3036 = vmatprep.mubr.f32.mxu1 %v4377_v19  ;;  %3169 = vmatpush1.msra.mxu1 %v2938_v13  ;;  %v2956_v13 = vrot.slane %v3795_v56, %v2955_v61 }
0x25f9   :  { %4103 = vmatpush3.msra.mxu0 %v2940_v57  ;;  %3798 = vmatmul.mubr.msk.f32.gmra.mxu1 %vm325_vm8, %v4088_v52  ;;  %v2952_v52 = vrot.slane %v3795_v56, %v4678_v10 }
0x25fa   :  { %3170 = vmatprep.subr.mxu1 %v2936_v29  ;;  %4104 = vmatprep.subr.mxu0 %v2937_v42 }
0x25fb   :  { %3171 = vmatpush1.msra.mxu1 %v2935_v18  ;;  %4105 = vmatpush3.msra.mxu0 %v2937_v42 }
0x25fc   :  { %3172 = vmatprep.subr.mxu1 %v2933_v26  ;;  %4106 = vmatprep.subr.mxu0 %v2934_v40 }
0x25fd   :  { %3173 = vmatpush1.msra.mxu1 %v2932_v58  ;;  %3206 = vmatprep.mubr.f32.mxu1 %v4377_v19 }
0x25fe   :  { %4107 = vmatpush3.msra.mxu0 %v2934_v40  ;;  %3801 = vmatmul.mubr.msk.f32.vlgmr.msra.gmra.mxu1 %vm325_vm8, %v3135_v37 }
0x25ff   :  { %4109 = vmatmul.mubr.msk.f32.vlgmr.msra.gmra.mxu0 %vm325_vm8, %v3137_v60  ;;  %3212 = vmatprep.mubr.f32.mxu1 %v4377_v19  ;;  %v3321_v19 = vadd.s32 208, %v4666_v5 }
0x2600   :  { %3943 = vmatprep.subr.msk.mxu1 %vm5664_vm10, %v4381_v43  ;;  %vm3375_vm10 = vcmp.lt.s32.totalorder %v3307_v54, %v5626_v16 }
0x2601   :  { %3944 = vmatpush3.msk.msra.mxu1 %vm5676_vm13, %v4381_v43  ;;  %vm3390_vm13 = vcmp.lt.s32.totalorder %v3322_v59, %v5626_v16  ;;  %vm3355_vm2 = vcmp.ge.s32.totalorder %v3321_v19, %v5607_v3  ;;  %vm3389_vm3 = vcmp.lt.s32.totalorder %v3321_v19, %v5626_v16 }
0x2602   :  { %3802 = vmatmul.mubr.msk.f32.gmra.mxu1 %vm325_vm8, %v3137_v60  ;;  %3945 = vmatprep.subr.msk.mxu1 %vm5689_vm1, %v4381_v43  ;;  %vm3424_vm8 = vmand %vm3357_vm5, %vm3391_vm6  ;;  %vm3339_vm5 = vcmp.ge.s32.totalorder %v3305_v28, %v5607_v3  ;;  %vm3373_vm6 = vcmp.lt.s32.totalorder %v3305_v28, %v5626_v16 }
0x2603   :  { %3946 = vmatpush3.msk.msra.mxu1 %vm3410_vm4, %v4381_v43  ;;  %vm3408_vm1 = vmand %vm3341_vm9, %vm3375_vm10  ;;  %vm3354_vm9 = vcmp.ge.s32.totalorder %v3320_v22, %v5607_v3  ;;  %vm3388_vm10 = vcmp.lt.s32.totalorder %v3320_v22, %v5626_v16 }
0x2604   :  { %3947 = vmatprep.subr.msk.mxu1 %vm3425_vm7, %v4381_v43  ;;  %vm3423_vm4 = vmand %vm3356_vm12, %vm3390_vm13  ;;  %vm3372_vm12 = vcmp.lt.s32.totalorder %v3304_v50, %v5626_v16 }
0x2605   :  { %3948 = vmatpush3.msk.msra.mxu1 %vm3409_vm11, %v4381_v43  ;;  %vm3407_vm7 = vmand %vm3340_vm15, %vm3374_vm0  ;;  %vm3338_vm11 = vcmp.ge.s32.totalorder %v3304_v50, %v5607_v3  ;;  %vm3387_vm0 = vcmp.lt.s32.totalorder %v3319_v53, %v5626_v16 }
0x2606   :  { %3949 = vmatprep.subr.msk.mxu1 %vm3424_vm8, %v4381_v43  ;;  %vm3422_vm14 = vmand %vm3355_vm2, %vm3389_vm3  ;;  %vm3353_vm8 = vcmp.ge.s32.totalorder %v3319_v53, %v5607_v3  ;;  %vm3371_vm2 = vcmp.lt.s32.totalorder %v3303_v35, %v5626_v16 }
0x2607   :  { %3950 = vmatpush3.msk.msra.mxu1 %vm3408_vm1, %v4381_v43  ;;  %vm3406_vm13 = vmand %vm3339_vm5, %vm3373_vm6  ;;  %vm3337_vm1 = vcmp.ge.s32.totalorder %v3303_v35, %v5607_v3  ;;  %vm3352_vm6 = vcmp.ge.s32.totalorder %v3318_v46, %v5607_v3 }
0x2608   :  { %3951 = vmatprep.subr.msk.mxu1 %vm3423_vm4, %v4381_v43  ;;  %vm3421_vm15 = vmand %vm3354_vm9, %vm3388_vm10  ;;  %vm3336_vm9 = vcmp.ge.s32.totalorder %v3302_v49, %v5607_v3  ;;  %vm3370_vm10 = vcmp.lt.s32.totalorder %v3302_v49, %v5626_v16 }
0x2609   :  { %3952 = vmatpush3.msk.msra.mxu1 %vm3407_vm7, %v4381_v43  ;;  %vm3405_vm3 = vmand %vm3338_vm11, %vm3372_vm12  ;;  %vm3351_vm12 = vcmp.ge.s32.totalorder %v3317_v23, %v5607_v3 }
0x260a   :  { %3953 = vmatprep.subr.msk.mxu1 %vm3422_vm14, %v4381_v43  ;;  %vm3420_vm4 = vmand %vm3353_vm8, %vm3387_vm0  ;;  %vm3386_vm14 = vcmp.lt.s32.totalorder %v3318_v46, %v5626_v16  ;;  %vm3335_vm0 = vcmp.ge.s32.totalorder %v3301_v12, %v5607_v3 }
0x260b   :  { %3954 = vmatpush3.msk.msra.mxu1 %vm3406_vm13, %v4381_v43  ;;  %vm3404_vm5 = vmand %vm3337_vm1, %vm3371_vm2  ;;  %vm3385_vm13 = vcmp.lt.s32.totalorder %v3317_v23, %v5626_v16  ;;  %vm3350_vm2 = vcmp.ge.s32.totalorder %v3316_v9, %v5607_v3 }
0x260c   :  { %3955 = vmatprep.subr.msk.mxu1 %vm3421_vm15, %v4381_v43  ;;  %vm3419_vm7 = vmand %vm3352_vm6, %vm3386_vm14  ;;  %vm3369_vm15 = vcmp.lt.s32.totalorder %v3301_v12, %v5626_v16  ;;  %vm3368_vm6 = vcmp.lt.s32.totalorder %v3300_v11, %v5626_v16 }
0x260d   :  { %3956 = vmatpush3.msk.msra.mxu1 %vm3405_vm3, %v4381_v43  ;;  %vm3403_vm11 = vmand %vm3336_vm9, %vm3370_vm10  ;;  %vm3384_vm3 = vcmp.lt.s32.totalorder %v3316_v9, %v5626_v16  ;;  %vm3383_vm9 = vcmp.lt.s32.totalorder %v3315_v31, %v5626_v16 }
0x260e   :  { %3957 = vmatprep.subr.msk.mxu1 %vm3420_vm4, %v4381_v43  ;;  %vm3418_vm8 = vmand %vm3351_vm12, %vm3385_vm13  ;;  %vm3367_vm12 = vcmp.lt.s32.totalorder %v3299_v17, %v5626_v16 }
0x260f   :  { %3958 = vmatpush3.msk.msra.mxu1 %vm3404_vm5, %v4381_v43  ;;  %vm3402_vm1 = vmand %vm3335_vm0, %vm3369_vm15  ;;  %vm3334_vm5 = vcmp.ge.s32.totalorder %v3300_v11, %v5607_v3  ;;  %vm3382_vm0 = vcmp.lt.s32.totalorder %v3314_v47, %v5626_v16 }
0x2610   :  { %3959 = vmatprep.subr.msk.mxu1 %vm3419_vm7, %v4381_v43  ;;  %vm3417_vm4 = vmand %vm3350_vm2, %vm3384_vm3  ;;  %vm3349_vm7 = vcmp.ge.s32.totalorder %v3315_v31, %v5607_v3  ;;  %vm3366_vm2 = vcmp.lt.s32.totalorder %v3298_v8, %v5626_v16 }
0x2611   :  { %3960 = vmatpush3.msk.msra.mxu1 %vm3403_vm11, %v4381_v43  ;;  %vm3401_vm14 = vmand %vm3334_vm5, %vm3368_vm6  ;;  %vm3333_vm11 = vcmp.ge.s32.totalorder %v3299_v17, %v5607_v3  ;;  %vm3381_vm5 = vcmp.lt.s32.totalorder %v3313_v32, %v5626_v16 }
0x2612   :  { %3961 = vmatprep.subr.msk.mxu1 %vm3418_vm8, %v4381_v43  ;;  %vm3416_vm10 = vmand %vm3349_vm7, %vm3383_vm9  ;;  %vm3348_vm8 = vcmp.ge.s32.totalorder %v3314_v47, %v5607_v3  ;;  %vm3365_vm7 = vcmp.lt.s32.totalorder %v3297_v36, %v5626_v16 }
0x2613   :  { %3962 = vmatpush3.msk.msra.mxu1 %vm3402_vm1, %v4381_v43  ;;  %vm3400_vm13 = vmand %vm3333_vm11, %vm3367_vm12  ;;  %vm3332_vm1 = vcmp.ge.s32.totalorder %v3298_v8, %v5607_v3  ;;  %vm3380_vm11 = vcmp.lt.s32.totalorder %v3312_v15, %v5626_v16 }
0x2614   :  { %3963 = vmatprep.subr.msk.mxu1 %vm3417_vm4, %v4381_v43  ;;  %vm3415_vm15 = vmand %vm3348_vm8, %vm3382_vm0  ;;  %vm3347_vm4 = vcmp.ge.s32.totalorder %v3313_v32, %v5607_v3  ;;  %vm3364_vm8 = vcmp.lt.s32.totalorder %v3296_v27, %v5626_v16 }
0x2615   :  { %3964 = vmatpush3.msk.msra.mxu1 %vm3401_vm14, %v4381_v43  ;;  %vm3399_vm3 = vmand %vm3332_vm1, %vm3366_vm2  ;;  %vm3331_vm14 = vcmp.ge.s32.totalorder %v3297_v36, %v5607_v3  ;;  %vm3379_vm1 = vcmp.lt.s32.totalorder %v3311_v1, %v5626_v16  ;;  %vm3361_vm2 = vcmp.ge.s32.totalorder %v3327_v48, %v5607_v3 }
0x2616   :  { %3965 = vmatprep.subr.msk.mxu1 %vm3416_vm10, %v4381_v43  ;;  %vm3414_vm6 = vmand %vm3347_vm4, %vm3381_vm5  ;;  %vm3346_vm10 = vcmp.ge.s32.totalorder %v3312_v15, %v5607_v3  ;;  %vm3329_vm5 = vcmp.ge.s32.totalorder %v4666_v5, %v5607_v3 }
0x2617   :  { %3966 = vmatpush3.msk.msra.mxu1 %vm3400_vm13, %v4381_v43  ;;  %vm3398_vm9 = vmand %vm3331_vm14, %vm3365_vm7  ;;  %vm3330_vm13 = vcmp.ge.s32.totalorder %v3296_v27, %v5607_v3 }
0x2618   :  { %3967 = vmatprep.subr.msk.mxu1 %vm3415_vm15, %v4381_v43  ;;  %vm3413_vm12 = vmand %vm3346_vm10, %vm3380_vm11  ;;  %vm3345_vm15 = vcmp.ge.s32.totalorder %v3311_v1, %v5607_v3 }
0x2619   :  { %3968 = vmatpush3.msk.msra.mxu1 %vm3399_vm3, %v4381_v43  ;;  %vm3397_vm0 = vmand %vm3330_vm13, %vm3364_vm8  ;;  %vm3395_vm3 = vcmp.lt.s32.totalorder %v3327_v48, %v5626_v16 }
0x261a   :  { %3969 = vmatprep.subr.msk.mxu1 %vm3414_vm6, %v4381_v43  ;;  %vm3412_vm4 = vmand %vm3345_vm15, %vm3379_vm1  ;;  %vm3363_vm6 = vcmp.lt.s32.totalorder %v4666_v5, %v5626_v16 }
0x261b   :  { %3970 = vmatpush3.msk.msra.mxu1 %vm3398_vm9, %v4381_v43  ;;  %vm3428_vm14 = vmand %vm3361_vm2, %vm3395_vm3  ;;  %vm5877_vm9 = vcmask 64512  }
0x261c   :  { %3971 = vmatprep.subr.msk.mxu1 %vm3413_vm12, %v4381_v43  ;;  %4111 = vmatprep.subr.msk.mxu0 %vm3428_vm14, %v4381_v43  ;;  %vm3396_vm7 = vmand %vm3329_vm5, %vm3363_vm6 }
0x261d   :  { %3972 = vmatpush3.msk.msra.mxu1 %vm3397_vm0, %v4381_v43  ;;  %4112 = vmatpush3.msk.msra.mxu0 %vm3428_vm14, %v4381_v43  ;;  %vm5878_vm10 = vmmov %vm5877_vm9 }
0x261e   :  { %3973 = vmatprep.subr.msk.mxu1 %vm3412_vm4, %v4381_v43 }
0x261f   :  { %3974 = vmatpush3.msk.msra.mxu1 %vm3396_vm7, %v4381_v43 }
0x26b4   :  { %v3032_v34 = vpop.f32.mrf.mxu1 }
0x26b5   :  { %v4099_v62 = vpop.f32.mrf.mxu0  ;;  %v3033_v18 = vadd.f32 %v3032_v34, %v2948_v6 }
0x26b6   :  { %v3034_v45 = vpop.f32.mrf.mxu1  ;;  %v3115_v51 = vadd.f32 %v4099_v62, %v2956_v13 }
0x26b7   :  { %v3109_v3 = vpop.f32.mrf.mxu0  ;;  %v3035_v29 = vadd.f32 %v3034_v45, %v2952_v52 }
0x26b8   :  { %v3110_v44 = vadd.f32 %v3109_v3, %v2956_v13 }
0x26b9   :  { %v3038_v0 = vpop.f32.mrf.mxu1 }
0x26ba   :  { %v3039_v60 = vadd.f32 %v3038_v0, %v2948_v6 }
0x26bb   :  { %v3040_v25 = vpop.f32.mrf.mxu1 }
0x26bc   :  { %v3041_v7 = vadd.f32 %v3040_v25, %v2952_v52 }
0x26be   :  { %v3208_v57 = vpop.f32.mrf.mxu1 }
0x26bf   :  { %v4110_v37 = vpop.f32.mrf.mxu0  ;;  %v3209_v20 = vadd.f32 %v3208_v57, %v3122_v4 }
0x26c0   :  { %v3210_v16 = vpop.f32.mrf.mxu1  ;;  %v3291_v42 = vadd.f32 %v4110_v37, %v3130_v38 }
0x26c1   :  { %v3211_v33 = vadd.f32 %v3210_v16, %v3126_v41  ;;  %v3285_v5 = vpop.f32.mrf.mxu0  ;;  %v3495_v63 = vmul.f32 %v3209_v20, %v3033_v18 }
0x26c2   :  { %v3286_v26 = vadd.f32 %v3285_v5, %v3130_v38  ;;  %v3214_v40 = vpop.f32.mrf.mxu1  ;;  %v3500_v55 = vmul.f32 %v3291_v42, %v3115_v51 }
0x26c3   :  { %v3496_v58 = vmul.f32 %v3211_v33, %v3035_v29  ;;  %v3215_v10 = vadd.f32 %v3214_v40, %v3122_v4 }
0x26c4   :  { %v3497_v21 = vmul.f32 %v3286_v26, %v3110_v44  ;;  %v3216_v2 = vpop.f32.mrf.mxu1 }
0x26c5   :  { %v3217_v54 = vadd.f32 %v3216_v2, %v3126_v41  ;;  %3571 = vmatprep.mubr.f32.mxu1 %v3496_v58  ;;  %v3498_v59 = vmul.f32 %v3215_v10, %v3039_v60 }
0x26c6   :  { %4113 = vmatprep.mubr.msk.f32.mxu0 %vm5877_vm9, %v3497_v21  ;;  %3572 = vmatmul.mubr.f32.vlgmr.msra.gmra.mxu1 %v3495_v63 }
0x26c7   :  { %v3499_v24 = vmul.f32 %v3217_v54, %v3041_v7  ;;  %4114 = vmatmul.mubr.msk.f32.vlgmr.msra.gmra.mxu0 %vm5878_vm10, %v3500_v55 }
0x26c9   :  { %3576 = vmatprep.mubr.f32.mxu1 %v3499_v24 }
0x26ca   :  { %3577 = vmatmul.mubr.f32.gmra.mxu1 %v3498_v59 }
0x26cb   :  { %4342 = shalt.err (!%p4339_p4)
}
0x26cc   :  { %s4383_s9 = smov 128   ;;  %s4384_s10 = smov 8   ;;  %vm5879_vm11 = vmmov %vm5877_vm9 }
0x26cd   :  { %3674 = dma.vmem_to_hbm [thread:$0]  %s3669_s7, 256, %s5856_s4, [#allocation5], %s4383_s9, %s4383_s9, %s4384_s10   ;;  %vm5880_vm12 = vmmov %vm5877_vm9 }
0x26ce   :  { %s4385_s13 = smov [#allocation6]  }
0x26cf   :  { %s3680_s14 = sshll.u32 %s4385_s13, 4  ;;  %s3681_s14 = int_to_ptr.vmem [resolvable:$true] %s3680_s14 }
0x26d0   :  { %s4351_s15 = scalar_lea.vmem %s3681_s14, 256  ;;  %p4356_p6 = scmp.lt.s32.totalorder %s3681_s14, %s3681_s14 }
0x26d1   :  { %p4352_p5 = scmp.ne.s32.totalorder %s3681_s14, %s4351_s15  ;;  %p4357_p7 = scmp.lt.s32.totalorder %s4351_s15, %s4351_s15 }
0x26d3   :  { %p4358_p8 = por %p4357_p7, %p4356_p6 }
0x26d5   :  { %p4359_p9 = pnand %p4358_p8, %p4352_p5 }
0x2786   :  { %v3975_v14 = vpop.f32.mrf.mxu1 }
0x2787   :  { %v4115_v30 = vpop.f32.mrf.mxu0 }
0x2788   :  { %v3976_v43 = vpop.f32.mrf.mxu1 }
0x2789   :  { %v3977_v19 = vadd.f32 %v3976_v43, %v3975_v14  ;;  %v3648_v28 = vpop.f32.mrf.mxu0 }
0x278a   :  { %v3978_v22 = vpop.f32.mrf.mxu1 }
0x278b   :  { %v3649_v50 = vadd.f32 %v3977_v19, %v3648_v28 }
0x278c   :  { %v3979_v53 = vpop.f32.mrf.mxu1 }
0x278d   :  { %3658 = vst.msk [vmem:[#allocation6] sm:$0xff] %vm5879_vm11, %v3649_v50  ;;  %v3980_v35 = vadd.f32 %v3979_v53, %v3978_v22 }
0x278f   :  { %v3654_v46 = vadd.f32 %v4115_v30, %v3980_v35 }
0x2791   :  { %3662 = vst.msk [vmem:[#allocation6 + $0x8] sm:$0xff] %vm5880_vm12, %v3654_v46 }
0x2792   :  { %4362 = shalt.err (!%p4359_p9)
}
0x2793   :  { %3686 = dma.vmem_to_hbm [thread:$0]  %s3681_s14, 256, %s5857_s5, [#allocation7], %s4383_s9, %s4383_s9, %s4384_s10  }
0x2794   :  { %4371 = dma.done.wait [#allocation5], 256  }
0x2795   :  { %4372 = vsyncadd [#allocation5], 4294967040 }
0x2796   :  { %4373 = dma.done.wait [#allocation7], 256  }
0x2797   :  { %4374 = vsyncadd [#allocation7], 4294967040 }
0x2798   :  { %3693 = vsyncpa [#allocation5], 1 }
0x2799   :  { %3694 = vsyncpa [#allocation7], 1 }

</bundles_post_ra>
